<compile_context>
chip_gen: v5e
topology: v5e:2x2
jax: 0.10.0
libtpu: 0.0.40
codegen_flags: <defaults>
</compile_context>

<pallas_src>
import numpy as np
import jax
import jax.numpy as jnp
from jax.experimental import pallas as pl
from jax.experimental.pallas import tpu as pltpu

EPS = 1e-5


# ------------------------------------------------------------------ kernel body
def make_pna_kernel(n_src_total: int):
    """n_src_total (== N on the dense complete graph) normalizes the streamed
    sum / sum-of-squares accumulators."""
    inv_n = 1.0 / float(n_src_total)

    def kernel(feat_dst_ref, s_t_ref, dpre_ref, ef_ref, w1e_b_ref,
               w2h_ref, w2e_ref, b2_ref, w3_ref, b3_ref,
               out_ref,
               sum_sc, sq_sc, max_sc, min_sc):
        j = pl.program_id(1)                       # src-tile index (reduction axis)

        @pl.when(j == 0)
        def _():
            sum_sc[...] = jnp.zeros_like(sum_sc)
            sq_sc[...] = jnp.zeros_like(sq_sc)
            max_sc[...] = jnp.full_like(max_sc, -jnp.inf)
            min_sc[...] = jnp.full_like(min_sc, jnp.inf)

        # ---- pretrans (1 layer, last_activation='none'), lane-dense layout:
        #   msg[d, f, s] = (w1e^T @ ef[d])[f, s] + (feat_src @ w1_src)^T[f, s]
        #                  + (feat_dst @ w1_dst + b1)[d, f]
        ef = ef_ref[...]                           # [TD, E, TS]   (f32 or bf16)
        eW = jax.lax.dot_general(                  # batched [F,E] x [E,TS] -> [TD,F,TS]
            w1e_b_ref[...], ef,
            dimension_numbers=(((2,), (1,)), ((0,), (0,))),
            preferred_element_type=jnp.float32)
        msg = eW + s_t_ref[...] + dpre_ref[...][:, :, None]   # [TD, F, TS] f32

        # ---- streaming aggregation: lane-partial accumulators, purely elementwise.
        sum_sc[...] += msg
        sq_sc[...] += msg * msg
        max_sc[...] = jnp.maximum(max_sc[...], msg)
        min_sc[...] = jnp.minimum(min_sc[...], msg)
        # TODO(synk): the sum/sumsq accumulators could be derived algebraically from
        # (sum_s ef) to skip one msg pass; kept explicit for clarity.

        @pl.when(j == pl.num_programs(1) - 1)
        def _():
            feat_dst = feat_dst_ref[...]                       # [TD, F]
            mean = jnp.sum(sum_sc[...], axis=-1) * inv_n       # single cross-lane reduce
            mean_sq = jnp.sum(sq_sc[...], axis=-1) * inv_n
            var = jnp.maximum(mean_sq - mean * mean, 0.0)      # aggregate_var (relu clamp)
            std = jnp.sqrt(var + EPS)                          # aggregate_std
            mx = jnp.max(max_sc[...], axis=-1)
            mn = jnp.min(min_sc[...], axis=-1)

            # posttrans layer 1 over cat([h, 12 scaled aggregations]) + relu.
            # The 3 degree scalers are compile-time constants (D == N) folded into
            # w2e on the host -> 4 matmuls instead of 12.
            y = jnp.dot(feat_dst, w2h_ref[...], preferred_element_type=jnp.float32) + b2_ref[...]
            y = y + jnp.dot(mean, w2e_ref[0], preferred_element_type=jnp.float32)
            y = y + jnp.dot(mx, w2e_ref[1], preferred_element_type=jnp.float32)
            y = y + jnp.dot(mn, w2e_ref[2], preferred_element_type=jnp.float32)
            y = y + jnp.dot(std, w2e_ref[3], preferred_element_type=jnp.float32)
            y = jnp.maximum(y, 0.0)                            # mid_activation='relu'

            # posttrans layer 2 (last_activation='none') + residual (out_dim == in_dim)
            out = jnp.dot(y, w3_ref[...], preferred_element_type=jnp.float32) + b3_ref[...]
            out_ref[...] = (out + feat_dst).astype(out_ref.dtype)

    return kernel


# ------------------------------------------------------------------ helpers
def _pick_tile(n: int, target: int, mult: int) -> int:
    """Largest t <= target with n % t == 0 and t % mult == 0; falls back to n (full)."""
    if n <= target:
        return n
    for t in range(min(target, n), mult - 1, -1):
        if n % t == 0 and t % mult == 0:
            return t
    return n


def _padded_bytes(shape, dtype) -> int:
    """Bytes of one VMEM buffer after (sublane, lane) tiling/padding."""
    item = jnp.dtype(dtype).itemsize
    dims = list(shape)
    if len(dims) >= 1:
        dims[-1] = -(-dims[-1] // 128) * 128
    if len(dims) >= 2:
        sub = max(8, 32 // item)
        dims[-2] = -(-dims[-2] // sub) * sub
    n = 1
    for d in dims:
        n *= int(d)
    return n * item


# ------------------------------------------------------------------ wrapper
def pna_layer_pallas(node_feat, edge_feat, params, avg_d_log=1.0,
                     tile_dst=None, tile_src=None,
                     edge_dtype=jnp.bfloat16, vmem_limit_bytes=None):
    N, F = node_feat.shape
    E = edge_feat.shape[-1]
    O = params["w3"].shape[-1]
    assert O == F, "residual path requires out_dim == in_dim (mirrors PyTorch residual gating)"
    A, S = 4, 3

    ef_dt = jnp.dtype(edge_dtype) if edge_dtype is not None else jnp.dtype(edge_feat.dtype)

    # --- generation-aware tiling + VMEM budget --------------------------------
    try:
        vmem_cap = int(getattr(pltpu.get_tpu_info(), "vmem_capacity_bytes", 64 << 20))
    except Exception:
        vmem_cap = 64 << 20                       # v7x-safe fallback
    small_vmem = vmem_cap <= (96 << 20)           # v7x: 64 MiB physical VMEM

    if tile_dst is None:
        tile_dst = _pick_tile(N, 64 if small_vmem else 128, 8)
        # keep >= 2 dst tiles so the "parallel" axis can shard across TensorCores
        if tile_dst == N and N >= 16 and (N // 2) % 8 == 0:
            tile_dst = N // 2
    if tile_src is None:
        tile_src = _pick_tile(N, 128, 128)        # lane axis: multiple of 128 (or full)

    def footprint(td, ts):
        io = [((td, F), jnp.float32), ((F, ts), jnp.float32), ((td, F), jnp.float32),
              ((td, E, ts), ef_dt), ((td, F, E), ef_dt),
              ((F, O), jnp.float32), ((A, F, O), jnp.float32), ((1, O), jnp.float32),
              ((O, O), jnp.float32), ((1, O), jnp.float32), ((td, O), jnp.float32)]
        b = sum(2 * _padded_bytes(s, d) for s, d in io)          # double-buffered I/O
        b += 4 * _padded_bytes((td, F, ts), jnp.float32)         # accumulator scratch
        b += 2 * _padded_bytes((td, F, ts), jnp.float32)         # eW / msg temporaries
        return b

    budget = int(0.45 * vmem_cap)
    while (footprint(tile_dst, tile_src) > budget and tile_dst >= 16
           and (tile_dst // 2) % 8 == 0 and N % (tile_dst // 2) == 0):
        tile_dst //= 2

    assert N % tile_dst == 0 and N % tile_src == 0, "tiles must divide N"
    assert tile_dst % 8 == 0 or tile_dst == N
    assert tile_src % 128 == 0 or tile_src == N

    if vmem_limit_bytes is None:
        vmem_limit_bytes = int(min(int(0.9 * vmem_cap), 128 << 20,
                                   max(int(1.3 * footprint(tile_dst, tile_src)) + (4 << 20),
                                       32 << 20)))

    # --- host-side precompute (hoisted out of the per-step critical path) ------
    # degree scalers folded into the aggregator weight blocks:
    #   w2_eff[a] = sum_s scale_s * w2_agg[s*A + a]   (D == N on the dense graph)
    amp = float(np.log(N + 1) / avg_d_log)
    att = float(avg_d_log / np.log(N + 1))
    scales = jnp.asarray([1.0, amp, att], dtype=jnp.float32)                        # (S,)
    w2_eff = jnp.einsum("s,safo->afo", scales,
                        params["w2_agg"].reshape(S, A, F, O).astype(jnp.float32))   # (A, F, O)

    s_t = (node_feat.astype(jnp.float32) @ params["w1_src"]).T                      # [F, N]
    dpre = node_feat.astype(jnp.float32) @ params["w1_dst"] + params["b1"]          # [N, F]

    # lane-dense mailbox: [dst, src, E] -> [dst, E, src]; narrow the only N^2 stream.
    ef_t = jnp.transpose(edge_feat, (0, 2, 1)).astype(ef_dt)                        # [N, E, N]
    w1e_b = jnp.broadcast_to(params["w1_e"].T.astype(ef_dt)[None], (tile_dst, F, E))
    # TODO(synk): on v7x the edge stream could additionally be quantized to fp8.

    weights = (w1e_b, params["w2_h"].astype(jnp.float32), w2_eff,
               params["b2"].astype(jnp.float32), params["w3"].astype(jnp.float32),
               params["b3"].astype(jnp.float32))

    def _full(x):       # resident weight: constant index_map => fetched once
        return pl.BlockSpec(x.shape, lambda i, j, nd=x.ndim: (0,) * nd)

    grid = (N // tile_dst, N // tile_src)
    in_specs = [
        pl.BlockSpec((tile_dst, F), lambda i, j: (i, 0)),                # node feat (dst rows)
        pl.BlockSpec((F, tile_src), lambda i, j: (0, j)),                # (feat @ w1_src)^T
        pl.BlockSpec((tile_dst, F), lambda i, j: (i, 0)),                # feat @ w1_dst + b1
        pl.BlockSpec((tile_dst, E, tile_src), lambda i, j: (i, 0, j)),   # lane-dense mailbox tile
    ] + [_full(w) for w in weights]

    wbytes = sum(int(np.prod(w.shape)) * jnp.dtype(w.dtype).itemsize for w in weights)
    cost = pl.CostEstimate(
        flops=int(2 * N * N * E * F                   # edge pretrans contraction
                  + 8 * N * N * F                     # msg build + 4 elementwise aggregations
                  + 10 * N * F * O + 2 * N * O * O),  # posttrans MLP
        transcendentals=int(N * F),                   # sqrt in the std aggregator
        bytes_accessed=int(N * N * E * ef_dt.itemsize + 5 * N * F * 4 + wbytes),
    )

    kernel = make_pna_kernel(N)
    return pl.pallas_call(
        kernel,
        out_shape=jax.ShapeDtypeStruct((N, O), jnp.float32),
        grid=grid,
        in_specs=in_specs,
        out_specs=pl.BlockSpec((tile_dst, O), lambda i, j: (i, 0)),
        scratch_shapes=[pltpu.VMEM((tile_dst, F, tile_src), jnp.float32)
                        for _ in range(4)],
        compiler_params=pltpu.CompilerParams(
            dimension_semantics=("parallel", "arbitrary"),
            vmem_limit_bytes=vmem_limit_bytes),
        cost_estimate=cost,
    )(node_feat.astype(jnp.float32), s_t.astype(jnp.float32),
      dpre.astype(jnp.float32), ef_t, *weights)


# ------------------------------------------------------------------ reference
def pna_layer_reference(feat, ef, params, avg_d_log=1.0):
    """Pure-JAX reference mirroring the PyTorch forward literally (with concats)."""
    N, F = feat.shape
    W1 = jnp.concatenate([params["w1_src"], params["w1_dst"], params["w1_e"]], axis=0)
    src = jnp.broadcast_to(feat[None, :, :], (N, N, F))   # [v, u] -> feat[u]
    dst = jnp.broadcast_to(feat[:, None, :], (N, N, F))   # [v, u] -> feat[v]
    z2 = jnp.concatenate([src, dst, ef], axis=-1)
    msg = z2 @ W1 + params["b1"]                          # mailbox [N, D=N, F]

    mean = msg.mean(axis=-2)
    mx = msg.max(axis=-2)
    mn = msg.min(axis=-2)
    var = jnp.maximum((msg * msg).mean(axis=-2) - mean * mean, 0.0)
    std = jnp.sqrt(var + EPS)
    h4 = jnp.concatenate([mean, mx, mn, std], axis=-1)

    D = N
    amp = np.log(D + 1) / avg_d_log
    att = avg_d_log / np.log(D + 1)
    h12 = jnp.concatenate([h4, h4 * amp, h4 * att], axis=-1)

    h_cat = jnp.concatenate([feat, h12], axis=-1)
    W2 = jnp.concatenate([params["w2_h"]] + [params["w2_agg"][k] for k in range(12)], axis=0)
    y = jnp.maximum(h_cat @ W2 + params["b2"], 0.0)
    out = y @ params["w3"] + params["b3"]
    return out + feat


if __name__ == "__main__":
    # Small primary shapes: N=16 nodes, in_dim = out_dim = 32, edge feature dim = 8.
    A, S = 4, 3
    N, F, E = 16, 32, 8
    O = F
    avg_d_log = 1.0                  # default avg_d={'log': 1.0}

    key = jax.random.PRNGKey(0)
    ks = jax.random.split(key, 11)

    def init(k, shape, fan_in):
        return (jax.random.normal(k, shape, jnp.float32) / np.sqrt(fan_in)).astype(jnp.float32)

    params = {
        # pretrans: Linear(2F + E -> F), split by concat blocks
        "w1_src": init(ks[0], (F, F), 2 * F + E),
        "w1_dst": init(ks[1], (F, F), 2 * F + E),
        "w1_e":   init(ks[2], (E, F), 2 * F + E),
        "b1":     init(ks[3], (1, F), 2 * F + E),
        # posttrans layer 1: Linear((A*S + 1) * F -> O), split by concat blocks
        "w2_h":   init(ks[4], (F, O), (A * S + 1) * F),
        "w2_agg": init(ks[5], (A * S, F, O), (A * S + 1) * F),
        "b2":     init(ks[6], (1, O), (A * S + 1) * F),
        # posttrans layer 2: Linear(O -> O)
        "w3":     init(ks[7], (O, O), O),
        "b3":     init(ks[8], (1, O), O),
    }

    node_feat = jax.random.normal(ks[9], (N, F), jnp.float32)
    edge_feat = jax.random.normal(ks[10], (N, N, E), jnp.float32)   # [dst, src, E]

    ref = jax.block_until_ready(pna_layer_reference(node_feat, edge_feat, params, avg_d_log))

    # strict f32 parity with the PyTorch layer
    out_f32 = jax.block_until_ready(
        pna_layer_pallas(node_feat, edge_feat, params, avg_d_log, edge_dtype=None))
    np.testing.assert_allclose(np.asarray(out_f32), np.asarray(ref), rtol=1e-3, atol=1e-3)

    # default path: bf16 edge stream (the only N^2-scale HBM stream), f32 accumulation
    out_bf16 = jax.block_until_ready(
        pna_layer_pallas(node_feat, edge_feat, params, avg_d_log))
    np.testing.assert_allclose(np.asarray(out_bf16), np.asarray(ref), rtol=5e-2, atol=5e-2)

    # medium shape exercising multi-tile streaming over src + >=2 parallel dst tiles
    N2 = 256
    k2 = jax.random.split(jax.random.PRNGKey(1), 2)
    node2 = jax.random.normal(k2[0], (N2, F), jnp.float32)
    edge2 = jax.random.normal(k2[1], (N2, N2, E), jnp.float32)
    ref2 = jax.block_until_ready(pna_layer_reference(node2, edge2, params, avg_d_log))
    out2 = jax.block_until_ready(
        pna_layer_pallas(node2, edge2, params, avg_d_log, edge_dtype=None))
    np.testing.assert_allclose(np.asarray(out2), np.asarray(ref2), rtol=2e-3, atol=2e-3)

    # TODO(synk): sparse / variable-degree DGL graphs would need scalar-prefetch gather of
    # per-node neighbour lists; this dense complete-graph instantiation fixes D = N.
    print("KERNEL_OK")
</pallas_src>

<mosaic_0001>
module attributes {stable_mosaic.version = 11 : i64} {
  func.func @kernel(%arg0: i32, %arg1: i32, %arg2: memref<8x32xf32, #tpu.memory_space<vmem>>, %arg3: memref<32x16xf32, #tpu.memory_space<vmem>>, %arg4: memref<8x32xf32, #tpu.memory_space<vmem>>, %arg5: memref<8x8x16xf32, #tpu.memory_space<vmem>>, %arg6: memref<8x32x8xf32, #tpu.memory_space<vmem>>, %arg7: memref<32x32xf32, #tpu.memory_space<vmem>>, %arg8: memref<4x32x32xf32, #tpu.memory_space<vmem>>, %arg9: memref<1x32xf32, #tpu.memory_space<vmem>>, %arg10: memref<32x32xf32, #tpu.memory_space<vmem>>, %arg11: memref<1x32xf32, #tpu.memory_space<vmem>>, %arg12: memref<8x32xf32, #tpu.memory_space<vmem>>, %arg13: memref<8x32x16xf32, #tpu.memory_space<vmem>>, %arg14: memref<8x32x16xf32, #tpu.memory_space<vmem>>, %arg15: memref<8x32x16xf32, #tpu.memory_space<vmem>>, %arg16: memref<8x32x16xf32, #tpu.memory_space<vmem>>) attributes {dimension_semantics = [#tpu.dimension_semantics<parallel>, #tpu.dimension_semantics<arbitrary>], iteration_bounds = array<i64: 2, 1>, scalar_prefetch = 0 : i64, scratch_operands = 4 : i64, tpu.core_type = #tpu.core_type<tc>, window_params = [{transform_indices = @transform_0, window_bounds = array<i64: 8, 32>}, {transform_indices = @transform_1, window_bounds = array<i64: 32, 16>}, {transform_indices = @transform_2, window_bounds = array<i64: 8, 32>}, {transform_indices = @transform_3, window_bounds = array<i64: 8, 8, 16>}, {pipeline_mode = #tpu.pipeline_mode<synchronous>, transform_indices = @transform_4, window_bounds = array<i64: 8, 32, 8>}, {pipeline_mode = #tpu.pipeline_mode<synchronous>, transform_indices = @transform_5, window_bounds = array<i64: 32, 32>}, {pipeline_mode = #tpu.pipeline_mode<synchronous>, transform_indices = @transform_6, window_bounds = array<i64: 4, 32, 32>}, {pipeline_mode = #tpu.pipeline_mode<synchronous>, transform_indices = @transform_7, window_bounds = array<i64: 1, 32>}, {pipeline_mode = #tpu.pipeline_mode<synchronous>, transform_indices = @transform_8, window_bounds = array<i64: 32, 32>}, {pipeline_mode = #tpu.pipeline_mode<synchronous>, transform_indices = @transform_9, window_bounds = array<i64: 1, 32>}, {transform_indices = @transform_10, window_bounds = array<i64: 8, 32>}]} {
    %c0_i32 = arith.constant 0 : i32
    %0 = arith.cmpi eq, %arg1, %c0_i32 : i32
    %1 = arith.extui %0 : i1 to i32
    %c0_i32_0 = arith.constant 0 : i32
    %2 = arith.cmpi ne, %1, %c0_i32_0 : i32
    scf.if %2 {
      %cst_36 = arith.constant 0.000000e+00 : f32
      %30 = vector.broadcast %cst_36 : f32 to vector<8x32x16xf32>
      %c0_37 = arith.constant 0 : index
      %c0_38 = arith.constant 0 : index
      %c0_39 = arith.constant 0 : index
      %31 = vector.load %arg13[%c0_37, %c0_38, %c0_39] : memref<8x32x16xf32, #tpu.memory_space<vmem>>, vector<8x32x16xf32>
      tpu.vector_store %arg13[%c0_37, %c0_38, %c0_39], %30 {strides = array<i32>} : memref<8x32x16xf32, #tpu.memory_space<vmem>>, vector<8x32x16xf32>,
      %cst_40 = arith.constant 0.000000e+00 : f32
      %32 = vector.broadcast %cst_40 : f32 to vector<8x32x16xf32>
      %c0_41 = arith.constant 0 : index
      %c0_42 = arith.constant 0 : index
      %c0_43 = arith.constant 0 : index
      %33 = vector.load %arg14[%c0_41, %c0_42, %c0_43] : memref<8x32x16xf32, #tpu.memory_space<vmem>>, vector<8x32x16xf32>
      tpu.vector_store %arg14[%c0_41, %c0_42, %c0_43], %32 {strides = array<i32>} : memref<8x32x16xf32, #tpu.memory_space<vmem>>, vector<8x32x16xf32>,
      %cst_44 = arith.constant 0xFF800000 : f32
      %34 = vector.broadcast %cst_44 : f32 to vector<8x32x16xf32>
      %c0_45 = arith.constant 0 : index
      %c0_46 = arith.constant 0 : index
      %c0_47 = arith.constant 0 : index
      %35 = vector.load %arg15[%c0_45, %c0_46, %c0_47] : memref<8x32x16xf32, #tpu.memory_space<vmem>>, vector<8x32x16xf32>
      tpu.vector_store %arg15[%c0_45, %c0_46, %c0_47], %34 {strides = array<i32>} : memref<8x32x16xf32, #tpu.memory_space<vmem>>, vector<8x32x16xf32>,
      %cst_48 = arith.constant 0x7F800000 : f32
      %36 = vector.broadcast %cst_48 : f32 to vector<8x32x16xf32>
      %c0_49 = arith.constant 0 : index
      %c0_50 = arith.constant 0 : index
      %c0_51 = arith.constant 0 : index
      %37 = vector.load %arg16[%c0_49, %c0_50, %c0_51] : memref<8x32x16xf32, #tpu.memory_space<vmem>>, vector<8x32x16xf32>
      tpu.vector_store %arg16[%c0_49, %c0_50, %c0_51], %36 {strides = array<i32>} : memref<8x32x16xf32, #tpu.memory_space<vmem>>, vector<8x32x16xf32>,
    } else {
    }
    %c0 = arith.constant 0 : index
    %c0_1 = arith.constant 0 : index
    %c0_2 = arith.constant 0 : index
    %3 = vector.load %arg5[%c0, %c0_1, %c0_2] : memref<8x8x16xf32, #tpu.memory_space<vmem>>, vector<8x8x16xf32>
    %c0_3 = arith.constant 0 : index
    %c0_4 = arith.constant 0 : index
    %c0_5 = arith.constant 0 : index
    %4 = vector.load %arg6[%c0_3, %c0_4, %c0_5] : memref<8x32x8xf32, #tpu.memory_space<vmem>>, vector<8x32x8xf32>
    %cst = arith.constant dense<0.000000e+00> : vector<8x32x16xf32>
    %5 = tpu.matmul %4, %3, %cst {dimension_numbers = #tpu.dot_dimension_numbers<[2], [1], [1], [2], [0, 0, 0, 1, 1, 2], [0], [0]>} : vector<8x32x8xf32>, vector<8x8x16xf32>, vector<8x32x16xf32> -> vector<8x32x16xf32>
    %c0_6 = arith.constant 0 : index
    %c0_7 = arith.constant 0 : index
    %6 = vector.load %arg3[%c0_6, %c0_7] : memref<32x16xf32, #tpu.memory_space<vmem>>, vector<32x16xf32>
    %7 = vector.shape_cast %6 : vector<32x16xf32> to vector<1x32x16xf32>
    %8 = vector.broadcast %7 : vector<1x32x16xf32> to vector<8x32x16xf32>
    %9 = arith.addf %5, %8 : vector<8x32x16xf32>
    %c0_8 = arith.constant 0 : index
    %c0_9 = arith.constant 0 : index
    %10 = vector.load %arg4[%c0_8, %c0_9] : memref<8x32xf32, #tpu.memory_space<vmem>>, vector<8x32xf32>
    %11 = vector.shape_cast %10 : vector<8x32xf32> to vector<8x32x1xf32>
    %12 = vector.broadcast %11 : vector<8x32x1xf32> to vector<8x32x16xf32>
    %13 = arith.addf %9, %12 : vector<8x32x16xf32>
    %c0_10 = arith.constant 0 : index
    %c0_11 = arith.constant 0 : index
    %c0_12 = arith.constant 0 : index
    %14 = vector.load %arg13[%c0_10, %c0_11, %c0_12] : memref<8x32x16xf32, #tpu.memory_space<vmem>>, vector<8x32x16xf32>
    %15 = arith.addf %14, %13 : vector<8x32x16xf32>
    %c0_13 = arith.constant 0 : index
    %c0_14 = arith.constant 0 : index
    %c0_15 = arith.constant 0 : index
    %16 = vector.load %arg13[%c0_13, %c0_14, %c0_15] : memref<8x32x16xf32, #tpu.memory_space<vmem>>, vector<8x32x16xf32>
    tpu.vector_store %arg13[%c0_13, %c0_14, %c0_15], %15 {strides = array<i32>} : memref<8x32x16xf32, #tpu.memory_space<vmem>>, vector<8x32x16xf32>,
    %c0_16 = arith.constant 0 : index
    %c0_17 = arith.constant 0 : index
    %c0_18 = arith.constant 0 : index
    %17 = vector.load %arg14[%c0_16, %c0_17, %c0_18] : memref<8x32x16xf32, #tpu.memory_space<vmem>>, vector<8x32x16xf32>
    %18 = arith.mulf %13, %13 : vector<8x32x16xf32>
    %19 = arith.addf %17, %18 : vector<8x32x16xf32>
    %c0_19 = arith.constant 0 : index
    %c0_20 = arith.constant 0 : index
    %c0_21 = arith.constant 0 : index
    %20 = vector.load %arg14[%c0_19, %c0_20, %c0_21] : memref<8x32x16xf32, #tpu.memory_space<vmem>>, vector<8x32x16xf32>
    tpu.vector_store %arg14[%c0_19, %c0_20, %c0_21], %19 {strides = array<i32>} : memref<8x32x16xf32, #tpu.memory_space<vmem>>, vector<8x32x16xf32>,
    %c0_22 = arith.constant 0 : index
    %c0_23 = arith.constant 0 : index
    %c0_24 = arith.constant 0 : index
    %21 = vector.load %arg15[%c0_22, %c0_23, %c0_24] : memref<8x32x16xf32, #tpu.memory_space<vmem>>, vector<8x32x16xf32>
    %22 = arith.maximumf %21, %13 : vector<8x32x16xf32>
    %c0_25 = arith.constant 0 : index
    %c0_26 = arith.constant 0 : index
    %c0_27 = arith.constant 0 : index
    %23 = vector.load %arg15[%c0_25, %c0_26, %c0_27] : memref<8x32x16xf32, #tpu.memory_space<vmem>>, vector<8x32x16xf32>
    tpu.vector_store %arg15[%c0_25, %c0_26, %c0_27], %22 {strides = array<i32>} : memref<8x32x16xf32, #tpu.memory_space<vmem>>, vector<8x32x16xf32>,
    %c0_28 = arith.constant 0 : index
    %c0_29 = arith.constant 0 : index
    %c0_30 = arith.constant 0 : index
    %24 = vector.load %arg16[%c0_28, %c0_29, %c0_30] : memref<8x32x16xf32, #tpu.memory_space<vmem>>, vector<8x32x16xf32>
    %25 = arith.minimumf %24, %13 : vector<8x32x16xf32>
    %c0_31 = arith.constant 0 : index
    %c0_32 = arith.constant 0 : index
    %c0_33 = arith.constant 0 : index
    %26 = vector.load %arg16[%c0_31, %c0_32, %c0_33] : memref<8x32x16xf32, #tpu.memory_space<vmem>>, vector<8x32x16xf32>
    tpu.vector_store %arg16[%c0_31, %c0_32, %c0_33], %25 {strides = array<i32>} : memref<8x32x16xf32, #tpu.memory_space<vmem>>, vector<8x32x16xf32>,
    %c0_i32_34 = arith.constant 0 : i32
    %27 = arith.cmpi eq, %arg1, %c0_i32_34 : i32
    %28 = arith.extui %27 : i1 to i32
    %c0_i32_35 = arith.constant 0 : i32
    %29 = arith.cmpi ne, %28, %c0_i32_35 : i32
    scf.if %29 {
      %c0_36 = arith.constant 0 : index
      %c0_37 = arith.constant 0 : index
      %30 = vector.load %arg2[%c0_36, %c0_37] : memref<8x32xf32, #tpu.memory_space<vmem>>, vector<8x32xf32>
      %c0_38 = arith.constant 0 : index
      %c0_39 = arith.constant 0 : index
      %c0_40 = arith.constant 0 : index
      %31 = vector.load %arg13[%c0_38, %c0_39, %c0_40] : memref<8x32x16xf32, #tpu.memory_space<vmem>>, vector<8x32x16xf32>
      %cst_41 = arith.constant dense<0.000000e+00> : vector<8x32xf32>
      %32 = vector.multi_reduction <add>, %31, %cst_41 [2] : vector<8x32x16xf32> to vector<8x32xf32>
      %cst_42 = arith.constant 6.250000e-02 : f32
      %33 = vector.broadcast %cst_42 : f32 to vector<8x32xf32>
      %34 = arith.mulf %32, %33 : vector<8x32xf32>
      %c0_43 = arith.constant 0 : index
      %c0_44 = arith.constant 0 : index
      %c0_45 = arith.constant 0 : index
      %35 = vector.load %arg14[%c0_43, %c0_44, %c0_45] : memref<8x32x16xf32, #tpu.memory_space<vmem>>, vector<8x32x16xf32>
      %cst_46 = arith.constant dense<0.000000e+00> : vector<8x32xf32>
      %36 = vector.multi_reduction <add>, %35, %cst_46 [2] : vector<8x32x16xf32> to vector<8x32xf32>
      %cst_47 = arith.constant 6.250000e-02 : f32
      %37 = vector.broadcast %cst_47 : f32 to vector<8x32xf32>
      %38 = arith.mulf %36, %37 : vector<8x32xf32>
      %39 = arith.mulf %34, %34 : vector<8x32xf32>
      %40 = arith.subf %38, %39 : vector<8x32xf32>
      %cst_48 = arith.constant 0.000000e+00 : f32
      %41 = vector.broadcast %cst_48 : f32 to vector<8x32xf32>
      %42 = arith.maximumf %40, %41 : vector<8x32xf32>
      %cst_49 = arith.constant 9.99999974E-6 : f32
      %43 = vector.broadcast %cst_49 : f32 to vector<8x32xf32>
      %44 = arith.addf %42, %43 : vector<8x32xf32>
      %45 = math.sqrt %44 : vector<8x32xf32>
      %c0_50 = arith.constant 0 : index
      %c0_51 = arith.constant 0 : index
      %c0_52 = arith.constant 0 : index
      %46 = vector.load %arg15[%c0_50, %c0_51, %c0_52] : memref<8x32x16xf32, #tpu.memory_space<vmem>>, vector<8x32x16xf32>
      %cst_53 = arith.constant dense<0xFF800000> : vector<8x32xf32>
      %47 = vector.multi_reduction <maximumf>, %46, %cst_53 [2] : vector<8x32x16xf32> to vector<8x32xf32>
      %c0_54 = arith.constant 0 : index
      %c0_55 = arith.constant 0 : index
      %c0_56 = arith.constant 0 : index
      %48 = vector.load %arg16[%c0_54, %c0_55, %c0_56] : memref<8x32x16xf32, #tpu.memory_space<vmem>>, vector<8x32x16xf32>
      %cst_57 = arith.constant dense<0x7F800000> : vector<8x32xf32>
      %49 = vector.multi_reduction <minimumf>, %48, %cst_57 [2] : vector<8x32x16xf32> to vector<8x32xf32>
      %c0_58 = arith.constant 0 : index
      %c0_59 = arith.constant 0 : index
      %50 = vector.load %arg7[%c0_58, %c0_59] : memref<32x32xf32, #tpu.memory_space<vmem>>, vector<32x32xf32>
      %cst_60 = arith.constant dense<0.000000e+00> : vector<8x32xf32>
      %51 = tpu.matmul %30, %50, %cst_60 {dimension_numbers = #tpu.dot_dimension_numbers<[1], [0], [0], [1], [0, 0, 1, 1], [], []>} : vector<8x32xf32>, vector<32x32xf32>, vector<8x32xf32> -> vector<8x32xf32>
      %c0_61 = arith.constant 0 : index
      %c0_62 = arith.constant 0 : index
      %52 = vector.load %arg9[%c0_61, %c0_62] : memref<1x32xf32, #tpu.memory_space<vmem>>, vector<1x32xf32>
      %53 = vector.broadcast %52 : vector<1x32xf32> to vector<8x32xf32>
      %54 = arith.addf %51, %53 : vector<8x32xf32>
      %c0_63 = arith.constant 0 : index
      %c0_64 = arith.constant 0 : index
      %c0_65 = arith.constant 0 : index
      %55 = vector.load %arg8[%c0_63, %c0_64, %c0_65] : memref<4x32x32xf32, #tpu.memory_space<vmem>>, vector<1x32x32xf32>
      %56 = vector.shape_cast %55 : vector<1x32x32xf32> to vector<32x32xf32>
      %cst_66 = arith.constant dense<0.000000e+00> : vector<8x32xf32>
      %57 = tpu.matmul %34, %56, %cst_66 {dimension_numbers = #tpu.dot_dimension_numbers<[1], [0], [0], [1], [0, 0, 1, 1], [], []>} : vector<8x32xf32>, vector<32x32xf32>, vector<8x32xf32> -> vector<8x32xf32>
      %58 = arith.addf %54, %57 : vector<8x32xf32>
      %c1 = arith.constant 1 : index
      %c0_67 = arith.constant 0 : index
      %c0_68 = arith.constant 0 : index
      %59 = vector.load %arg8[%c1, %c0_67, %c0_68] : memref<4x32x32xf32, #tpu.memory_space<vmem>>, vector<1x32x32xf32>
      %60 = vector.shape_cast %59 : vector<1x32x32xf32> to vector<32x32xf32>
      %cst_69 = arith.constant dense<0.000000e+00> : vector<8x32xf32>
      %61 = tpu.matmul %47, %60, %cst_69 {dimension_numbers = #tpu.dot_dimension_numbers<[1], [0], [0], [1], [0, 0, 1, 1], [], []>} : vector<8x32xf32>, vector<32x32xf32>, vector<8x32xf32> -> vector<8x32xf32>
      %62 = arith.addf %58, %61 : vector<8x32xf32>
      %c2 = arith.constant 2 : index
      %c0_70 = arith.constant 0 : index
      %c0_71 = arith.constant 0 : index
      %63 = vector.load %arg8[%c2, %c0_70, %c0_71] : memref<4x32x32xf32, #tpu.memory_space<vmem>>, vector<1x32x32xf32>
      %64 = vector.shape_cast %63 : vector<1x32x32xf32> to vector<32x32xf32>
      %cst_72 = arith.constant dense<0.000000e+00> : vector<8x32xf32>
      %65 = tpu.matmul %49, %64, %cst_72 {dimension_numbers = #tpu.dot_dimension_numbers<[1], [0], [0], [1], [0, 0, 1, 1], [], []>} : vector<8x32xf32>, vector<32x32xf32>, vector<8x32xf32> -> vector<8x32xf32>
      %66 = arith.addf %62, %65 : vector<8x32xf32>
      %c3 = arith.constant 3 : index
      %c0_73 = arith.constant 0 : index
      %c0_74 = arith.constant 0 : index
      %67 = vector.load %arg8[%c3, %c0_73, %c0_74] : memref<4x32x32xf32, #tpu.memory_space<vmem>>, vector<1x32x32xf32>
      %68 = vector.shape_cast %67 : vector<1x32x32xf32> to vector<32x32xf32>
      %cst_75 = arith.constant dense<0.000000e+00> : vector<8x32xf32>
      %69 = tpu.matmul %45, %68, %cst_75 {dimension_numbers = #tpu.dot_dimension_numbers<[1], [0], [0], [1], [0, 0, 1, 1], [], []>} : vector<8x32xf32>, vector<32x32xf32>, vector<8x32xf32> -> vector<8x32xf32>
      %70 = arith.addf %66, %69 : vector<8x32xf32>
      %cst_76 = arith.constant 0.000000e+00 : f32
      %71 = vector.broadcast %cst_76 : f32 to vector<8x32xf32>
      %72 = arith.maximumf %70, %71 : vector<8x32xf32>
      %c0_77 = arith.constant 0 : index
      %c0_78 = arith.constant 0 : index
      %73 = vector.load %arg10[%c0_77, %c0_78] : memref<32x32xf32, #tpu.memory_space<vmem>>, vector<32x32xf32>
      %cst_79 = arith.constant dense<0.000000e+00> : vector<8x32xf32>
      %74 = tpu.matmul %72, %73, %cst_79 {dimension_numbers = #tpu.dot_dimension_numbers<[1], [0], [0], [1], [0, 0, 1, 1], [], []>} : vector<8x32xf32>, vector<32x32xf32>, vector<8x32xf32> -> vector<8x32xf32>
      %c0_80 = arith.constant 0 : index
      %c0_81 = arith.constant 0 : index
      %75 = vector.load %arg11[%c0_80, %c0_81] : memref<1x32xf32, #tpu.memory_space<vmem>>, vector<1x32xf32>
      %76 = vector.broadcast %75 : vector<1x32xf32> to vector<8x32xf32>
      %77 = arith.addf %74, %76 : vector<8x32xf32>
      %78 = arith.addf %77, %30 : vector<8x32xf32>
      %c0_82 = arith.constant 0 : index
      %c0_83 = arith.constant 0 : index
      %79 = vector.load %arg12[%c0_82, %c0_83] : memref<8x32xf32, #tpu.memory_space<vmem>>, vector<8x32xf32>
      tpu.vector_store %arg12[%c0_82, %c0_83], %78 {strides = array<i32>} : memref<8x32xf32, #tpu.memory_space<vmem>>, vector<8x32xf32>,
    } else {
    }
    return
  }
  func.func @transform_0(%arg0: i32, %arg1: i32) -> (i32, i32) {
    %c0_i32 = arith.constant 0 : i32
    %c0_i32_0 = arith.constant 0 : i32
    return %arg0, %c0_i32 : i32, i32
  }
  func.func @transform_1(%arg0: i32, %arg1: i32) -> (i32, i32) {
    %c0_i32 = arith.constant 0 : i32
    %c0_i32_0 = arith.constant 0 : i32
    return %c0_i32, %arg1 : i32, i32
  }
  func.func @transform_2(%arg0: i32, %arg1: i32) -> (i32, i32) {
    %c0_i32 = arith.constant 0 : i32
    %c0_i32_0 = arith.constant 0 : i32
    return %arg0, %c0_i32 : i32, i32
  }
  func.func @transform_3(%arg0: i32, %arg1: i32) -> (i32, i32, i32) {
    %c0_i32 = arith.constant 0 : i32
    %c0_i32_0 = arith.constant 0 : i32
    return %arg0, %c0_i32, %arg1 : i32, i32, i32
  }
  func.func @transform_4(%arg0: i32, %arg1: i32) -> (i32, i32, i32) {
    %c0_i32 = arith.constant 0 : i32
    %c0_i32_0 = arith.constant 0 : i32
    %c0_i32_1 = arith.constant 0 : i32
    %c0_i32_2 = arith.constant 0 : i32
    return %c0_i32, %c0_i32_0, %c0_i32_1 : i32, i32, i32
  }
  func.func @transform_5(%arg0: i32, %arg1: i32) -> (i32, i32) {
    %c0_i32 = arith.constant 0 : i32
    %c0_i32_0 = arith.constant 0 : i32
    %c0_i32_1 = arith.constant 0 : i32
    return %c0_i32, %c0_i32_0 : i32, i32
  }
  func.func @transform_6(%arg0: i32, %arg1: i32) -> (i32, i32, i32) {
    %c0_i32 = arith.constant 0 : i32
    %c0_i32_0 = arith.constant 0 : i32
    %c0_i32_1 = arith.constant 0 : i32
    %c0_i32_2 = arith.constant 0 : i32
    return %c0_i32, %c0_i32_0, %c0_i32_1 : i32, i32, i32
  }
  func.func @transform_7(%arg0: i32, %arg1: i32) -> (i32, i32) {
    %c0_i32 = arith.constant 0 : i32
    %c0_i32_0 = arith.constant 0 : i32
    %c0_i32_1 = arith.constant 0 : i32
    return %c0_i32, %c0_i32_0 : i32, i32
  }
  func.func @transform_8(%arg0: i32, %arg1: i32) -> (i32, i32) {
    %c0_i32 = arith.constant 0 : i32
    %c0_i32_0 = arith.constant 0 : i32
    %c0_i32_1 = arith.constant 0 : i32
    return %c0_i32, %c0_i32_0 : i32, i32
  }
  func.func @transform_9(%arg0: i32, %arg1: i32) -> (i32, i32) {
    %c0_i32 = arith.constant 0 : i32
    %c0_i32_0 = arith.constant 0 : i32
    %c0_i32_1 = arith.constant 0 : i32
    return %c0_i32, %c0_i32_0 : i32, i32
  }
  func.func @transform_10(%arg0: i32, %arg1: i32) -> (i32, i32) {
    %c0_i32 = arith.constant 0 : i32
    %c0_i32_0 = arith.constant 0 : i32
    return %arg0, %c0_i32 : i32, i32
  }
}

</mosaic_0001>

<bundles_post_ra>
// kernel: tpu_custom_call.1
= control target key start
LH: loop header
LB: loop body
LE: loop exit
PB: predicated region body
PF: predicated region fallthrough
CT: control target
= control target key end

     0   :  { %s6348_s0 = inlined_call_operand.vmem [shape: f32[16,32], index: 0, kind: input, shape index: {}]   ;;  %s6349_s1 = inlined_call_operand.vmem [shape: f32[32,16], index: 1, kind: input, shape index: {}]   ;;  %s6350_s2 = inlined_call_operand.vmem [shape: f32[16,32], index: 2, kind: input, shape index: {}]   ;;  %s6351_s3 = inlined_call_operand.vmem [shape: f32[16,8,16], index: 3, kind: input, shape index: {}]   ;;  %s6352_s4 = inlined_call_operand.vmem [shape: f32[8,32,8], index: 4, kind: input, shape index: {}]   ;;  %s6353_s5 = inlined_call_operand.vmem [shape: f32[32,32], index: 5, kind: input, shape index: {}]   ;;  %s6354_s6 = inlined_call_operand.vmem [shape: f32[4,32,32], index: 6, kind: input, shape index: {}]   ;;  %s6355_s7 = inlined_call_operand.vmem [shape: f32[1,32], index: 7, kind: input, shape index: {}]   ;;  %s6356_s8 = inlined_call_operand.vmem [shape: f32[32,32], index: 8, kind: input, shape index: {}]   ;;  %s6357_s9 = inlined_call_operand.vmem [shape: f32[1,32], index: 9, kind: input, shape index: {}]   ;;  %s6358_s10 = inlined_call_operand.hbm [shape: f32[16,32], index: 10, kind: output, shape index: {}]  }
   0x1   :  { %6368 = sst [smem:[#allocation44_spill]] %s6348_s0 }
   0x2   :  { %15 = vsyncpa [#allocation7], 0 }
   0x3   :  { %17 = vsyncpa [#allocation7 + $0x1], 0  ;;  %s3741_s13 = smov 0   ;;  %s3743_s14 = smov 0  }
   0x4   :  { %s3745_s15 = smov 0   ;;  %s3747_s16 = smov 0  }
   0x5   :  { %s3749_s17 = smov 0   ;;  %s3751_s18 = smov 0  }
   0x6 LB: > { %6369 = sst [smem:[#allocation9_spill]] %s3677_s17  ;;  %s3379_s19 = sadd.s32 4294967295, %s3681_s18   ;;  %s3681_s18 = sphi %s3751_s18, %s23_s18   ;;  %s3677_s17 = sphi %s3749_s17, %s6493_s17   ;;  %s3673_s16 = sphi %s3747_s16, %s6492_s16   ;;  %s3669_s15 = sphi %s3745_s15, %s6496_s15   ;;  %s3665_s14 = sphi %s3743_s14, %s6495_s14   ;;  %s3661_s13 = sphi %s3741_s13, %s6494_s13  }
   0x7   : > { %s3380_s20 = sadd.s32 4294967294, %s3681_s18   ;;  %s35_s21 = sadd.s32 1, %s3677_s17 }
   0x8   : > { %s274_s22 = sadd.s32 1, %s3669_s15  ;;  %p37_p0 = scmp.ge.s32.totalorder %s35_s21, 2 }
   0x9   : > { %p284_p1 = scmp.ne.s32.totalorder %s3669_s15, %s3665_s14  ;;  %p285_p2 = scmp.eq.s32.totalorder %s3379_s19, 1 }
   0xa   : > { %p290_p3 = scmp.ne.s32.totalorder %s3665_s14, %s3661_s13  ;;  %s6498_s21 = smov (%p37_p0, %s35_s21), 0 }
   0xb   : > { %6370 = sst [smem:[#allocation10_spill]] %s6498_s21  ;;  %p3779_p4 = por %p285_p2, %p284_p1 }
   0xc   : > { %p291_p5 = scmp.eq.s32.totalorder %s3380_s20, 1  ;;  %s271_s24 = ssub.s32 %s3677_s17, %s6498_s21 }
   0xd   : > { %p3384_p6 = scmp.ge.s32.totalorder %s3681_s18, 1  ;;  %p272_p7 = scmp.eq.s32.totalorder %s271_s24, 0 }
   0xe   : > { %p3786_p8 = por %p291_p5, %p290_p3  ;;  %p360_p9 = scmp.lt.s32.totalorder %s3681_s18, 3 }
   0xf   : > { %s3792_s26 = scalar_select %p272_p7, %s3669_s15, %s274_s22  }
  0x10   : > { %p361_p10 = pnand %p3384_p6, %p360_p9 }
  0x12   : > { %364 = sbr.rel (%p361_p10) target bundleno = 1000 (0x3e8), region = 60 }
  0x17   : > { %v942_v0 = vlaneseq  ;;  %s3794_s27 = sshll.u32 %s3673_s16, 3  ;;  %p413_p11 = scmp.lt.s32.totalorder %s3673_s16, 1  ;;  %v575_v4 = vld [vmem:[%s6352_s4] sm:$0xff]  ;;  %vm611_vm0 = vcmask 64512   ;;  %v576_v16 = vld [vmem:[%s6352_s4 + $0x8] sm:$0xff]  ;;  %v577_v23 = vld [vmem:[%s6352_s4 + $0x10] sm:$0xff] }
  0x18   : > { %p426_p12 = scmp.lt.s32.totalorder %s3794_s27, 15  ;;  %v579_v5 = vld [vmem:[%s6352_s4 + $0x20] sm:$0xff]  ;;  %v580_v18 = vld [vmem:[%s6352_s4 + $0x28] sm:$0xff]  ;;  %v581_v24 = vld [vmem:[%s6352_s4 + $0x30] sm:$0xff]  ;;  %vm438_vm1 = vcmask 130048   ;;  %v3683_v50 = vmov 0.0   ;;  %s3265_s20 = scalar_lea.hbm %s6358_s10, %s3794_s27 }
  0x19   : > { %v3798_v1 = vshrl.u32 %v942_v0, 7  ;;  %s6500_s16 = smov (!%p413_p11, %s3673_s16), 1  ;;  %v583_v6 = vld [vmem:[%s6352_s4 + $0x40] sm:$0xff]  ;;  %v584_v19 = vld [vmem:[%s6352_s4 + $0x48] sm:$0xff]  ;;  %v585_v25 = vld [vmem:[%s6352_s4 + $0x50] sm:$0xff]  ;;  %443 = vst.msk [vmem:[#allocation2 + $0x20] sm:$0xff] %vm438_vm1, %v3683_v50 }
  0x1a   : > { %s427_s28 = scalar_select %p426_p12, %s3794_s27, 15  ;;  %v587_v14 = vld [vmem:[%s6352_s4 + $0x60] sm:$0xff]  ;;  %v588_v20 = vld [vmem:[%s6352_s4 + $0x68] sm:$0xff]  ;;  %v589_v26 = vld [vmem:[%s6352_s4 + $0x70] sm:$0xff]  ;;  %475 = vst.msk [vmem:[#allocation3 + $0x20] sm:$0xff] %vm438_vm1, %v3683_v50  ;;  %v3684_v51 = vmov -inf  }
  0x1b   : > { %3503 = vset.pattern.permute.xlu2 %v3798_v1  ;;  %v3805_v2 = vadd.s32 16, %v3798_v1  ;;  %v3808_v3 = vadd.s32 8, %v3798_v1  ;;  %s3386_s29 = sshll.u32 %s6500_s16, 3  ;;  %v3869_v21 = vadd.s32 24, %v3798_v1  ;;  %v578_v27 = vld [vmem:[%s6352_s4 + $0x18] sm:$0xff]  ;;  %v591_v32 = vld [vmem:[%s6352_s4 + $0x80] sm:$0xff] }
  0x1c   : > { %s3389_s30 = sshll.u32 %s427_s28, 3  ;;  %s424_s22 = scalar_lea.vmem %s6350_s2, %s3386_s29  ;;  %v582_v28 = vld [vmem:[%s6352_s4 + $0x38] sm:$0xff]  ;;  %v595_v33 = vld [vmem:[%s6352_s4 + $0xa0] sm:$0xff]  ;;  %v592_v34 = vld [vmem:[%s6352_s4 + $0x88] sm:$0xff]  ;;  %507 = vst.msk [vmem:[#allocation4 + $0x20] sm:$0xff] %vm438_vm1, %v3684_v51  ;;  %v3685_v52 = vmov inf  }
  0x1d   : > { %3504 = vset.pattern.permute.xlu1 %v3805_v2  ;;  %3502 = vset.pattern.permute.xlu0 %v3808_v3  ;;  %s3824_s17 = scalar_lea.vmem %s6351_s3, %s3389_s30  ;;  %v3832_v7 = vld [vmem:[%s424_s22] sm:$0xff]  ;;  %v586_v29 = vld [vmem:[%s6352_s4 + $0x58] sm:$0xff]  ;;  %v596_v35 = vld [vmem:[%s6352_s4 + $0xa8] sm:$0xff]  ;;  %539 = vst.msk [vmem:[#allocation5 + $0x20] sm:$0xff] %vm438_vm1, %v3685_v52  ;;  %vm2755_vm2 = vcmask 130112   ;;  %vm2759_vm3 = vcmask 195712  }
  0x1e   : > { %v567_v8 = vld [vmem:[%s3824_s17] sm:$0xff]  ;;  %v568_v9 = vld [vmem:[%s3824_s17 + $0x8] sm:$0xff]  ;;  %v569_v10 = vld [vmem:[%s3824_s17 + $0x10] sm:$0xff]  ;;  %v966_v11 = vperm.slane %v3832_v7, 1  ;;  %v3847_v15 = vperm.slane %v3832_v7, 0  ;;  %v3872_v22 = vperm.slane %v3832_v7, 3 }
  0x1f   : > { %639 = vmatpush.msra.mxu0 %v567_v8  ;;  %680 = vmatpush.msra.mxu1 %v568_v9  ;;  %v570_v12 = vld [vmem:[%s3824_s17 + $0x18] sm:$0xff]  ;;  %v571_v13 = vld [vmem:[%s3824_s17 + $0x20] sm:$0xff]  ;;  %v572_v17 = vld [vmem:[%s3824_s17 + $0x28] sm:$0xff]  ;;  %v3911_v31 = vperm.slane %v3832_v7, 4  ;;  %v3935_v36 = vperm.slane %v3832_v7, 5  ;;  %v991_v41 = vperm.slane %v3832_v7, 2 }
  0x20   : > { %721 = vmatpush.msra.mxu2 %v569_v10  ;;  %3390 = vmatmul.msk.f32.vlgmr.msra.gmra.mxu0 %vm611_vm0, %v575_v4  ;;  %v590_v30 = vld [vmem:[%s6352_s4 + $0x78] sm:$0xff]  ;;  %v603_v38 = vld [vmem:[%s6352_s4 + $0xe0] sm:$0xff]  ;;  %v593_v39 = vld [vmem:[%s6352_s4 + $0x90] sm:$0xff]  ;;  %v3974_v46 = vperm.slane %v3832_v7, 7  ;;  %439 = vst.msk [vmem:[#allocation2] sm:$0xff] %vm438_vm1, %v3683_v50  ;;  %vm2763_vm4 = vcmask 261312  }
  0x21   : > { %3394 = vmatmul.msk.f32.vlgmr.msra.gmra.mxu1 %vm611_vm0, %v579_v5  ;;  %3398 = vmatmul.msk.f32.vlgmr.msra.gmra.mxu2 %vm611_vm0, %v583_v6  ;;  %v574_v37 = vld [vmem:[%s3824_s17 + $0x38] sm:$0xff]  ;;  %v597_v40 = vld [vmem:[%s6352_s4 + $0xb0] sm:$0xff]  ;;  %v599_v44 = vld [vmem:[%s6352_s4 + $0xc0] sm:$0xff]  ;;  %440 = vst.msk [vmem:[#allocation2 + $0x8] sm:$0xff] %vm438_vm1, %v3683_v50  ;;  %vm2814_vm5 = vcmask 1041409   ;;  %vm6367_vm6 = vcmask 1042434  }
  0x22   : > { %762 = vmatpush.msra.mxu3 %v570_v12  ;;  %803 = vmatpush.msrb.mxu0 %v571_v13  ;;  %v598_v42 = vld [vmem:[%s6352_s4 + $0xb8] sm:$0xff]  ;;  %v573_v43 = vld [vmem:[%s3824_s17 + $0x30] sm:$0xff]  ;;  %v600_v47 = vld [vmem:[%s6352_s4 + $0xc8] sm:$0xff]  ;;  %441 = vst.msk [vmem:[#allocation2 + $0x10] sm:$0xff] %vm438_vm1, %v3683_v50  ;;  %v1091_v12 = vperm.slane %v3832_v7, 6  ;;  %vm6366_vm7 = vcmask 1043459  }
  0x23   : > { %971 = vperm.xlu2 %3503, %v966_v11   ;;  %3402 = vmatmul.msk.f32.vlgmr.msra.gmra.mxu3 %vm611_vm0, %v587_v14  ;;  %v594_v45 = vld [vmem:[%s6352_s4 + $0x98] sm:$0xff]  ;;  %v601_v48 = vld [vmem:[%s6352_s4 + $0xd0] sm:$0xff]  ;;  %442 = vst.msk [vmem:[#allocation2 + $0x18] sm:$0xff] %vm438_vm1, %v3683_v50  ;;  %v4072_v53 = vld [vmem:[%s6349_s1] sm:$0xff]  ;;  %s6432_s0 = sld [smem:[#allocation44_spill]]  ;;  %s410_s11 = sand.u32 1, %s3665_s14  }
  0x24   : > { %844 = vmatpush.msrb.mxu1 %v572_v17  ;;  %926 = vmatpush.msrb.mxu3 %v574_v37  ;;  %v602_v49 = vld [vmem:[%s6352_s4 + $0xd8] sm:$0xff]  ;;  %444 = vst.msk [vmem:[#allocation2 + $0x28] sm:$0xff] %vm438_vm1, %v3683_v50  ;;  %v1177_v57 = vld [vmem:[#allocation2 + $0x20] sm:$0xff]  ;;  %v605_v9 = vld [vmem:[%s6352_s4 + $0xf0] sm:$0xff]  ;;  %s3385_s12 = sshll.u32 %s410_s11, 3  ;;  %s3255_s28 = scalar_lea.sflag [#allocation7], %s410_s11 }
  0x25   : > { %958 = vperm.xlu1 %3504, %v3847_v15   ;;  %952 = vperm.xlu0 %3502, %v3847_v15   ;;  %445 = vst.msk [vmem:[#allocation2 + $0x30] sm:$0xff] %vm438_vm1, %v3683_v50  ;;  %v1402_v58 = vld [vmem:[#allocation4 + $0x20] sm:$0xff]  ;;  %v4256_v7 = vld [vmem:[%s6349_s1 + $0x8] sm:$0xff]  ;;  %v4272_v17 = vld [vmem:[%s6349_s1 + $0x10] sm:$0xff]  ;;  %s412_s22 = scalar_lea.vmem [#allocation6], %s3385_s12  ;;  %s3623_s12 = scalar_lea.hbm %s6358_s10, 16 }
  0x26   : > { %885 = vmatpush.msrb.mxu2 %v573_v43  ;;  %446 = vst.msk [vmem:[#allocation2 + $0x38] sm:$0xff] %vm438_vm1, %v3683_v50  ;;  %v1498_v60 = vld [vmem:[#allocation5 + $0x20] sm:$0xff]  ;;  %s3267_s16 = sshll.u32 %s412_s22, 4  ;;  %s3268_s16 = int_to_ptr.vmem [resolvable:$true] %s3267_s16 }
  0x27   : > { %447 = vst.msk [vmem:[#allocation2 + $0x40] sm:$0xff] %vm438_vm1, %v3683_v50  ;;  %v1274_v61 = vld [vmem:[#allocation3 + $0x20] sm:$0xff] }
  0x28   : > { %3391 = vmatmul.msk.f32.gmra.mxu0 %vm611_vm0, %v576_v16  ;;  %448 = vst.msk [vmem:[#allocation2 + $0x48] sm:$0xff] %vm438_vm1, %v3683_v50 }
  0x29   : > { %3395 = vmatmul.msk.f32.gmra.mxu1 %vm611_vm0, %v580_v18  ;;  %3399 = vmatmul.msk.f32.gmra.mxu2 %vm611_vm0, %v584_v19  ;;  %449 = vst.msk [vmem:[#allocation2 + $0x50] sm:$0xff] %vm438_vm1, %v3683_v50  ;;  %s5534_s24 = scalar_lea.vmem %s6432_s0, %s3386_s29  ;;  %s3269_s29 = sshll.u32 %s3265_s20, 4  ;;  %s3270_s29 = int_to_ptr.hbm [resolvable:$true] %s3269_s29 }
  0x2a   : > { %450 = vst.msk [vmem:[#allocation2 + $0x58] sm:$0xff] %vm438_vm1, %v3683_v50  ;;  %s3617_s0 = sshra.s32 %s3270_s29, 4  ;;  %s3618_s0 = int_to_ptr.hbm [resolvable:$true] %s3617_s0 }
  0x2b   : > { %3506 = vset.pattern.permute.xlu2 %v3808_v3  ;;  %3403 = vmatmul.msk.f32.gmra.mxu3 %vm611_vm0, %v588_v20  ;;  %451 = vst.msk [vmem:[#allocation2 + $0x60] sm:$0xff] %vm438_vm1, %v3683_v50  ;;  %s3619_s19 = scalar_lea.hbm %s3618_s0, 8  ;;  %p3624_p2 = scmp.lt.s32.totalorder %s3618_s0, %s6358_s10 }
  0x2c   : > { %452 = vst.msk [vmem:[#allocation2 + $0x68] sm:$0xff] %vm438_vm1, %v3683_v50  ;;  %p3620_p13 = scmp.ne.s32.totalorder %s3618_s0, %s3619_s19  ;;  %p3625_p3 = scmp.lt.s32.totalorder %s3623_s12, %s3619_s19 }
  0x2d   : > { %3505 = vset.pattern.permute.xlu1 %v3869_v21  ;;  %1027 = vperm.xlu0 %3502, %v3872_v22   ;;  %453 = vst.msk [vmem:[#allocation2 + $0x70] sm:$0xff] %vm438_vm1, %v3683_v50 }
  0x2e   : > { %454 = vst.msk [vmem:[#allocation2 + $0x78] sm:$0xff] %vm438_vm1, %v3683_v50  ;;  %p3621_p0 = pnand %p3620_p13, %p3779_p4  ;;  %p3626_p5 = por %p3625_p3, %p3624_p2 }
  0x2f   : > { %455 = vst.msk [vmem:[#allocation2 + $0x80] sm:$0xff] %vm438_vm1, %v3683_v50 }
  0x30   : > { %3392 = vmatmul.msk.f32.gmra.mxu0 %vm611_vm0, %v577_v23  ;;  %456 = vst.msk [vmem:[#allocation2 + $0x88] sm:$0xff] %vm438_vm1, %v3683_v50  ;;  %p3622_p1 = pneg %p3621_p0 }
  0x31   : > { %3396 = vmatmul.msk.f32.gmra.mxu1 %vm611_vm0, %v581_v24  ;;  %3400 = vmatmul.msk.f32.gmra.mxu2 %vm611_vm0, %v585_v25  ;;  %457 = vst.msk [vmem:[#allocation2 + $0x90] sm:$0xff] %vm438_vm1, %v3683_v50 }
  0x32   : > { %458 = vst.msk [vmem:[#allocation2 + $0x98] sm:$0xff] %vm438_vm1, %v3683_v50  ;;  %p3627_p6 = pnand %p3626_p5, %p3622_p1 }
  0x33   : > { %977 = vperm.xlu2 %3506, %v966_v11   ;;  %3404 = vmatmul.msk.f32.gmra.mxu3 %vm611_vm0, %v589_v26  ;;  %459 = vst.msk [vmem:[#allocation2 + $0xa0] sm:$0xff] %vm438_vm1, %v3683_v50 }
  0x34   : > { %460 = vst.msk [vmem:[#allocation2 + $0xa8] sm:$0xff] %vm438_vm1, %v3683_v50 }
  0x35   : > { %964 = vperm.xlu1 %3505, %v3847_v15   ;;  %3517 = vset.pattern.permute.xlu0 %v3805_v2  ;;  %461 = vst.msk [vmem:[#allocation2 + $0xb0] sm:$0xff] %vm438_vm1, %v3683_v50 }
  0x36   : > { %462 = vst.msk [vmem:[#allocation2 + $0xb8] sm:$0xff] %vm438_vm1, %v3683_v50 }
  0x37   : > { %463 = vst.msk [vmem:[#allocation2 + $0xc0] sm:$0xff] %vm438_vm1, %v3683_v50 }
  0x38   : > { %3393 = vmatmul.msk.f32.gmra.mxu0 %vm611_vm0, %v578_v27  ;;  %464 = vst.msk [vmem:[#allocation2 + $0xc8] sm:$0xff] %vm438_vm1, %v3683_v50  ;;  %v1178_v27 = vld [vmem:[#allocation2 + $0x28] sm:$0xff] }
  0x39   : > { %3397 = vmatmul.msk.f32.gmra.mxu1 %vm611_vm0, %v582_v28  ;;  %3401 = vmatmul.msk.f32.gmra.mxu2 %vm611_vm0, %v586_v29  ;;  %465 = vst.msk [vmem:[#allocation2 + $0xd0] sm:$0xff] %vm438_vm1, %v3683_v50 }
  0x3a   : > { %466 = vst.msk [vmem:[#allocation2 + $0xd8] sm:$0xff] %vm438_vm1, %v3683_v50 }
  0x3b   : > { %3508 = vset.pattern.permute.xlu2 %v3869_v21  ;;  %3405 = vmatmul.msk.f32.gmra.mxu3 %vm611_vm0, %v590_v30  ;;  %467 = vst.msk [vmem:[#allocation2 + $0xe0] sm:$0xff] %vm438_vm1, %v3683_v50 }
  0x3c   : > { %468 = vst.msk [vmem:[#allocation2 + $0xe8] sm:$0xff] %vm438_vm1, %v3683_v50 }
  0x3d   : > { %3507 = vset.pattern.permute.xlu1 %v3805_v2  ;;  %1058 = vperm.xlu0 %3517, %v3911_v31   ;;  %469 = vst.msk [vmem:[#allocation2 + $0xf0] sm:$0xff] %vm438_vm1, %v3683_v50 }
  0x3e   : > { %470 = vst.msk [vmem:[#allocation2 + $0xf8] sm:$0xff] %vm438_vm1, %v3683_v50 }
  0x3f   : > { %471 = vst.msk [vmem:[#allocation3] sm:$0xff] %vm438_vm1, %v3683_v50 }
  0x40   : > { %3406 = vmatmul.msk.f32.vlgmr.msrb.gmra.mxu0 %vm611_vm0, %v591_v32  ;;  %472 = vst.msk [vmem:[#allocation3 + $0x8] sm:$0xff] %vm438_vm1, %v3683_v50 }
  0x41   : > { %3410 = vmatmul.msk.f32.vlgmr.msrb.gmra.mxu1 %vm611_vm0, %v595_v33  ;;  %3414 = vmatmul.msk.f32.vlgmr.msrb.gmra.mxu2 %vm611_vm0, %v599_v44  ;;  %473 = vst.msk [vmem:[#allocation3 + $0x10] sm:$0xff] %vm438_vm1, %v3683_v50 }
  0x42   : > { %474 = vst.msk [vmem:[#allocation3 + $0x18] sm:$0xff] %vm438_vm1, %v3683_v50 }
  0x43   : > { %989 = vperm.xlu2 %3508, %v966_v11   ;;  %3418 = vmatmul.msk.f32.vlgmr.msrb.gmra.mxu3 %vm611_vm0, %v603_v38  ;;  %476 = vst.msk [vmem:[#allocation3 + $0x28] sm:$0xff] %vm438_vm1, %v3683_v50 }
  0x44   : > { %477 = vst.msk [vmem:[#allocation3 + $0x30] sm:$0xff] %vm438_vm1, %v3683_v50 }
  0x45   : > { %983 = vperm.xlu1 %3507, %v966_v11   ;;  %3522 = vset.pattern.permute.xlu0 %v3869_v21  ;;  %478 = vst.msk [vmem:[#allocation3 + $0x38] sm:$0xff] %vm438_vm1, %v3683_v50 }
  0x46   : > { %479 = vst.msk [vmem:[#allocation3 + $0x40] sm:$0xff] %vm438_vm1, %v3683_v50 }
  0x47   : > { %480 = vst.msk [vmem:[#allocation3 + $0x48] sm:$0xff] %vm438_vm1, %v3683_v50 }
  0x48   : > { %3407 = vmatmul.msk.f32.gmra.mxu0 %vm611_vm0, %v592_v34  ;;  %481 = vst.msk [vmem:[#allocation3 + $0x50] sm:$0xff] %vm438_vm1, %v3683_v50 }
  0x49   : > { %3411 = vmatmul.msk.f32.gmra.mxu1 %vm611_vm0, %v596_v35  ;;  %3415 = vmatmul.msk.f32.gmra.mxu2 %vm611_vm0, %v600_v47  ;;  %482 = vst.msk [vmem:[#allocation3 + $0x58] sm:$0xff] %vm438_vm1, %v3683_v50 }
  0x4a   : > { %483 = vst.msk [vmem:[#allocation3 + $0x60] sm:$0xff] %vm438_vm1, %v3683_v50  ;;  %v1275_v30 = vld [vmem:[#allocation3 + $0x28] sm:$0xff] }
  0x4b   : > { %3510 = vset.pattern.permute.xlu2 %v3805_v2  ;;  %484 = vst.msk [vmem:[#allocation3 + $0x68] sm:$0xff] %vm438_vm1, %v3683_v50 }
  0x4c   : > { %485 = vst.msk [vmem:[#allocation3 + $0x70] sm:$0xff] %vm438_vm1, %v3683_v50 }
  0x4d   : > { %3509 = vset.pattern.permute.xlu1 %v3808_v3  ;;  %1089 = vperm.xlu0 %3522, %v3935_v36   ;;  %486 = vst.msk [vmem:[#allocation3 + $0x78] sm:$0xff] %vm438_vm1, %v3683_v50 }
  0x4e   : > { %487 = vst.msk [vmem:[#allocation3 + $0x80] sm:$0xff] %vm438_vm1, %v3683_v50 }
  0x4f   : > { %488 = vst.msk [vmem:[#allocation3 + $0x88] sm:$0xff] %vm438_vm1, %v3683_v50 }
  0x50   : > { %3408 = vmatmul.msk.f32.gmra.mxu0 %vm611_vm0, %v593_v39  ;;  %489 = vst.msk [vmem:[#allocation3 + $0x90] sm:$0xff] %vm438_vm1, %v3683_v50 }
  0x51   : > { %3412 = vmatmul.msk.f32.gmra.mxu1 %vm611_vm0, %v597_v40  ;;  %3416 = vmatmul.msk.f32.gmra.mxu2 %vm611_vm0, %v601_v48  ;;  %490 = vst.msk [vmem:[#allocation3 + $0x98] sm:$0xff] %vm438_vm1, %v3683_v50 }
  0x52   : > { %491 = vst.msk [vmem:[#allocation3 + $0xa0] sm:$0xff] %vm438_vm1, %v3683_v50 }
  0x53   : > { %1008 = vperm.xlu2 %3510, %v991_v41   ;;  %492 = vst.msk [vmem:[#allocation3 + $0xa8] sm:$0xff] %vm438_vm1, %v3683_v50 }
  0x54   : > { %493 = vst.msk [vmem:[#allocation3 + $0xb0] sm:$0xff] %vm438_vm1, %v3683_v50 }
  0x55   : > { %1002 = vperm.xlu1 %3509, %v991_v41   ;;  %3523 = vset.pattern.permute.xlu0 %v3798_v1  ;;  %494 = vst.msk [vmem:[#allocation3 + $0xb8] sm:$0xff] %vm438_vm1, %v3683_v50 }
  0x56   : > { %495 = vst.msk [vmem:[#allocation3 + $0xc0] sm:$0xff] %vm438_vm1, %v3683_v50 }
  0x57   : > { %496 = vst.msk [vmem:[#allocation3 + $0xc8] sm:$0xff] %vm438_vm1, %v3683_v50 }
  0x58   : > { %3409 = vmatmul.msk.f32.gmra.mxu0 %vm611_vm0, %v594_v45  ;;  %497 = vst.msk [vmem:[#allocation3 + $0xd0] sm:$0xff] %vm438_vm1, %v3683_v50 }
  0x59   : > { %3413 = vmatmul.msk.f32.gmra.mxu1 %vm611_vm0, %v598_v42  ;;  %3417 = vmatmul.msk.f32.gmra.mxu2 %vm611_vm0, %v602_v49  ;;  %498 = vst.msk [vmem:[#allocation3 + $0xd8] sm:$0xff] %vm438_vm1, %v3683_v50  ;;  %v4312_v42 = vld [vmem:[%s6349_s1 + $0x18] sm:$0xff] }
  0x5a   : > { %499 = vst.msk [vmem:[#allocation3 + $0xe0] sm:$0xff] %vm438_vm1, %v3683_v50 }
  0x5b   : > { %3512 = vset.pattern.permute.xlu2 %v3798_v1  ;;  %500 = vst.msk [vmem:[#allocation3 + $0xe8] sm:$0xff] %vm438_vm1, %v3683_v50 }
  0x5c   : > { %501 = vst.msk [vmem:[#allocation3 + $0xf0] sm:$0xff] %vm438_vm1, %v3683_v50 }
  0x5d   : > { %3511 = vset.pattern.permute.xlu1 %v3869_v21  ;;  %946 = vperm.xlu0 %3523, %v3847_v15   ;;  %502 = vst.msk [vmem:[#allocation3 + $0xf8] sm:$0xff] %vm438_vm1, %v3683_v50 }
  0x5e   : > { %503 = vst.msk [vmem:[#allocation4] sm:$0xff] %vm438_vm1, %v3684_v51 }
  0x5f   : > { %504 = vst.msk [vmem:[#allocation4 + $0x8] sm:$0xff] %vm438_vm1, %v3684_v51 }
  0x60   : > { %505 = vst.msk [vmem:[#allocation4 + $0x10] sm:$0xff] %vm438_vm1, %v3684_v51 }
  0x61   : > { %506 = vst.msk [vmem:[#allocation4 + $0x18] sm:$0xff] %vm438_vm1, %v3684_v51 }
  0x62   : > { %508 = vst.msk [vmem:[#allocation4 + $0x28] sm:$0xff] %vm438_vm1, %v3684_v51 }
  0x63   : > { %1021 = vperm.xlu2 %3512, %v3872_v22   ;;  %509 = vst.msk [vmem:[#allocation4 + $0x30] sm:$0xff] %vm438_vm1, %v3684_v51 }
  0x64   : > { %510 = vst.msk [vmem:[#allocation4 + $0x38] sm:$0xff] %vm438_vm1, %v3684_v51 }
  0x65   : > { %1014 = vperm.xlu1 %3511, %v991_v41   ;;  %996 = vperm.xlu0 %3523, %v991_v41   ;;  %511 = vst.msk [vmem:[#allocation4 + $0x40] sm:$0xff] %vm438_vm1, %v3684_v51  ;;  %v1272_v41 = vld [vmem:[#allocation3 + $0x10] sm:$0xff] }
  0x66   : > { %512 = vst.msk [vmem:[#allocation4 + $0x48] sm:$0xff] %vm438_vm1, %v3684_v51 }
  0x67   : > { %513 = vst.msk [vmem:[#allocation4 + $0x50] sm:$0xff] %vm438_vm1, %v3684_v51  ;;  %v1400_v47 = vld [vmem:[#allocation4 + $0x10] sm:$0xff] }
  0x68   : > { %514 = vst.msk [vmem:[#allocation4 + $0x58] sm:$0xff] %vm438_vm1, %v3684_v51 }
  0x69   : > { %515 = vst.msk [vmem:[#allocation4 + $0x60] sm:$0xff] %vm438_vm1, %v3684_v51  ;;  %v1403_v32 = vld [vmem:[#allocation4 + $0x28] sm:$0xff] }
  0x6a   : > { %516 = vst.msk [vmem:[#allocation4 + $0x68] sm:$0xff] %vm438_vm1, %v3684_v51 }
  0x6b   : > { %3514 = vset.pattern.permute.xlu2 %v3869_v21  ;;  %517 = vst.msk [vmem:[#allocation4 + $0x70] sm:$0xff] %vm438_vm1, %v3684_v51 }
  0x6c   : > { %518 = vst.msk [vmem:[#allocation4 + $0x78] sm:$0xff] %vm438_vm1, %v3684_v51 }
  0x6d   : > { %3513 = vset.pattern.permute.xlu1 %v3805_v2  ;;  %1121 = vperm.xlu0 %3523, %v3974_v46   ;;  %519 = vst.msk [vmem:[#allocation4 + $0x80] sm:$0xff] %vm438_vm1, %v3684_v51 }
  0x6e   : > { %520 = vst.msk [vmem:[#allocation4 + $0x88] sm:$0xff] %vm438_vm1, %v3684_v51 }
  0x6f   : > { %521 = vst.msk [vmem:[#allocation4 + $0x90] sm:$0xff] %vm438_vm1, %v3684_v51 }
  0x70   : > { %522 = vst.msk [vmem:[#allocation4 + $0x98] sm:$0xff] %vm438_vm1, %v3684_v51 }
  0x71   : > { %523 = vst.msk [vmem:[#allocation4 + $0xa0] sm:$0xff] %vm438_vm1, %v3684_v51 }
  0x72   : > { %524 = vst.msk [vmem:[#allocation4 + $0xa8] sm:$0xff] %vm438_vm1, %v3684_v51 }
  0x73   : > { %1039 = vperm.xlu2 %3514, %v3872_v22   ;;  %525 = vst.msk [vmem:[#allocation4 + $0xb0] sm:$0xff] %vm438_vm1, %v3684_v51 }
  0x74   : > { %526 = vst.msk [vmem:[#allocation4 + $0xb8] sm:$0xff] %vm438_vm1, %v3684_v51 }
  0x75   : > { %1033 = vperm.xlu1 %3513, %v3872_v22   ;;  %3531 = vset.pattern.permute.xlu0 %v3869_v21  ;;  %527 = vst.msk [vmem:[#allocation4 + $0xc0] sm:$0xff] %vm438_vm1, %v3684_v51 }
  0x76   : > { %528 = vst.msk [vmem:[#allocation4 + $0xc8] sm:$0xff] %vm438_vm1, %v3684_v51 }
  0x77   : > { %529 = vst.msk [vmem:[#allocation4 + $0xd0] sm:$0xff] %vm438_vm1, %v3684_v51 }
  0x78   : > { %530 = vst.msk [vmem:[#allocation4 + $0xd8] sm:$0xff] %vm438_vm1, %v3684_v51 }
  0x79   : > { %531 = vst.msk [vmem:[#allocation4 + $0xe0] sm:$0xff] %vm438_vm1, %v3684_v51 }
  0x7a   : > { %532 = vst.msk [vmem:[#allocation4 + $0xe8] sm:$0xff] %vm438_vm1, %v3684_v51 }
  0x7b   : > { %3516 = vset.pattern.permute.xlu2 %v3808_v3  ;;  %533 = vst.msk [vmem:[#allocation4 + $0xf0] sm:$0xff] %vm438_vm1, %v3684_v51 }
  0x7c   : > { %534 = vst.msk [vmem:[#allocation4 + $0xf8] sm:$0xff] %vm438_vm1, %v3684_v51 }
  0x7d   : > { %3515 = vset.pattern.permute.xlu1 %v3798_v1  ;;  %v972_v56 = vpop.permute.xlu2 %971  ;;  %535 = vst.msk [vmem:[#allocation5] sm:$0xff] %vm438_vm1, %v3685_v52 }
  0x7e   : > { %536 = vst.msk [vmem:[#allocation5 + $0x8] sm:$0xff] %vm438_vm1, %v3685_v52 }
  0x7f   : > { %537 = vst.msk [vmem:[#allocation5 + $0x10] sm:$0xff] %vm438_vm1, %v3685_v52 }
  0x80   : > { %538 = vst.msk [vmem:[#allocation5 + $0x18] sm:$0xff] %vm438_vm1, %v3685_v52 }
  0x81   : > { %540 = vst.msk [vmem:[#allocation5 + $0x28] sm:$0xff] %vm438_vm1, %v3685_v52 }
  0x82   : > { %541 = vst.msk [vmem:[#allocation5 + $0x30] sm:$0xff] %vm438_vm1, %v3685_v52 }
  0x83   : > { %1052 = vperm.xlu2 %3516, %v3911_v31   ;;  %542 = vst.msk [vmem:[#allocation5 + $0x38] sm:$0xff] %vm438_vm1, %v3685_v52 }
  0x84   : > { %543 = vst.msk [vmem:[#allocation5 + $0x40] sm:$0xff] %vm438_vm1, %v3685_v52 }
  0x85   : > { %1046 = vperm.xlu1 %3515, %v3911_v31   ;;  %544 = vst.msk [vmem:[#allocation5 + $0x48] sm:$0xff] %vm438_vm1, %v3685_v52 }
  0x86   : > { %545 = vst.msk [vmem:[#allocation5 + $0x50] sm:$0xff] %vm438_vm1, %v3685_v52  ;;  %v1496_v49 = vld [vmem:[#allocation5 + $0x10] sm:$0xff] }
  0x87   : > { %546 = vst.msk [vmem:[#allocation5 + $0x58] sm:$0xff] %vm438_vm1, %v3685_v52 }
  0x88   : > { %547 = vst.msk [vmem:[#allocation5 + $0x60] sm:$0xff] %vm438_vm1, %v3685_v52  ;;  %v1499_v34 = vld [vmem:[#allocation5 + $0x28] sm:$0xff] }
  0x89   : > { %548 = vst.msk [vmem:[#allocation5 + $0x68] sm:$0xff] %vm438_vm1, %v3685_v52 }
  0x8a   : > { %549 = vst.msk [vmem:[#allocation5 + $0x70] sm:$0xff] %vm438_vm1, %v3685_v52 }
  0x8b   : > { %3519 = vset.pattern.permute.xlu2 %v3798_v1  ;;  %550 = vst.msk [vmem:[#allocation5 + $0x78] sm:$0xff] %vm438_vm1, %v3685_v52 }
  0x8c   : > { %551 = vst.msk [vmem:[#allocation5 + $0x80] sm:$0xff] %vm438_vm1, %v3685_v52 }
  0x8d   : > { %3518 = vset.pattern.permute.xlu1 %v3869_v21  ;;  %v978_v14 = vpop.permute.xlu2 %977  ;;  %552 = vst.msk [vmem:[#allocation5 + $0x88] sm:$0xff] %vm438_vm1, %v3685_v52 }
  0x8e   : > { %553 = vst.msk [vmem:[#allocation5 + $0x90] sm:$0xff] %vm438_vm1, %v3685_v52 }
  0x8f   : > { %554 = vst.msk [vmem:[#allocation5 + $0x98] sm:$0xff] %vm438_vm1, %v3685_v52 }
  0x90   : > { %555 = vst.msk [vmem:[#allocation5 + $0xa0] sm:$0xff] %vm438_vm1, %v3685_v52 }
  0x91   : > { %556 = vst.msk [vmem:[#allocation5 + $0xa8] sm:$0xff] %vm438_vm1, %v3685_v52 }
  0x92   : > { %557 = vst.msk [vmem:[#allocation5 + $0xb0] sm:$0xff] %vm438_vm1, %v3685_v52 }
  0x93   : > { %1071 = vperm.xlu2 %3519, %v3935_v36   ;;  %558 = vst.msk [vmem:[#allocation5 + $0xb8] sm:$0xff] %vm438_vm1, %v3685_v52 }
  0x94   : > { %559 = vst.msk [vmem:[#allocation5 + $0xc0] sm:$0xff] %vm438_vm1, %v3685_v52 }
  0x95   : > { %1064 = vperm.xlu1 %3518, %v3911_v31   ;;  %560 = vst.msk [vmem:[#allocation5 + $0xc8] sm:$0xff] %vm438_vm1, %v3685_v52 }
  0x96   : > { %561 = vst.msk [vmem:[#allocation5 + $0xd0] sm:$0xff] %vm438_vm1, %v3685_v52 }
  0x97   : > { %v953_v19 = vpop.permute.xlu0 %952  ;;  %v959_v23 = vpop.permute.xlu1 %958  ;;  %562 = vst.msk [vmem:[#allocation5 + $0xd8] sm:$0xff] %vm438_vm1, %v3685_v52 }
  0x98   : > { %563 = vst.msk [vmem:[#allocation5 + $0xe0] sm:$0xff] %vm438_vm1, %v3685_v52 }
  0x99   : > { %564 = vst.msk [vmem:[#allocation5 + $0xe8] sm:$0xff] %vm438_vm1, %v3685_v52 }
  0x9a   : > { %565 = vst.msk [vmem:[#allocation5 + $0xf0] sm:$0xff] %vm438_vm1, %v3685_v52 }
  0x9b   : > { %3521 = vset.pattern.permute.xlu2 %v3805_v2  ;;  %566 = vst.msk [vmem:[#allocation5 + $0xf8] sm:$0xff] %vm438_vm1, %v3685_v52 }
  0x9d   : > { %3520 = vset.pattern.permute.xlu1 %v3808_v3  ;;  %v4210_v8 = vpop.f32.mrf.mxu0  ;;  %v4289_v24 = vpop.permute.xlu2 %989 }
  0x9e   : > { %v682_v54 = vpop.f32.mrf.mxu1 }
  0x9f   : > { %v683_v55 = vadd.f32 %v682_v54, %v4072_v53  ;;  %v4314_v44 = vpop.permute.xlu0 %1027 }
  0xa1   : > { %v1145_v59 = vadd.f32 %v972_v56, %v683_v55  ;;  %v1174_v55 = vld [vmem:[#allocation2 + $0x8] sm:$0xff] }
  0xa3   : > { %v1209_v62 = vadd.f32 %v1177_v57, %v1145_v59  ;;  %v1306_v63 = vmul.f32 %v1145_v59, %v1145_v59  ;;  %v1434_v4 = vmax.f32 %v1402_v58, %v1145_v59  ;;  %v1530_v5 = vmin.f32 %v1498_v60, %v1145_v59  ;;  %1083 = vperm.xlu2 %3521, %v3935_v36   ;;  %v1271_v60 = vld [vmem:[#allocation3 + $0x8] sm:$0xff] }
  0xa4   : > { %v4234_v10 = vpop.f32.mrf.mxu2 }
  0xa5   : > { %1242 = vst.msk [vmem:[#allocation2 + $0x20] sm:$0xff] %vm438_vm1, %v1209_v62  ;;  %v1338_v6 = vadd.f32 %v1306_v63, %v1274_v61  ;;  %1077 = vperm.xlu1 %3520, %v3935_v36   ;;  %v644_v11 = vpop.f32.mrf.mxu0  ;;  %v1175_v36 = vld [vmem:[#allocation2 + $0x10] sm:$0xff]  ;;  %v1399_v63 = vld [vmem:[#allocation4 + $0x8] sm:$0xff] }
  0xa6   : > { %1466 = vst.msk [vmem:[#allocation4 + $0x20] sm:$0xff] %vm438_vm1, %v1434_v4  ;;  %v685_v13 = vpop.f32.mrf.mxu1  ;;  %v645_v26 = vadd.f32 %v644_v11, %v4256_v7  ;;  %v4319_v50 = vpop.f32.mrf.mxu3  ;;  %v1495_v4 = vld [vmem:[#allocation5 + $0x8] sm:$0xff] }
  0xa7   : > { %1370 = vst.msk [vmem:[#allocation3 + $0x20] sm:$0xff] %vm438_vm1, %v1338_v6  ;;  %v686_v16 = vadd.f32 %v685_v13, %v4256_v7  ;;  %v965_v52 = vpop.permute.xlu1 %964 }
  0xa8   : > { %1562 = vst.msk [vmem:[#allocation5 + $0x20] sm:$0xff] %vm438_vm1, %v1530_v5  ;;  %v4304_v38 = vadd.f32 %v953_v19, %v645_v26  ;;  %v1504_v19 = vld [vmem:[#allocation5 + $0x50] sm:$0xff]  ;;  %v1176_v26 = vld [vmem:[#allocation2 + $0x18] sm:$0xff] }
  0xa9   : > { %v1146_v20 = vadd.f32 %v978_v14, %v686_v16  ;;  %v1280_v14 = vld [vmem:[#allocation3 + $0x50] sm:$0xff] }
  0xaa   : > { %v1303_v56 = vmul.f32 %v4304_v38, %v4304_v38  ;;  %v1206_v5 = vadd.f32 %v1174_v55, %v4304_v38  ;;  %v1431_v13 = vmax.f32 %v1399_v63, %v4304_v38  ;;  %v1404_v63 = vld [vmem:[#allocation4 + $0x30] sm:$0xff] }
  0xab   : > { %3525 = vset.pattern.permute.xlu2 %v3808_v3  ;;  %v1307_v28 = vmul.f32 %v1146_v20, %v1146_v20  ;;  %v1210_v33 = vadd.f32 %v1178_v27, %v1146_v20  ;;  %v1435_v40 = vmax.f32 %v1403_v32, %v1146_v20  ;;  %v1531_v45 = vmin.f32 %v1499_v34, %v1146_v20  ;;  %v1401_v34 = vld [vmem:[#allocation4 + $0x18] sm:$0xff] }
  0xac   : > { %v4262_v15 = vpop.f32.mrf.mxu2  ;;  %v1335_v6 = vadd.f32 %v1303_v56, %v1271_v60  ;;  %1239 = vst.msk [vmem:[#allocation2 + $0x8] sm:$0xff] %vm438_vm1, %v1206_v5  ;;  %v1179_v56 = vld [vmem:[#allocation2 + $0x30] sm:$0xff] }
  0xad   : > { %3524 = vset.pattern.permute.xlu1 %v3798_v1  ;;  %v604_v1 = vld [vmem:[%s6352_s4 + $0xe8] sm:$0xff]  ;;  %v647_v18 = vpop.f32.mrf.mxu0  ;;  %v1339_v35 = vadd.f32 %v1307_v28, %v1275_v30  ;;  %1243 = vst.msk [vmem:[#allocation2 + $0x28] sm:$0xff] %vm438_vm1, %v1210_v33  ;;  %v1009_v51 = vpop.permute.xlu2 %1008  ;;  %v1273_v30 = vld [vmem:[#allocation3 + $0x18] sm:$0xff]  ;;  %v1276_v60 = vld [vmem:[#allocation3 + $0x30] sm:$0xff] }
  0xae   : > { %3419 = vmatmul.msk.f32.gmra.mxu3 %vm611_vm0, %v604_v1  ;;  %v648_v22 = vadd.f32 %v647_v18, %v4272_v17  ;;  %v4291_v25 = vpop.f32.mrf.mxu1  ;;  %1467 = vst.msk [vmem:[#allocation4 + $0x28] sm:$0xff] %vm438_vm1, %v1435_v40  ;;  %v1183_v1 = vld [vmem:[#allocation2 + $0x50] sm:$0xff]  ;;  %v767_v32 = vpop.f32.mrf.mxu3 }
  0xaf   : > { %1371 = vst.msk [vmem:[#allocation3 + $0x28] sm:$0xff] %vm438_vm1, %v1339_v35  ;;  %v4340_v20 = vpop.permute.xlu0 %1058  ;;  %v1497_v35 = vld [vmem:[#allocation5 + $0x18] sm:$0xff]  ;;  %v768_v40 = vadd.f32 %v767_v32, %v4256_v7 }
  0xb0   : > { %v1143_v29 = vadd.f32 %v959_v23, %v648_v22  ;;  %1563 = vst.msk [vmem:[#allocation5 + $0x28] sm:$0xff] %vm438_vm1, %v1531_v45  ;;  %v689_v22 = vadd.f32 %v4291_v25, %v4272_v17 }
  0xb1   : > { %1367 = vst.msk [vmem:[#allocation3 + $0x8] sm:$0xff] %vm438_vm1, %v1335_v6  ;;  %v727_v6 = vadd.f32 %v4262_v15, %v4256_v7 }
  0xb2   : > { %v1304_v37 = vmul.f32 %v1143_v29, %v1143_v29  ;;  %v1207_v48 = vadd.f32 %v1175_v36, %v1143_v29  ;;  %v1432_v59 = vmax.f32 %v1400_v47, %v1143_v29  ;;  %v1528_v62 = vmin.f32 %v1496_v49, %v1143_v29  ;;  %1463 = vst.msk [vmem:[#allocation4 + $0x8] sm:$0xff] %vm438_vm1, %v1431_v13  ;;  %v1405_v47 = vld [vmem:[#allocation4 + $0x38] sm:$0xff] }
  0xb3   : > { %1102 = vperm.xlu2 %3525, %v1091_v12   ;;  %v1501_v49 = vld [vmem:[#allocation5 + $0x38] sm:$0xff] }
  0xb4   : > { %v729_v31 = vpop.f32.mrf.mxu2  ;;  %v1336_v54 = vadd.f32 %v1304_v37, %v1272_v41  ;;  %1240 = vst.msk [vmem:[#allocation2 + $0x10] sm:$0xff] %vm438_vm1, %v1207_v48  ;;  %v1180_v37 = vld [vmem:[#allocation2 + $0x38] sm:$0xff] }
  0xb5   : > { %1096 = vperm.xlu1 %3524, %v1091_v12   ;;  %v730_v39 = vadd.f32 %v729_v31, %v4272_v17  ;;  %v650_v43 = vpop.f32.mrf.mxu0  ;;  %1464 = vst.msk [vmem:[#allocation4 + $0x10] sm:$0xff] %vm438_vm1, %v1432_v59 }
  0xb6   : > { %3420 = vmatmul.msk.f32.gmra.mxu3 %vm611_vm0, %v605_v9  ;;  %v651_v58 = vadd.f32 %v650_v43, %v4312_v42  ;;  %v691_v61 = vpop.f32.mrf.mxu1  ;;  %1368 = vst.msk [vmem:[#allocation3 + $0x10] sm:$0xff] %vm438_vm1, %v1336_v54  ;;  %v1277_v43 = vld [vmem:[#allocation3 + $0x38] sm:$0xff]  ;;  %v765_v54 = vadd.f32 %v4319_v50, %v4072_v53  ;;  %v4379_v5 = vpop.f32.mrf.mxu3 }
  0xb7   : > { %v1151_v57 = vadd.f32 %v1009_v51, %v730_v39  ;;  %1560 = vst.msk [vmem:[#allocation5 + $0x10] sm:$0xff] %vm438_vm1, %v1528_v62  ;;  %v984_v31 = vpop.permute.xlu1 %983 }
  0xb8   : > { %v1144_v11 = vadd.f32 %v965_v52, %v651_v58  ;;  %v1147_v39 = vadd.f32 %v984_v31, %v689_v22  ;;  %v1154_v58 = vadd.f32 %v4314_v44, %v768_v40  ;;  %v606_v52 = vld [vmem:[%s6352_s4 + $0xf8] sm:$0xff]  ;;  %v1500_v44 = vld [vmem:[#allocation5 + $0x30] sm:$0xff]  ;;  %v642_v22 = vadd.f32 %v4210_v8, %v4072_v53 }
  0xb9   : > { %v1312_v9 = vmul.f32 %v1151_v57, %v1151_v57  ;;  %v1215_v18 = vadd.f32 %v1183_v1, %v1151_v57  ;;  %v1536_v33 = vmin.f32 %v1504_v19, %v1151_v57  ;;  %v1507_v19 = vld [vmem:[#allocation5 + $0x68] sm:$0xff] }
  0xba   : > { %v1305_v27 = vmul.f32 %v1144_v11, %v1144_v11  ;;  %v1208_v25 = vadd.f32 %v1176_v26, %v1144_v11  ;;  %v1433_v41 = vmax.f32 %v1401_v34, %v1144_v11  ;;  %v1529_v45 = vmin.f32 %v1497_v35, %v1144_v11  ;;  %v1185_v26 = vld [vmem:[#allocation2 + $0x60] sm:$0xff] }
  0xbb   : > { %3527 = vset.pattern.permute.xlu2 %v3869_v21  ;;  %v1344_v23 = vadd.f32 %v1312_v9, %v1280_v14  ;;  %1248 = vst.msk [vmem:[#allocation2 + $0x50] sm:$0xff] %vm438_vm1, %v1215_v18  ;;  %v1186_v9 = vld [vmem:[#allocation2 + $0x68] sm:$0xff]  ;;  %v1315_v11 = vmul.f32 %v1154_v58, %v1154_v58  ;;  %v1436_v13 = vmax.f32 %v1404_v63, %v1147_v39  ;;  %v1506_v34 = vld [vmem:[#allocation5 + $0x60] sm:$0xff] }
  0xbc   : > { %1568 = vst.msk [vmem:[#allocation5 + $0x50] sm:$0xff] %vm438_vm1, %v1536_v33  ;;  %v1283_v14 = vld [vmem:[#allocation3 + $0x68] sm:$0xff]  ;;  %v1532_v18 = vmin.f32 %v1500_v44, %v1147_v39  ;;  %v1218_v15 = vadd.f32 %v1186_v9, %v1154_v58  ;;  %v1539_v32 = vmin.f32 %v1507_v19, %v1154_v58  ;;  %v1410_v33 = vld [vmem:[#allocation4 + $0x60] sm:$0xff] }
  0xbd   : > { %3526 = vset.pattern.permute.xlu1 %v3805_v2  ;;  %v4335_v16 = vpop.f32.mrf.mxu0  ;;  %1376 = vst.msk [vmem:[#allocation3 + $0x50] sm:$0xff] %vm438_vm1, %v1344_v23  ;;  %v1347_v23 = vadd.f32 %v1315_v11, %v1283_v14  ;;  %v1398_v63 = vld [vmem:[#allocation4] sm:$0xff] }
  0xbe   : > { %v4351_v36 = vpop.f32.mrf.mxu1  ;;  %1241 = vst.msk [vmem:[#allocation2 + $0x18] sm:$0xff] %vm438_vm1, %v1208_v25  ;;  %3421 = vmatmul.msk.f32.gmra.mxu3 %vm611_vm0, %v606_v52  ;;  %v1494_v44 = vld [vmem:[#allocation5] sm:$0xff] }
  0xbf   : > { %1465 = vst.msk [vmem:[#allocation4 + $0x18] sm:$0xff] %vm438_vm1, %v1433_v41  ;;  %v4374_v62 = vpop.permute.xlu0 %1089  ;;  %v1279_v41 = vld [vmem:[#allocation3 + $0x48] sm:$0xff] }
  0xc0   : > { %1561 = vst.msk [vmem:[#allocation5 + $0x18] sm:$0xff] %vm438_vm1, %v1529_v45 }
  0xc1   : > { %1468 = vst.msk [vmem:[#allocation4 + $0x30] sm:$0xff] %vm438_vm1, %v1436_v13  ;;  %v1288_v13 = vld [vmem:[#allocation3 + $0x90] sm:$0xff] }
  0xc2   : > { %1564 = vst.msk [vmem:[#allocation5 + $0x30] sm:$0xff] %vm438_vm1, %v1532_v18  ;;  %v1416_v18 = vld [vmem:[#allocation4 + $0x90] sm:$0xff] }
  0xc3   : > { %1114 = vperm.xlu2 %3527, %v1091_v12   ;;  %1251 = vst.msk [vmem:[#allocation2 + $0x68] sm:$0xff] %vm438_vm1, %v1218_v15  ;;  %v1512_v15 = vld [vmem:[#allocation5 + $0x90] sm:$0xff] }
  0xc4   : > { %1379 = vst.msk [vmem:[#allocation3 + $0x68] sm:$0xff] %vm438_vm1, %v1347_v23 }
  0xc5   : > { %1108 = vperm.xlu1 %3526, %v1091_v12   ;;  %v692_v12 = vadd.f32 %v691_v61, %v4312_v42  ;;  %v4363_v51 = vpop.f32.mrf.mxu0  ;;  %v1022_v61 = vpop.permute.xlu2 %1021  ;;  %1571 = vst.msk [vmem:[#allocation5 + $0x68] sm:$0xff] %vm438_vm1, %v1539_v32  ;;  %v1413_v32 = vld [vmem:[#allocation4 + $0x78] sm:$0xff] }
  0xc7   : > { %v4346_v28 = vadd.f32 %v4289_v24, %v692_v12  ;;  %v1337_v24 = vadd.f32 %v1305_v27, %v1273_v30  ;;  %v1153_v12 = vadd.f32 %v1022_v61, %v765_v54  ;;  %v1282_v30 = vld [vmem:[#allocation3 + $0x60] sm:$0xff]  ;;  %v732_v61 = vpop.f32.mrf.mxu2 }
  0xc8   : > { %v733_v11 = vadd.f32 %v732_v61, %v4312_v42  ;;  %v1502_v61 = vld [vmem:[#allocation5 + $0x40] sm:$0xff] }
  0xc9   : > { %v1212_v48 = vadd.f32 %v1180_v37, %v4346_v28  ;;  %1369 = vst.msk [vmem:[#allocation3 + $0x18] sm:$0xff] %vm438_vm1, %v1337_v24  ;;  %v1437_v59 = vmax.f32 %v1405_v47, %v4346_v28  ;;  %v1533_v50 = vmin.f32 %v1501_v49, %v4346_v28  ;;  %v1314_v27 = vmul.f32 %v1153_v12, %v1153_v12  ;;  %v1182_v24 = vld [vmem:[#allocation2 + $0x48] sm:$0xff] }
  0xca   : > { %v1217_v25 = vadd.f32 %v1185_v26, %v1153_v12  ;;  %v1442_v40 = vmax.f32 %v1410_v33, %v1153_v12  ;;  %v1538_v45 = vmin.f32 %v1506_v34, %v1153_v12  ;;  %v1407_v47 = vld [vmem:[#allocation4 + $0x48] sm:$0xff]  ;;  %v1509_v33 = vld [vmem:[#allocation5 + $0x78] sm:$0xff] }
  0xcb   : > { %3529 = vset.pattern.permute.xlu2 %v3805_v2  ;;  %v1527_v2 = vmin.f32 %v1495_v4, %v4304_v38  ;;  %v1309_v38 = vmul.f32 %v4346_v28, %v4346_v28  ;;  %1245 = vst.msk [vmem:[#allocation2 + $0x38] sm:$0xff] %vm438_vm1, %v1212_v48  ;;  %v1211_v4 = vadd.f32 %v1179_v56, %v1147_v39  ;;  %v1173_v56 = vld [vmem:[#allocation2] sm:$0xff] }
  0xcc   : > { %1469 = vst.msk [vmem:[#allocation4 + $0x38] sm:$0xff] %vm438_vm1, %v1437_v59  ;;  %v1346_v35 = vadd.f32 %v1314_v27, %v1282_v30  ;;  %v1270_v59 = vld [vmem:[#allocation3] sm:$0xff]  ;;  %v724_v30 = vadd.f32 %v4234_v10, %v4072_v53  ;;  %v1281_v10 = vld [vmem:[#allocation3 + $0x58] sm:$0xff] }
  0xcd   : > { %3528 = vset.pattern.permute.xlu1 %v3808_v3  ;;  %v1408_v3 = vld [vmem:[#allocation4 + $0x50] sm:$0xff]  ;;  %1559 = vst.msk [vmem:[#allocation5 + $0x8] sm:$0xff] %vm438_vm1, %v1527_v2  ;;  %v1341_v55 = vadd.f32 %v1309_v38, %v1277_v43  ;;  %v1003_v2 = vpop.permute.xlu1 %1002  ;;  %v811_v31 = vpop.f32.mrf.mxu0 }
  0xce   : > { %v1440_v29 = vmax.f32 %v1408_v3, %v1151_v57  ;;  %v1308_v57 = vmul.f32 %v1147_v39, %v1147_v39  ;;  %v4387_v3 = vpop.f32.mrf.mxu1  ;;  %1565 = vst.msk [vmem:[#allocation5 + $0x38] sm:$0xff] %vm438_vm1, %v1533_v50  ;;  %v1150_v28 = vadd.f32 %v1003_v2, %v727_v6  ;;  %v812_v39 = vadd.f32 %v811_v31, %v4272_v17  ;;  %v773_v43 = vpop.f32.mrf.mxu3 }
  0xcf   : > { %1373 = vst.msk [vmem:[#allocation3 + $0x38] sm:$0xff] %vm438_vm1, %v1341_v55  ;;  %v947_v8 = vpop.permute.xlu0 %946  ;;  %v774_v55 = vadd.f32 %v773_v43, %v4312_v42  ;;  %v1505_v43 = vld [vmem:[#allocation5 + $0x58] sm:$0xff] }
  0xd0   : > { %1472 = vst.msk [vmem:[#allocation4 + $0x50] sm:$0xff] %vm438_vm1, %v1440_v29  ;;  %v1340_v1 = vadd.f32 %v1308_v57, %v1276_v60  ;;  %v1311_v37 = vmul.f32 %v1150_v28, %v1150_v28  ;;  %v1141_v38 = vadd.f32 %v947_v8, %v642_v22  ;;  %v1214_v48 = vadd.f32 %v1182_v24, %v1150_v28  ;;  %v1040_v60 = vpop.permute.xlu2 %1039  ;;  %v1188_v22 = vld [vmem:[#allocation2 + $0x78] sm:$0xff] }
  0xd1   : > { %1244 = vst.msk [vmem:[#allocation2 + $0x30] sm:$0xff] %vm438_vm1, %v1211_v4  ;;  %v1439_v52 = vmax.f32 %v1407_v47, %v1150_v28  ;;  %v809_v47 = vadd.f32 %v4363_v51, %v4256_v7  ;;  %v771_v51 = vadd.f32 %v4379_v5, %v4272_v17 }
  0xd2   : > { %1372 = vst.msk [vmem:[#allocation3 + $0x30] sm:$0xff] %vm438_vm1, %v1340_v1  ;;  %v1343_v54 = vadd.f32 %v1311_v37, %v1279_v41  ;;  %v1302_v57 = vmul.f32 %v1141_v38, %v1141_v38  ;;  %v1205_v4 = vadd.f32 %v1173_v56, %v1141_v38  ;;  %v1191_v1 = vld [vmem:[#allocation2 + $0x90] sm:$0xff]  ;;  %v1430_v12 = vmax.f32 %v1398_v63, %v1141_v38  ;;  %v1196_v63 = vld [vmem:[#allocation2 + $0xb8] sm:$0xff] }
  0xd3   : > { %1133 = vperm.xlu2 %3529, %v3974_v46   ;;  %1250 = vst.msk [vmem:[#allocation2 + $0x60] sm:$0xff] %vm438_vm1, %v1217_v25  ;;  %v1526_v2 = vmin.f32 %v1494_v44, %v1141_v38 }
  0xd4   : > { %1378 = vst.msk [vmem:[#allocation3 + $0x60] sm:$0xff] %vm438_vm1, %v1346_v35  ;;  %v1334_v6 = vadd.f32 %v1302_v57, %v1270_v59  ;;  %v1184_v35 = vld [vmem:[#allocation2 + $0x58] sm:$0xff]  ;;  %v1278_v57 = vld [vmem:[#allocation3 + $0x40] sm:$0xff] }
  0xd5   : > { %1127 = vperm.xlu1 %3528, %v3974_v46   ;;  %1474 = vst.msk [vmem:[#allocation4 + $0x60] sm:$0xff] %vm438_vm1, %v1442_v40  ;;  %v1409_v40 = vld [vmem:[#allocation4 + $0x58] sm:$0xff]  ;;  %v1406_v59 = vld [vmem:[#allocation4 + $0x40] sm:$0xff] }
  0xd6   : > { %v4403_v49 = vpop.f32.mrf.mxu1  ;;  %1570 = vst.msk [vmem:[#allocation5 + $0x60] sm:$0xff] %vm438_vm1, %v1538_v45 }
  0xd7   : > { %1247 = vst.msk [vmem:[#allocation2 + $0x48] sm:$0xff] %vm438_vm1, %v1214_v48  ;;  %v1015_v14 = vpop.permute.xlu1 %1014  ;;  %v997_v25 = vpop.permute.xlu0 %996  ;;  %v1181_v48 = vld [vmem:[#allocation2 + $0x40] sm:$0xff] }
  0xd8   : > { %1375 = vst.msk [vmem:[#allocation3 + $0x48] sm:$0xff] %vm438_vm1, %v1343_v54  ;;  %v1152_v26 = vadd.f32 %v1015_v14, %v733_v11  ;;  %v1149_v41 = vadd.f32 %v997_v25, %v724_v30  ;;  %v1421_v11 = vld [vmem:[#allocation4 + $0xb8] sm:$0xff]  ;;  %v847_v14 = vadd.f32 %v4351_v36, %v4072_v53  ;;  %v1415_v36 = vld [vmem:[#allocation4 + $0x88] sm:$0xff] }
  0xd9   : > { %1471 = vst.msk [vmem:[#allocation4 + $0x48] sm:$0xff] %vm438_vm1, %v1439_v52 }
  0xda   : > { %1238 = vst.msk [vmem:[#allocation2] sm:$0xff] %vm438_vm1, %v1205_v4  ;;  %v1313_v24 = vmul.f32 %v1152_v26, %v1152_v26  ;;  %v1216_v45 = vadd.f32 %v1184_v35, %v1152_v26  ;;  %v1310_v54 = vmul.f32 %v1149_v41, %v1149_v41  ;;  %v1441_v56 = vmax.f32 %v1409_v40, %v1152_v26 }
  0xdb   : > { %1366 = vst.msk [vmem:[#allocation3] sm:$0xff] %vm438_vm1, %v1334_v6  ;;  %v1537_v52 = vmin.f32 %v1505_v43, %v1152_v26  ;;  %v1534_v5 = vmin.f32 %v1502_v61, %v1149_v41 }
  0xdc   : > { %1462 = vst.msk [vmem:[#allocation4] sm:$0xff] %vm438_vm1, %v1430_v12 }
  0xdd   : > { %3530 = vset.pattern.permute.xlu1 %v3869_v21  ;;  %v1411_v21 = vld [vmem:[#allocation4 + $0x68] sm:$0xff]  ;;  %1558 = vst.msk [vmem:[#allocation5] sm:$0xff] %vm438_vm1, %v1526_v2 }
  0xde   : > { %v1443_v29 = vmax.f32 %v1411_v21, %v1154_v58  ;;  %v1159_v58 = vadd.f32 %v4340_v20, %v812_v39  ;;  %v1156_v20 = vadd.f32 %v1040_v60, %v774_v55  ;;  %1249 = vst.msk [vmem:[#allocation2 + $0x58] sm:$0xff] %vm438_vm1, %v1216_v45 }
  0xdf   : > { %1473 = vst.msk [vmem:[#allocation4 + $0x58] sm:$0xff] %vm438_vm1, %v1441_v56 }
  0xe0   : > { %1475 = vst.msk [vmem:[#allocation4 + $0x68] sm:$0xff] %vm438_vm1, %v1443_v29  ;;  %v1320_v9 = vmul.f32 %v1159_v58, %v1159_v58  ;;  %v1223_v21 = vadd.f32 %v1191_v1, %v1159_v58  ;;  %v1317_v23 = vmul.f32 %v1156_v20, %v1156_v20  ;;  %v1448_v27 = vmax.f32 %v1416_v18, %v1159_v58  ;;  %v855_v29 = vpop.f32.mrf.mxu1  ;;  %v1190_v18 = vld [vmem:[#allocation2 + $0x88] sm:$0xff] }
  0xe1   : > { %v1544_v31 = vmin.f32 %v1512_v15, %v1159_v58  ;;  %v1220_v34 = vadd.f32 %v1188_v22, %v1156_v20  ;;  %v856_v37 = vadd.f32 %v855_v29, %v4312_v42  ;;  %v1445_v38 = vmax.f32 %v1413_v32, %v1156_v20  ;;  %v1053_v58 = vpop.permute.xlu2 %1052  ;;  %v1594_v60 = vld [vmem:[#allocation2] sm:$0xff]  ;;  %1569 = vst.msk [vmem:[#allocation5 + $0x58] sm:$0xff] %vm438_vm1, %v1537_v52  ;;  %v1511_v29 = vld [vmem:[#allocation5 + $0x88] sm:$0xff] }
  0xe2   : > { %v1352_v19 = vadd.f32 %v1320_v9, %v1288_v13  ;;  %1256 = vst.msk [vmem:[#allocation2 + $0x90] sm:$0xff] %vm438_vm1, %v1223_v21  ;;  %v1541_v39 = vmin.f32 %v1509_v33, %v1156_v20  ;;  %v4437_v4 = vadd.f32 %v1053_v58, %v809_v47  ;;  %v1626_v6 = vsel %vm438_vm1, %v1594_v60, 0.0  ;;  %v1293_v9 = vld [vmem:[#allocation3 + $0xb8] sm:$0xff]  ;;  %v1187_v33 = vld [vmem:[#allocation2 + $0x70] sm:$0xff]  ;;  %v1607_v52 = vld [vmem:[#allocation2 + $0x68] sm:$0xff] }
  0xe3   : > { %1480 = vst.msk [vmem:[#allocation4 + $0x90] sm:$0xff] %vm438_vm1, %v1448_v27  ;;  %v1164_v55 = vadd.f32 %v4374_v62, %v856_v37  ;;  %v1342_v62 = vadd.f32 %v1310_v54, %v1278_v57  ;;  %v1438_v1 = vmax.f32 %v1406_v59, %v1149_v41  ;;  %v1517_v13 = vld [vmem:[#allocation5 + $0xb8] sm:$0xff]  ;;  %v1598_v27 = vld [vmem:[#allocation2 + $0x20] sm:$0xff]  ;;  %v1284_v37 = vld [vmem:[#allocation3 + $0x70] sm:$0xff]  ;;  %v806_v47 = vadd.f32 %v4335_v16, %v4072_v53 }
  0xe4   : > { %1384 = vst.msk [vmem:[#allocation3 + $0x90] sm:$0xff] %vm438_vm1, %v1352_v19  ;;  %v1319_v21 = vmul.f32 %v4437_v4, %v4437_v4  ;;  %v928_v19 = vpop.f32.mrf.mxu3  ;;  %v1222_v30 = vadd.f32 %v1190_v18, %v4437_v4  ;;  %v1638_v35 = vsel %vm438_vm1, %v1598_v27, 0.0  ;;  %v1290_v57 = vld [vmem:[#allocation3 + $0xa0] sm:$0xff]  ;;  %v853_v60 = vadd.f32 %v4403_v49, %v4272_v17 }
  0xe5   : > { %1139 = vperm.xlu1 %3530, %v3974_v46   ;;  %v1503_v46 = vld [vmem:[#allocation5 + $0x48] sm:$0xff]  ;;  %1576 = vst.msk [vmem:[#allocation5 + $0x90] sm:$0xff] %vm438_vm1, %v1544_v31  ;;  %v1325_v44 = vmul.f32 %v1164_v55, %v1164_v55  ;;  %v1228_v12 = vadd.f32 %v1196_v63, %v1164_v55  ;;  %v1453_v22 = vmax.f32 %v1421_v11, %v1164_v55  ;;  %v1606_v59 = vld [vmem:[#allocation2 + $0x60] sm:$0xff] }
  0xe6   : > { %v1535_v50 = vmin.f32 %v1503_v46, %v1150_v28  ;;  %v1285_v28 = vld [vmem:[#allocation3 + $0x78] sm:$0xff]  ;;  %1253 = vst.msk [vmem:[#allocation2 + $0x78] sm:$0xff] %vm438_vm1, %v1220_v34  ;;  %v1345_v46 = vadd.f32 %v1313_v24, %v1281_v10  ;;  %v929_v31 = vadd.f32 %v928_v19, %v4072_v53  ;;  %v1447_v24 = vmax.f32 %v1415_v36, %v4437_v4  ;;  %v1418_v16 = vld [vmem:[#allocation4 + $0xa0] sm:$0xff] }
  0xe7   : > { %v1349_v8 = vadd.f32 %v1317_v23, %v1285_v28  ;;  %1477 = vst.msk [vmem:[#allocation4 + $0x78] sm:$0xff] %vm438_vm1, %v1445_v38  ;;  %v1034_v20 = vpop.permute.xlu1 %1033  ;;  %v1357_v2 = vadd.f32 %v1325_v44, %v1293_v9  ;;  %v1287_v23 = vld [vmem:[#allocation3 + $0x88] sm:$0xff]  ;;  %v1549_v28 = vmin.f32 %v1517_v13, %v1164_v55  ;;  %v1543_v38 = vmin.f32 %v1511_v29, %v4437_v4  ;;  %v4475_v55 = vpop.f32.mrf.mxu2  ;;  %v1201_v44 = vld [vmem:[#allocation2 + $0xe0] sm:$0xff]  ;;  %v1604_v29 = vld [vmem:[#allocation2 + $0x50] sm:$0xff] }
  0xe8   : > { %1567 = vst.msk [vmem:[#allocation5 + $0x48] sm:$0xff] %vm438_vm1, %v1535_v50  ;;  %v1213_v50 = vadd.f32 %v1181_v48, %v1149_v41  ;;  %v4448_v15 = vadd.f32 %v1034_v20, %v771_v51  ;;  %v1351_v32 = vadd.f32 %v1319_v21, %v1287_v23  ;;  %v1508_v41 = vld [vmem:[#allocation5 + $0x70] sm:$0xff]  ;;  %v1193_v48 = vld [vmem:[#allocation2 + $0xa0] sm:$0xff]  ;;  %v1662_v17 = vsel %vm438_vm1, %v1606_v59, 0.0  ;;  %v814_v20 = vpop.f32.mrf.mxu0 }
  0xe9   : > { %1381 = vst.msk [vmem:[#allocation3 + $0x78] sm:$0xff] %vm438_vm1, %v1349_v8  ;;  %v1122_v8 = vpop.permute.xlu0 %1121  ;;  %v1514_v51 = vld [vmem:[#allocation5 + $0xa0] sm:$0xff]  ;;  %v815_v19 = vadd.f32 %v814_v20, %v4312_v42 }
  0xea   : > { %1573 = vst.msk [vmem:[#allocation5 + $0x78] sm:$0xff] %vm438_vm1, %v1541_v39  ;;  %v1316_v34 = vmul.f32 %v4448_v15, %v4448_v15  ;;  %v1412_v39 = vld [vmem:[#allocation4 + $0x70] sm:$0xff]  ;;  %v1219_v43 = vadd.f32 %v1187_v33, %v4448_v15  ;;  %v4468_v45 = vadd.f32 %v1122_v8, %v929_v31  ;;  %v1540_v53 = vmin.f32 %v1508_v41, %v4448_v15  ;;  %v1298_v4 = vld [vmem:[#allocation3 + $0xe0] sm:$0xff]  ;;  %v1599_v33 = vld [vmem:[#allocation2 + $0x28] sm:$0xff] }
  0xeb   : > { %1377 = vst.msk [vmem:[#allocation3 + $0x58] sm:$0xff] %vm438_vm1, %v1345_v46  ;;  %v1444_v56 = vmax.f32 %v1412_v39, %v4448_v15  ;;  %v1426_v11 = vld [vmem:[#allocation4 + $0xe0] sm:$0xff]  ;;  %v1656_v39 = vsel %vm438_vm1, %v1604_v29, 0.0  ;;  %v1515_v29 = vld [vmem:[#allocation5 + $0xa8] sm:$0xff] }
  0xec   : > { %1246 = vst.msk [vmem:[#allocation2 + $0x40] sm:$0xff] %vm438_vm1, %v1213_v50  ;;  %v1348_v46 = vadd.f32 %v1316_v34, %v1284_v37  ;;  %v1330_v50 = vmul.f32 %v4468_v45, %v4468_v45  ;;  %v1522_v13 = vld [vmem:[#allocation5 + $0xe0] sm:$0xff]  ;;  %v1458_v23 = vmax.f32 %v1426_v11, %v4468_v45  ;;  %v1423_v11 = vld [vmem:[#allocation4 + $0xc8] sm:$0xff] }
  0xed   : > { %1374 = vst.msk [vmem:[#allocation3 + $0x40] sm:$0xff] %vm438_vm1, %v1342_v62  ;;  %v1072_v26 = vpop.permute.xlu2 %1071  ;;  %v1595_v62 = vld [vmem:[#allocation2 + $0x8] sm:$0xff]  ;;  %v1189_v18 = vld [vmem:[#allocation2 + $0x80] sm:$0xff] }
  0xee   : > { %1470 = vst.msk [vmem:[#allocation4 + $0x40] sm:$0xff] %vm438_vm1, %v1438_v1  ;;  %v4458_v25 = vadd.f32 %v1072_v26, %v847_v14  ;;  %v1665_v1 = vsel %vm438_vm1, %v1607_v52, 0.0  ;;  %v1233_v14 = vadd.f32 %v1201_v44, %v4468_v45  ;;  %v1286_v26 = vld [vmem:[#allocation3 + $0x80] sm:$0xff]  ;;  %v1198_v44 = vld [vmem:[#allocation2 + $0xc8] sm:$0xff] }
  0xef   : > { %1566 = vst.msk [vmem:[#allocation5 + $0x40] sm:$0xff] %vm438_vm1, %v1534_v5  ;;  %v1414_v36 = vld [vmem:[#allocation4 + $0x80] sm:$0xff] }
  0xf0   : > { %1261 = vst.msk [vmem:[#allocation2 + $0xb8] sm:$0xff] %vm438_vm1, %v1228_v12  ;;  %v1322_v54 = vmul.f32 %v4458_v25, %v4458_v25  ;;  %v1225_v61 = vadd.f32 %v1193_v48, %v4458_v25  ;;  %v1450_v49 = vmax.f32 %v1418_v16, %v4458_v25  ;;  %v1546_v5 = vmin.f32 %v1514_v51, %v4458_v25  ;;  %v1510_v31 = vld [vmem:[#allocation5 + $0x80] sm:$0xff]  ;;  %v1195_v25 = vld [vmem:[#allocation2 + $0xb0] sm:$0xff]  ;;  %v1417_v51 = vld [vmem:[#allocation4 + $0x98] sm:$0xff] }
  0xf1   : > { %1389 = vst.msk [vmem:[#allocation3 + $0xb8] sm:$0xff] %vm438_vm1, %v1357_v2  ;;  %v1629_v12 = vsel %vm438_vm1, %v1595_v62, 0.0  ;;  %v1362_v2 = vadd.f32 %v1330_v50, %v1298_v4  ;;  %v1754_v16 = vld [vmem:[#allocation3] sm:$0xff]  ;;  %v1513_v50 = vld [vmem:[#allocation5 + $0x98] sm:$0xff] }
  0xf2   : > { %1485 = vst.msk [vmem:[#allocation4 + $0xb8] sm:$0xff] %vm438_vm1, %v1453_v22  ;;  %v1354_v63 = vadd.f32 %v1322_v54, %v1290_v57  ;;  %v890_v22 = vpop.f32.mrf.mxu2 }
  0xf3   : > { %1581 = vst.msk [vmem:[#allocation5 + $0xb8] sm:$0xff] %vm438_vm1, %v1549_v28  ;;  %v1602_v10 = vld [vmem:[#allocation2 + $0x40] sm:$0xff]  ;;  %v1554_v28 = vmin.f32 %v1522_v13, %v4468_v45  ;;  %v850_v45 = vadd.f32 %v4387_v3, %v4256_v7  ;;  %v1289_v3 = vld [vmem:[#allocation3 + $0x98] sm:$0xff] }
  0xf4   : > { %1255 = vst.msk [vmem:[#allocation2 + $0x88] sm:$0xff] %vm438_vm1, %v1222_v30  ;;  %v1650_v40 = vsel %vm438_vm1, %v1602_v10, 0.0  ;;  %v1603_v30 = vld [vmem:[#allocation2 + $0x48] sm:$0xff] }
  0xf5   : > { %1383 = vst.msk [vmem:[#allocation3 + $0x88] sm:$0xff] %vm438_vm1, %v1351_v32  ;;  %1651 = vadd.xlane.f32.xlu0 %v1650_v40  ;;  %v1653_v40 = vsel %vm438_vm1, %v1603_v30, 0.0 }
  0xf6   : > { %1479 = vst.msk [vmem:[#allocation4 + $0x88] sm:$0xff] %vm438_vm1, %v1447_v24  ;;  %v891_v24 = vadd.f32 %v890_v22, %v4256_v7  ;;  %v1291_v22 = vld [vmem:[#allocation3 + $0xa8] sm:$0xff] }
  0xf7   : > { %v1047_v58 = vpop.permute.xlu1 %1046  ;;  %1575 = vst.msk [vmem:[#allocation5 + $0x88] sm:$0xff] %vm438_vm1, %v1543_v38  ;;  %v1292_v38 = vld [vmem:[#allocation3 + $0xb0] sm:$0xff] }
  0xf8   : > { %1252 = vst.msk [vmem:[#allocation2 + $0x70] sm:$0xff] %vm438_vm1, %v1219_v43  ;;  %v1420_v43 = vld [vmem:[#allocation4 + $0xb0] sm:$0xff] }
  0xf9   : > { %1380 = vst.msk [vmem:[#allocation3 + $0x70] sm:$0xff] %vm438_vm1, %v1348_v46  ;;  %v1516_v46 = vld [vmem:[#allocation5 + $0xb0] sm:$0xff] }
  0xfa   : > { %1476 = vst.msk [vmem:[#allocation4 + $0x70] sm:$0xff] %vm438_vm1, %v1444_v56  ;;  %v1192_v56 = vld [vmem:[#allocation2 + $0x98] sm:$0xff]  ;;  %v4533_v52 = vpop.f32.mrf.mxu2 }
  0xfb   : > { %1572 = vst.msk [vmem:[#allocation5 + $0x70] sm:$0xff] %vm438_vm1, %v1540_v53  ;;  %v1596_v53 = vld [vmem:[#allocation2 + $0x10] sm:$0xff] }
  0xfc   : > { %1627 = vadd.xlane.f32.xlu2 %v1626_v6  ;;  %v4488_v6 = vadd.f32 %v1047_v58, %v806_v47  ;;  %1258 = vst.msk [vmem:[#allocation2 + $0xa0] sm:$0xff] %vm438_vm1, %v1225_v61  ;;  %v1641_v47 = vsel %vm438_vm1, %v1599_v33, 0.0  ;;  %v1597_v61 = vld [vmem:[#allocation2 + $0x18] sm:$0xff]  ;;  %v1632_v20 = vsel %vm438_vm1, %v1596_v53, 0.0 }
  0xfd   : > { %v1084_v9 = vpop.permute.xlu2 %1083  ;;  %1630 = vadd.xlane.f32.xlu0 %v1629_v12  ;;  %1386 = vst.msk [vmem:[#allocation3 + $0xa0] sm:$0xff] %vm438_vm1, %v1354_v63  ;;  %v1519_v12 = vld [vmem:[#allocation5 + $0xc8] sm:$0xff] }
  0xfe   : > { %v1318_v21 = vmul.f32 %v4488_v6, %v4488_v6  ;;  %v4502_v15 = vadd.f32 %v1084_v9, %v853_v60  ;;  %1482 = vst.msk [vmem:[#allocation4 + $0xa0] sm:$0xff] %vm438_vm1, %v1450_v49  ;;  %v1221_v32 = vadd.f32 %v1189_v18, %v4488_v6  ;;  %v1446_v37 = vmax.f32 %v1414_v36, %v4488_v6  ;;  %v1295_v49 = vld [vmem:[#allocation3 + $0xc8] sm:$0xff]  ;;  %v1600_v36 = vld [vmem:[#allocation2 + $0x30] sm:$0xff] }
  0xff   : > { %1578 = vst.msk [vmem:[#allocation5 + $0xa0] sm:$0xff] %vm438_vm1, %v1546_v5  ;;  %v1542_v41 = vmin.f32 %v1510_v31, %v4488_v6  ;;  %v1635_v9 = vsel %vm438_vm1, %v1597_v61, 0.0 }
 0x100   : > { %1266 = vst.msk [vmem:[#allocation2 + $0xe0] sm:$0xff] %vm438_vm1, %v1233_v14  ;;  %v1350_v34 = vadd.f32 %v1318_v21, %v1286_v26  ;;  %v1324_v8 = vmul.f32 %v4502_v15, %v4502_v15  ;;  %v1227_v48 = vadd.f32 %v1195_v25, %v4502_v15  ;;  %v1452_v7 = vmax.f32 %v1420_v43, %v4502_v15  ;;  %v1601_v26 = vld [vmem:[#allocation2 + $0x38] sm:$0xff]  ;;  %v3598_v25 = vld [vmem:[%s6349_s1] sm:$0xff] }
 0x101   : > { %1394 = vst.msk [vmem:[#allocation3 + $0xe0] sm:$0xff] %vm438_vm1, %v1362_v2  ;;  %v1548_v60 = vmin.f32 %v1516_v46, %v4502_v15  ;;  %v1194_v2 = vld [vmem:[#allocation2 + $0xa8] sm:$0xff] }
 0x102   : > { %1490 = vst.msk [vmem:[#allocation4 + $0xe0] sm:$0xff] %vm438_vm1, %v1458_v23  ;;  %v1356_v54 = vadd.f32 %v1324_v8, %v1292_v38  ;;  %v896_v21 = vpop.f32.mrf.mxu2  ;;  %v888_v8 = vadd.f32 %v3598_v25, %v4475_v55  ;;  %v1644_v38 = vsel %vm438_vm1, %v1600_v36, 0.0  ;;  %v1521_v55 = vld [vmem:[#allocation5 + $0xd8] sm:$0xff] }
 0x103   : > { %1586 = vst.msk [vmem:[#allocation5 + $0xe0] sm:$0xff] %vm438_vm1, %v1554_v28  ;;  %v897_v23 = vadd.f32 %v896_v21, %v4312_v42  ;;  %v1419_v28 = vld [vmem:[#allocation4 + $0xa8] sm:$0xff]  ;;  %v1647_v42 = vsel %vm438_vm1, %v1601_v26, 0.0 }
 0x104   : > { %1639 = vadd.xlane.f32.xlu2 %v1638_v35  ;;  %1254 = vst.msk [vmem:[#allocation2 + $0x80] sm:$0xff] %vm438_vm1, %v1221_v32  ;;  %v1759_v32 = vld [vmem:[#allocation3 + $0x28] sm:$0xff] }
 0x105   : > { %1642 = vadd.xlane.f32.xlu0 %v1641_v47  ;;  %1382 = vst.msk [vmem:[#allocation3 + $0x80] sm:$0xff] %vm438_vm1, %v1350_v34  ;;  %v1200_v34 = vld [vmem:[#allocation2 + $0xd8] sm:$0xff]  ;;  %v1197_v47 = vld [vmem:[#allocation2 + $0xc0] sm:$0xff] }
 0x106   : > { %1478 = vst.msk [vmem:[#allocation4 + $0x80] sm:$0xff] %vm438_vm1, %v1446_v37 }
 0x107   : > { %v1065_v27 = vpop.permute.xlu1 %1064  ;;  %1574 = vst.msk [vmem:[#allocation5 + $0x80] sm:$0xff] %vm438_vm1, %v1542_v41 }
 0x108   : > { %v4514_v35 = vadd.f32 %v1065_v27, %v815_v19  ;;  %1260 = vst.msk [vmem:[#allocation2 + $0xb0] sm:$0xff] %vm438_vm1, %v1227_v48 }
 0x109   : > { %1388 = vst.msk [vmem:[#allocation3 + $0xb0] sm:$0xff] %vm438_vm1, %v1356_v54 }
 0x10a   : > { %v1321_v57 = vmul.f32 %v4514_v35, %v4514_v35  ;;  %v1224_v62 = vadd.f32 %v1192_v56, %v4514_v35  ;;  %1484 = vst.msk [vmem:[#allocation4 + $0xb0] sm:$0xff] %vm438_vm1, %v1452_v7  ;;  %v1545_v5 = vmin.f32 %v1513_v50, %v4514_v35  ;;  %v1758_v56 = vld [vmem:[#allocation3 + $0x20] sm:$0xff] }
 0x10b   : > { %1580 = vst.msk [vmem:[#allocation5 + $0xb0] sm:$0xff] %vm438_vm1, %v1548_v60  ;;  %v1422_v7 = vld [vmem:[#allocation4 + $0xc0] sm:$0xff]  ;;  %v1605_v60 = vld [vmem:[#allocation2 + $0x58] sm:$0xff]  ;;  %v1798_v50 = vsel %vm438_vm1, %v1758_v56, 0.0  ;;  %v1427_v56 = vld [vmem:[#allocation4 + $0xe8] sm:$0xff] }
 0x10c   : > { %1666 = vadd.xlane.f32.xlu2 %v1665_v1  ;;  %v1353_v63 = vadd.f32 %v1321_v57, %v1289_v3  ;;  %v1786_v1 = vsel %vm438_vm1, %v1754_v16, 0.0  ;;  %1257 = vst.msk [vmem:[#allocation2 + $0x98] sm:$0xff] %vm438_vm1, %v1224_v62  ;;  %v1755_v3 = vld [vmem:[#allocation3 + $0x8] sm:$0xff] }
 0x10d   : > { %v1103_v10 = vpop.permute.xlu2 %1102  ;;  %1787 = vadd.xlane.f32.xlu0 %v1786_v1  ;;  %1577 = vst.msk [vmem:[#allocation5 + $0x98] sm:$0xff] %vm438_vm1, %v1545_v5  ;;  %v1789_v62 = vsel %vm438_vm1, %v1755_v3, 0.0  ;;  %v3599_v1 = vld [vmem:[%s6349_s1 + $0x10] sm:$0xff]  ;;  %v1610_v5 = vld [vmem:[#allocation2 + $0x80] sm:$0xff]  ;;  %v1299_v3 = vld [vmem:[#allocation3 + $0xe8] sm:$0xff] }
 0x10e   : > { %v4531_v58 = vadd.f32 %v1103_v10, %v891_v24  ;;  %1385 = vst.msk [vmem:[#allocation3 + $0x98] sm:$0xff] %vm438_vm1, %v1353_v63  ;;  %v1297_v24 = vld [vmem:[#allocation3 + $0xd8] sm:$0xff] }
 0x10f   : > { %1663 = vadd.xlane.f32.xlu1 %v1662_v17  ;;  %v1449_v17 = vmax.f32 %v1417_v51, %v4514_v35 }
 0x110   : > { %v1327_v4 = vmul.f32 %v4531_v58, %v4531_v58  ;;  %v1230_v13 = vadd.f32 %v1198_v44, %v4531_v58  ;;  %v1455_v19 = vmax.f32 %v1423_v11, %v4531_v58  ;;  %v1551_v27 = vmin.f32 %v1519_v12, %v4531_v58  ;;  %v1294_v58 = vld [vmem:[#allocation3 + $0xc0] sm:$0xff]  ;;  %v1524_v11 = vld [vmem:[#allocation5 + $0xf0] sm:$0xff] }
 0x111   : > { %1481 = vst.msk [vmem:[#allocation4 + $0x98] sm:$0xff] %vm438_vm1, %v1449_v17  ;;  %v1659_v44 = vsel %vm438_vm1, %v1605_v60, 0.0 }
 0x112   : > { %v1359_v14 = vadd.f32 %v1327_v4, %v1295_v49  ;;  %1263 = vst.msk [vmem:[#allocation2 + $0xc8] sm:$0xff] %vm438_vm1, %v1230_v13  ;;  %v1608_v49 = vld [vmem:[#allocation2 + $0x70] sm:$0xff]  ;;  %v1611_v13 = vld [vmem:[#allocation2 + $0x88] sm:$0xff] }
 0x113   : > { %1487 = vst.msk [vmem:[#allocation4 + $0xc8] sm:$0xff] %vm438_vm1, %v1455_v19  ;;  %v1677_v26 = vsel %vm438_vm1, %v1611_v13, 0.0 }
 0x114   : > { %1657 = vadd.xlane.f32.xlu2 %v1656_v39  ;;  %1391 = vst.msk [vmem:[#allocation3 + $0xc8] sm:$0xff] %vm438_vm1, %v1359_v14  ;;  %v1425_v39 = vld [vmem:[#allocation4 + $0xd8] sm:$0xff]  ;;  %v894_v14 = vadd.f32 %v3599_v1, %v4533_v52  ;;  %v1199_v52 = vld [vmem:[#allocation2 + $0xd0] sm:$0xff] }
 0x115   : > { %1583 = vst.msk [vmem:[#allocation5 + $0xc8] sm:$0xff] %vm438_vm1, %v1551_v27 }
 0x117   : > { %1654 = vadd.xlane.f32.xlu1 %v1653_v40  ;;  %v1078_v59 = vpop.permute.xlu1 %1077  ;;  %v1801_v40 = vsel %vm438_vm1, %v1759_v32, 0.0  ;;  %v1760_v32 = vld [vmem:[#allocation3 + $0x30] sm:$0xff] }
 0x118   : > { %v4544_v6 = vadd.f32 %v1078_v59, %v850_v45  ;;  %1802 = vadd.xlane.f32.xlu0 %v1801_v40  ;;  %v1518_v59 = vld [vmem:[#allocation5 + $0xc0] sm:$0xff]  ;;  %v1763_v40 = vld [vmem:[#allocation3 + $0x48] sm:$0xff] }
 0x11a   : > { %v1323_v18 = vmul.f32 %v4544_v6, %v4544_v6  ;;  %v1226_v30 = vadd.f32 %v1194_v2, %v4544_v6  ;;  %v1451_v35 = vmax.f32 %v1419_v28, %v4544_v6  ;;  %v1547_v10 = vmin.f32 %v1515_v29, %v4544_v6  ;;  %v1300_v2 = vld [vmem:[#allocation3 + $0xf0] sm:$0xff] }
 0x11b   : > { %v1424_v28 = vld [vmem:[#allocation4 + $0xd0] sm:$0xff] }
 0x11c   : > { %1636 = vadd.xlane.f32.xlu2 %v1635_v9  ;;  %v1355_v33 = vadd.f32 %v1323_v18, %v1291_v22  ;;  %1259 = vst.msk [vmem:[#allocation2 + $0xa8] sm:$0xff] %vm438_vm1, %v1226_v30  ;;  %v1203_v9 = vld [vmem:[#allocation2 + $0xf0] sm:$0xff]  ;;  %v1668_v18 = vsel %vm438_vm1, %v1608_v49, 0.0  ;;  %v1674_v22 = vsel %vm438_vm1, %v1610_v5, 0.0  ;;  %v1767_v5 = vld [vmem:[#allocation3 + $0x68] sm:$0xff] }
 0x11d   : > { %v1115_v15 = vpop.permute.xlu2 %1114  ;;  %1483 = vst.msk [vmem:[#allocation4 + $0xa8] sm:$0xff] %vm438_vm1, %v1451_v35  ;;  %v1520_v29 = vld [vmem:[#allocation5 + $0xd0] sm:$0xff]  ;;  %v1825_v13 = vsel %vm438_vm1, %v1767_v5, 0.0 }
 0x11e   : > { %v1168_v31 = vadd.f32 %v1115_v15, %v897_v23  ;;  %1387 = vst.msk [vmem:[#allocation3 + $0xa8] sm:$0xff] %vm438_vm1, %v1355_v33  ;;  %v1756_v33 = vld [vmem:[#allocation3 + $0x10] sm:$0xff] }
 0x11f   : > { %1633 = vadd.xlane.f32.xlu1 %v1632_v20  ;;  %1579 = vst.msk [vmem:[#allocation5 + $0xa8] sm:$0xff] %vm438_vm1, %v1547_v10  ;;  %v1428_v20 = vld [vmem:[#allocation4 + $0xf0] sm:$0xff] }
 0x120   : > { %v1329_v37 = vmul.f32 %v1168_v31, %v1168_v31  ;;  %v1232_v41 = vadd.f32 %v1200_v34, %v1168_v31  ;;  %v1457_v48 = vmax.f32 %v1425_v39, %v1168_v31  ;;  %v1553_v57 = vmin.f32 %v1521_v55, %v1168_v31  ;;  %1660 = vadd.xlane.f32.xlu0 %v1659_v44  ;;  %v1296_v31 = vld [vmem:[#allocation3 + $0xd0] sm:$0xff]  ;;  %v1609_v39 = vld [vmem:[#allocation2 + $0x78] sm:$0xff] }
 0x121   : > { %v1612_v55 = vld [vmem:[#allocation2 + $0x90] sm:$0xff] }
 0x122   : > { %v1361_v43 = vadd.f32 %v1329_v37, %v1297_v24  ;;  %1265 = vst.msk [vmem:[#allocation2 + $0xd8] sm:$0xff] %vm438_vm1, %v1232_v41  ;;  %v1804_v37 = vsel %vm438_vm1, %v1760_v32, 0.0  ;;  %v3600_v41 = vld [vmem:[%s6349_s1 + $0x8] sm:$0xff] }
 0x123   : > { %1489 = vst.msk [vmem:[#allocation4 + $0xd8] sm:$0xff] %vm438_vm1, %v1457_v48  ;;  %v1680_v48 = vsel %vm438_vm1, %v1612_v55, 0.0  ;;  %v1622_v55 = vld [vmem:[#allocation2 + $0xe0] sm:$0xff] }
 0x124   : > { %1648 = vadd.xlane.f32.xlu2 %v1647_v42  ;;  %1393 = vst.msk [vmem:[#allocation3 + $0xd8] sm:$0xff] %vm438_vm1, %v1361_v43 }
 0x125   : > { %1585 = vst.msk [vmem:[#allocation5 + $0xd8] sm:$0xff] %vm438_vm1, %v1553_v57 }
 0x127   : > { %1645 = vadd.xlane.f32.xlu1 %v1644_v38  ;;  %v1097_v46 = vpop.permute.xlu1 %1096  ;;  %v1792_v38 = vsel %vm438_vm1, %v1756_v33, 0.0 }
 0x128   : > { %v1165_v54 = vadd.f32 %v1097_v46, %v888_v8  ;;  %1678 = vadd.xlane.f32.xlu0 %v1677_v26  ;;  %v1762_v8 = vld [vmem:[#allocation3 + $0x40] sm:$0xff]  ;;  %v1813_v46 = vsel %vm438_vm1, %v1763_v40, 0.0  ;;  %v1617_v40 = vld [vmem:[#allocation2 + $0xb8] sm:$0xff] }
 0x129   : > { %v1810_v10 = vsel %vm438_vm1, %v1762_v8, 0.0  ;;  %v1770_v8 = vld [vmem:[#allocation3 + $0x80] sm:$0xff] }
 0x12a   : > { %v1229_v53 = vadd.f32 %v1197_v47, %v1165_v54  ;;  %v1326_v16 = vmul.f32 %v1165_v54, %v1165_v54  ;;  %v1454_v61 = vmax.f32 %v1422_v7, %v1165_v54  ;;  %v1550_v63 = vmin.f32 %v1518_v59, %v1165_v54  ;;  %v1202_v54 = vld [vmem:[#allocation2 + $0xe8] sm:$0xff] }
 0x12b   : > { %v1671_v47 = vsel %vm438_vm1, %v1609_v39, 0.0  ;;  %v1615_v59 = vld [vmem:[#allocation2 + $0xa8] sm:$0xff] }
 0x12c   : > { %v1358_v51 = vadd.f32 %v1326_v16, %v1294_v58  ;;  %1799 = vadd.xlane.f32.xlu2 %v1798_v50  ;;  %1262 = vst.msk [vmem:[#allocation2 + $0xc0] sm:$0xff] %vm438_vm1, %v1229_v53  ;;  %v1523_v58 = vld [vmem:[#allocation5 + $0xe8] sm:$0xff]  ;;  %v1614_v53 = vld [vmem:[#allocation2 + $0xa0] sm:$0xff] }
 0x12d   : > { %v1134_v6 = vpop.permute.xlu2 %1133  ;;  %1486 = vst.msk [vmem:[#allocation4 + $0xc0] sm:$0xff] %vm438_vm1, %v1454_v61 }
 0x12e   : > { %1390 = vst.msk [vmem:[#allocation3 + $0xc0] sm:$0xff] %vm438_vm1, %v1358_v51  ;;  %v1757_v51 = vld [vmem:[#allocation3 + $0x18] sm:$0xff] }
 0x12f   : > { %1790 = vadd.xlane.f32.xlu1 %v1789_v62  ;;  %1582 = vst.msk [vmem:[#allocation5 + $0xc0] sm:$0xff] %vm438_vm1, %v1550_v63  ;;  %v1689_v62 = vsel %vm438_vm1, %v1615_v59, 0.0  ;;  %v1686_v63 = vsel %vm438_vm1, %v1614_v53, 0.0  ;;  %v1795_v44 = vsel %vm438_vm1, %v1757_v51, 0.0  ;;  %v1774_v51 = vld [vmem:[#allocation3 + $0xa0] sm:$0xff] }
 0x130   : > { %1811 = vadd.xlane.f32.xlu0 %v1810_v10 }
 0x131   : > { %v4579_v45 = vpop.f32.mrf.mxu3 }
 0x132   : > { %v932_v43 = vadd.f32 %v3600_v41, %v4579_v45 }
 0x134   : > { %1675 = vadd.xlane.f32.xlu2 %v1674_v22  ;;  %v1429_v22 = vld [vmem:[#allocation4 + $0xf8] sm:$0xff] }
 0x137   : > { %1669 = vadd.xlane.f32.xlu1 %v1668_v18  ;;  %v1109_v36 = vpop.permute.xlu1 %1108 }
 0x138   : > { %v1167_v30 = vadd.f32 %v1109_v36, %v894_v14  ;;  %1681 = vadd.xlane.f32.xlu0 %v1680_v48  ;;  %v1769_v48 = vld [vmem:[#allocation3 + $0x78] sm:$0xff] }
 0x139   : > { %v934_v4 = vpop.f32.mrf.mxu3 }
 0x13a   : > { %v935_v17 = vadd.f32 %v3599_v1, %v934_v4  ;;  %v1231_v34 = vadd.f32 %v1199_v52, %v1167_v30  ;;  %v1328_v42 = vmul.f32 %v1167_v30, %v1167_v30  ;;  %v1456_v25 = vmax.f32 %v1424_v28, %v1167_v30  ;;  %v1764_v4 = vld [vmem:[#allocation3 + $0x50] sm:$0xff]  ;;  %v1766_v1 = vld [vmem:[#allocation3 + $0x60] sm:$0xff]  ;;  %v1619_v52 = vld [vmem:[#allocation2 + $0xc8] sm:$0xff] }
 0x13b   : > { %v1552_v35 = vmin.f32 %v1520_v29, %v1167_v30  ;;  %v1618_v28 = vld [vmem:[#allocation2 + $0xc0] sm:$0xff] }
 0x13c   : > { %v1171_v12 = vadd.f32 %v1134_v6, %v935_v17  ;;  %1264 = vst.msk [vmem:[#allocation2 + $0xd0] sm:$0xff] %vm438_vm1, %v1231_v34  ;;  %v1360_v24 = vadd.f32 %v1328_v42, %v1296_v31  ;;  %1805 = vadd.xlane.f32.xlu2 %v1804_v37  ;;  %v1761_v6 = vld [vmem:[#allocation3 + $0x38] sm:$0xff]  ;;  %v1816_v17 = vsel %vm438_vm1, %v1764_v4, 0.0  ;;  %v1701_v34 = vsel %vm438_vm1, %v1619_v52, 0.0 }
 0x13d   : > { %1488 = vst.msk [vmem:[#allocation4 + $0xd0] sm:$0xff] %vm438_vm1, %v1456_v25  ;;  %v1807_v49 = vsel %vm438_vm1, %v1761_v6, 0.0  ;;  %v1765_v31 = vld [vmem:[#allocation3 + $0x58] sm:$0xff]  ;;  %v1698_v42 = vsel %vm438_vm1, %v1618_v28, 0.0  ;;  %v1834_v37 = vsel %vm438_vm1, %v1770_v8, 0.0 }
 0x13e   : > { %v1235_v21 = vadd.f32 %v1203_v9, %v1171_v12  ;;  %v1332_v15 = vmul.f32 %v1171_v12, %v1171_v12  ;;  %v1460_v19 = vmax.f32 %v1428_v20, %v1171_v12  ;;  %v1556_v23 = vmin.f32 %v1524_v11, %v1171_v12  ;;  %1392 = vst.msk [vmem:[#allocation3 + $0xd0] sm:$0xff] %vm438_vm1, %v1360_v24  ;;  %v1613_v20 = vld [vmem:[#allocation2 + $0x98] sm:$0xff]  ;;  %v1616_v11 = vld [vmem:[#allocation2 + $0xb0] sm:$0xff]  ;;  %v1771_v24 = vld [vmem:[#allocation3 + $0x88] sm:$0xff] }
 0x13f   : > { %1793 = vadd.xlane.f32.xlu1 %v1792_v38  ;;  %1584 = vst.msk [vmem:[#allocation5 + $0xd0] sm:$0xff] %vm438_vm1, %v1552_v35  ;;  %v1822_v9 = vsel %vm438_vm1, %v1766_v1, 0.0  ;;  %v1683_v12 = vsel %vm438_vm1, %v1613_v20, 0.0  ;;  %v1692_v18 = vsel %vm438_vm1, %v1616_v11, 0.0  ;;  %v1819_v25 = vsel %vm438_vm1, %v1765_v31, 0.0  ;;  %v1768_v35 = vld [vmem:[#allocation3 + $0x70] sm:$0xff] }
 0x140   : > { %1268 = vst.msk [vmem:[#allocation2 + $0xf0] sm:$0xff] %vm438_vm1, %v1235_v21  ;;  %v1364_v27 = vadd.f32 %v1332_v15, %v1300_v2  ;;  %1796 = vadd.xlane.f32.xlu0 %v1795_v44  ;;  %v3601_v21 = vld [vmem:[%s6349_s1 + $0x18] sm:$0xff]  ;;  %v1828_v38 = vsel %vm438_vm1, %v1768_v35, 0.0  ;;  %v1837_v10 = vsel %vm438_vm1, %v1771_v24, 0.0  ;;  %v1846_v44 = vsel %vm438_vm1, %v1774_v51, 0.0 }
 0x141   : > { %1492 = vst.msk [vmem:[#allocation4 + $0xf0] sm:$0xff] %vm438_vm1, %v1460_v19  ;;  %v937_v14 = vpop.f32.mrf.mxu3  ;;  %v1204_v19 = vld [vmem:[#allocation2 + $0xf8] sm:$0xff] }
 0x142   : > { %1396 = vst.msk [vmem:[#allocation3 + $0xf0] sm:$0xff] %vm438_vm1, %v1364_v27  ;;  %v938_v15 = vadd.f32 %v3601_v21, %v937_v14  ;;  %v1301_v27 = vld [vmem:[#allocation3 + $0xf8] sm:$0xff] }
 0x143   : > { %1588 = vst.msk [vmem:[#allocation5 + $0xf0] sm:$0xff] %vm438_vm1, %v1556_v23  ;;  %v1525_v23 = vld [vmem:[#allocation5 + $0xf8] sm:$0xff]  ;;  %v1620_v39 = vld [vmem:[#allocation2 + $0xd0] sm:$0xff] }
 0x144   : > { %1672 = vadd.xlane.f32.xlu2 %v1671_v47  ;;  %v1695_v47 = vsel %vm438_vm1, %v1617_v40, 0.0  ;;  %v1773_v11 = vld [vmem:[#allocation3 + $0x98] sm:$0xff] }
 0x147   : > { %1814 = vadd.xlane.f32.xlu1 %v1813_v46  ;;  %v1128_v57 = vpop.permute.xlu1 %1127  ;;  %v1710_v46 = vsel %vm438_vm1, %v1622_v55, 0.0 }
 0x148   : > { %v1170_v7 = vadd.f32 %v1128_v57, %v932_v43  ;;  %1823 = vadd.xlane.f32.xlu0 %v1822_v9  ;;  %v1704_v43 = vsel %vm438_vm1, %v1620_v39, 0.0  ;;  %v1772_v57 = vld [vmem:[#allocation3 + $0x90] sm:$0xff] }
 0x149   : > { %v1840_v53 = vsel %vm438_vm1, %v1772_v57, 0.0  ;;  %v1780_v57 = vld [vmem:[#allocation3 + $0xd0] sm:$0xff] }
 0x14a   : > { %v1234_v16 = vadd.f32 %v1202_v54, %v1170_v7  ;;  %v1331_v60 = vmul.f32 %v1170_v7, %v1170_v7  ;;  %v1459_v45 = vmax.f32 %v1427_v56, %v1170_v7  ;;  %v1555_v61 = vmin.f32 %v1523_v58, %v1170_v7 }
 0x14b   : > { %v1831_v58 = vsel %vm438_vm1, %v1769_v48, 0.0  ;;  %v1777_v48 = vld [vmem:[#allocation3 + $0xb8] sm:$0xff] }
 0x14c   : > { %1267 = vst.msk [vmem:[#allocation2 + $0xe8] sm:$0xff] %vm438_vm1, %v1234_v16  ;;  %v1363_v50 = vadd.f32 %v1331_v60, %v1299_v3  ;;  %1690 = vadd.xlane.f32.xlu2 %v1689_v62  ;;  %v4651_v3 = vand.u32 127, %v942_v0  ;;  %v1621_v62 = vld [vmem:[#allocation2 + $0xd8] sm:$0xff] }
 0x14d   : > { %1491 = vst.msk [vmem:[#allocation4 + $0xe8] sm:$0xff] %vm438_vm1, %v1459_v45  ;;  %v1775_v45 = vld [vmem:[#allocation3 + $0xa8] sm:$0xff]  ;;  %v1707_v1 = vsel %vm438_vm1, %v1621_v62, 0.0 }
 0x14e   : > { %1395 = vst.msk [vmem:[#allocation3 + $0xe8] sm:$0xff] %vm438_vm1, %v1363_v50  ;;  %v4655_v60 = vadd.s32 4294967288, %v4651_v3  ;;  %v1849_v0 = vsel %vm438_vm1, %v1775_v45, 0.0 }
 0x14f   : > { %1687 = vadd.xlane.f32.xlu1 %v1686_v63  ;;  %1587 = vst.msk [vmem:[#allocation5 + $0xe8] sm:$0xff] %vm438_vm1, %v1555_v61 }
 0x150   : > { %1693 = vadd.xlane.f32.xlu0 %v1692_v18 }
 0x153   : > { %v1623_v54 = vld [vmem:[#allocation2 + $0xe8] sm:$0xff] }
 0x154   : > { %1817 = vadd.xlane.f32.xlu2 %v1816_v17  ;;  %v1713_v7 = vsel %vm438_vm1, %v1623_v54, 0.0 }
 0x157   : > { %1808 = vadd.xlane.f32.xlu1 %v1807_v49  ;;  %v1140_v2 = vpop.permute.xlu1 %1139 }
 0x158   : > { %v1172_v26 = vadd.f32 %v1140_v2, %v938_v15  ;;  %1820 = vadd.xlane.f32.xlu0 %v1819_v25  ;;  %v1776_v2 = vld [vmem:[#allocation3 + $0xb0] sm:$0xff] }
 0x159   : > { %v1852_v52 = vsel %vm438_vm1, %v1776_v2, 0.0 }
 0x15a   : > { %v1236_v36 = vadd.f32 %v1204_v19, %v1172_v26  ;;  %v1333_v29 = vmul.f32 %v1172_v26, %v1172_v26  ;;  %v1461_v30 = vmax.f32 %v1429_v22, %v1172_v26  ;;  %v1557_v32 = vmin.f32 %v1525_v23, %v1172_v26 }
 0x15b   : > { %v1843_v19 = vsel %vm438_vm1, %v1773_v11, 0.0 }
 0x15c   : > { %1684 = vadd.xlane.f32.xlu2 %v1683_v12  ;;  %1269 = vst.msk [vmem:[#allocation2 + $0xf8] sm:$0xff] %vm438_vm1, %v1236_v36  ;;  %v1365_v33 = vadd.f32 %v1333_v29, %v1301_v27  ;;  %v1624_v12 = vld [vmem:[#allocation2 + $0xf0] sm:$0xff]  ;;  %v4693_v29 = vadd.s32 4294967280, %v4651_v3 }
 0x15d   : > { %1493 = vst.msk [vmem:[#allocation4 + $0xf8] sm:$0xff] %vm438_vm1, %v1461_v30  ;;  %v1716_v22 = vsel %vm438_vm1, %v1624_v12, 0.0 }
 0x15e   : > { %1397 = vst.msk [vmem:[#allocation3 + $0xf8] sm:$0xff] %vm438_vm1, %v1365_v33 }
 0x15f   : > { %1826 = vadd.xlane.f32.xlu1 %v1825_v13  ;;  %1589 = vst.msk [vmem:[#allocation5 + $0xf8] sm:$0xff] %vm438_vm1, %v1557_v32 }
 0x160   : > { %1838 = vadd.xlane.f32.xlu0 %v1837_v10 }
 0x163   : > { %v1625_v24 = vld [vmem:[#allocation2 + $0xf8] sm:$0xff] }
 0x164   : > { %1702 = vadd.xlane.f32.xlu2 %v1701_v34  ;;  %v1779_v34 = vld [vmem:[#allocation3 + $0xc8] sm:$0xff] }
 0x165   : > { %v1861_v10 = vsel %vm438_vm1, %v1779_v34, 0.0  ;;  %v2430_v34 = vld [vmem:[#allocation4 + $0x20] sm:$0xff] }
 0x167   : > { %1699 = vadd.xlane.f32.xlu1 %v1698_v42  ;;  %v1778_v42 = vld [vmem:[#allocation3 + $0xc0] sm:$0xff] }
 0x168   : > { %1711 = vadd.xlane.f32.xlu0 %v1710_v46  ;;  %v1652_v56 = vpop.xlane.xlu0 %1651  ;;  %v1858_v39 = vsel %vm438_vm1, %v1778_v42, 0.0 }
 0x169   : > { %v4687_v28 = vmul.f32 0.0625, %v1652_v56 }
 0x16b   : > { %v2772_v8 = vperm.slane %v4687_v28, %v4651_v3 }
 0x16c   : > { %1835 = vadd.xlane.f32.xlu2 %v1834_v37 }
 0x16f   : > { %1829 = vadd.xlane.f32.xlu1 %v1828_v38  ;;  %v1628_v41 = vpop.xlane.xlu2 %1627 }
 0x170   : > { %1841 = vadd.xlane.f32.xlu0 %v1840_v53  ;;  %v1722_v16 = vmul.f32 0.0625, %v1628_v41  ;;  %v1631_v61 = vpop.xlane.xlu0 %1630  ;;  %v1855_v53 = vsel %vm438_vm1, %v1777_v48, 0.0 }
 0x171   : > { %v4657_v50 = vmul.f32 0.0625, %v1631_v61  ;;  %v1864_v61 = vsel %vm438_vm1, %v1780_v57, 0.0  ;;  %v2436_v57 = vld [vmem:[#allocation4 + $0x50] sm:$0xff] }
 0x172   : > { %v2752_v63 = vperm.slane %v1722_v16, %v4651_v3  ;;  %v1914_v32 = vmul.f32 %v1722_v16, %v1722_v16 }
 0x173   : > { %v2754_v4 = vperm.slane %v4657_v50, %v4655_v60 }
 0x174   : > { %1705 = vadd.xlane.f32.xlu2 %v1704_v43  ;;  %v1719_v43 = vsel %vm438_vm1, %v1625_v24, 0.0 }
 0x175   : > { %v4666_v17 = vsel %vm2755_vm2, %v2754_v4, %v2752_v63 }
 0x177   : > { %1696 = vadd.xlane.f32.xlu1 %v1695_v47  ;;  %v1640_v59 = vpop.xlane.xlu2 %1639 }
 0x178   : > { %1708 = vadd.xlane.f32.xlu0 %v1707_v1  ;;  %v4668_v49 = vmul.f32 0.0625, %v1640_v59  ;;  %v1643_v13 = vpop.xlane.xlu0 %1642  ;;  %v4715_v59 = vadd.s32 4294967272, %v4651_v3 }
 0x179   : > { %v1727_v14 = vmul.f32 0.0625, %v1643_v13  ;;  %v1781_v13 = vld [vmem:[#allocation3 + $0xd8] sm:$0xff] }
 0x17a   : > { %v2765_v18 = vperm.slane %v4668_v49, %v4651_v3  ;;  %v4754_v42 = vmul.f32 %v4668_v49, %v4668_v49  ;;  %v4761_v49 = vsel %vm438_vm1, %v2430_v34, -inf  ;;  %v2567_v34 = vld [vmem:[#allocation5 + $0x68] sm:$0xff] }
 0x17b   : > { %v2766_v23 = vperm.slane %v1727_v14, %v4655_v60  ;;  %v4718_v16 = vmul.f32 %v1727_v14, %v1727_v14  ;;  %v1783_v14 = vld [vmem:[#allocation3 + $0xe8] sm:$0xff] }
 0x17c   : > { %1832 = vadd.xlane.f32.xlu2 %v1831_v58 }
 0x17d   : > { %v4690_v36 = vsel %vm2755_vm2, %v2766_v23, %v2765_v18  ;;  %v1784_v18 = vld [vmem:[#allocation3 + $0xf0] sm:$0xff] }
 0x17f   : > { %1714 = vadd.xlane.f32.xlu1 %v1713_v7  ;;  %v1667_v6 = vpop.xlane.xlu2 %1666  ;;  %v1782_v7 = vld [vmem:[#allocation3 + $0xe0] sm:$0xff] }
 0x180   : > { %v4670_v9 = vmul.f32 0.0625, %v1667_v6  ;;  %1853 = vadd.xlane.f32.xlu0 %v1852_v52  ;;  %v1788_v25 = vpop.xlane.xlu0 %1787  ;;  %v1876_v52 = vsel %vm438_vm1, %v1784_v18, 0.0 }
 0x181   : > { %v1882_v35 = vmul.f32 0.0625, %v1788_v25 }
 0x182   : > { %v1664_v20 = vpop.xlane.xlu1 %1663  ;;  %v2780_v21 = vperm.slane %v4670_v9, %v4655_v60 }
 0x183   : > { %v4672_v5 = vmul.f32 0.0625, %v1664_v20  ;;  %v1946_v40 = vsub.f32 %v1882_v35, %v1914_v32  ;;  %v2558_v35 = vld [vmem:[#allocation5 + $0x20] sm:$0xff] }
 0x184   : > { %1850 = vadd.xlane.f32.xlu2 %v1849_v0 }
 0x185   : > { %v2779_v15 = vperm.slane %v4672_v5, %v4651_v3  ;;  %v1978_v11 = vmax.f32 %v1946_v40, 0.0 }
 0x187   : > { %1847 = vadd.xlane.f32.xlu1 %v1846_v44  ;;  %v4684_v26 = vsel %vm2755_vm2, %v2780_v21, %v2779_v15  ;;  %v1658_v27 = vpop.xlane.xlu2 %1657  ;;  %v1870_v44 = vsel %vm438_vm1, %v1782_v7, 0.0  ;;  %v4745_v23 = vadd.f32 1e-05, %v1978_v11  ;;  %v1785_v7 = vld [vmem:[#allocation3 + $0xf8] sm:$0xff] }
 0x188   : > { %v4695_v30 = vmul.f32 0.0625, %v1658_v27  ;;  %1720 = vadd.xlane.f32.xlu0 %v1719_v43  ;;  %v2555_v43 = vld [vmem:[#allocation5 + $0x8] sm:$0xff]  ;;  %v1879_v18 = vsel %vm438_vm1, %v1785_v7, 0.0 }
 0x189   : > { %3534 = vrsqrt.f32 %v4745_v23  ;;  %vm2049_vm8 = vcmp.eq.f32.partialorder %v4745_v23, inf  ;;  %vm2051_vm9 = vcmp.eq.f32.partialorder %v4745_v23, 0.0 }
 0x18a   : > { %v1655_v31 = vpop.xlane.xlu1 %1654  ;;  %v2775_v38 = vperm.slane %v4695_v30, %v4693_v29 }
 0x18b   : > { %v4697_v33 = vmul.f32 0.0625, %v1655_v31  ;;  %v1803_v58 = vpop.xlane.xlu0 %1802 }
 0x18c   : > { %1844 = vadd.xlane.f32.xlu2 %v1843_v19  ;;  %v4720_v45 = vmul.f32 0.0625, %v1803_v58  ;;  %v1867_v19 = vsel %vm438_vm1, %v1781_v13, 0.0  ;;  %v2426_v58 = vld [vmem:[#allocation4] sm:$0xff]  ;;  %v2561_v13 = vld [vmem:[#allocation5 + $0x38] sm:$0xff] }
 0x18d   : > { %v2773_v37 = vperm.slane %v4697_v33, %v4655_v60 }
 0x18e   : > { %v1951_v0 = vsub.f32 %v4720_v45, %v4718_v16 }
 0x18f   : > { %1717 = vadd.xlane.f32.xlu1 %v1716_v22  ;;  %v2774_v55 = vsel %vm2755_vm2, %v2773_v37, %v2772_v8  ;;  %v1637_v41 = vpop.xlane.xlu2 %1636  ;;  %v1873_v22 = vsel %vm438_vm1, %v1783_v14, 0.0  ;;  %v2428_v37 = vld [vmem:[#allocation4 + $0x10] sm:$0xff]  ;;  %v4792_v14 = vsel %vm438_vm1, %v2436_v57, -inf  ;;  %v4835_v57 = vsel %vm438_vm1, %v2567_v34, inf }
 0x190   : > { %v2776_v47 = vsel %vm2759_vm3, %v2775_v38, %v2774_v55  ;;  %v4710_v54 = vmul.f32 0.0625, %v1637_v41  ;;  %1871 = vadd.xlane.f32.xlu0 %v1870_v44  ;;  %v4777_v45 = vsel %vm438_vm1, %v2428_v37, -inf  ;;  %v1983_v44 = vmax.f32 %v1951_v0, 0.0  ;;  %v2566_v37 = vld [vmem:[#allocation5 + $0x60] sm:$0xff]  ;;  %6377 = vst [vmem:[#allocation15_spill] sm:$0xff] %v4835_v57 }
 0x191   : > { %v4797_v0 = vsel %vm438_vm1, %v2555_v43, inf }
 0x192   : > { %v1634_v46 = vpop.xlane.xlu1 %1633  ;;  %v2762_v62 = vperm.slane %v4710_v54, %v4715_v59 }
 0x193   : > { %v4712_v56 = vmul.f32 0.0625, %v1634_v46  ;;  %v1661_v2 = vpop.xlane.xlu0 %1660  ;;  %v2556_v46 = vld [vmem:[#allocation5 + $0x10] sm:$0xff] }
 0x194   : > { %1862 = vadd.xlane.f32.xlu2 %v1861_v10  ;;  %v4737_v21 = vmul.f32 0.0625, %v1661_v2  ;;  %v2559_v10 = vld [vmem:[#allocation5 + $0x28] sm:$0xff]  ;;  %v4789_v11 = vsel %vm438_vm1, %v2556_v46, inf  ;;  %v2458_v2 = vsel %vm438_vm1, %v2426_v58, -inf }
 0x195   : > { %v2758_v51 = vperm.slane %v4712_v56, %v4693_v29 }
 0x196   : > { %v2777_v27 = vperm.slane %v4737_v21, %v4715_v59 }
 0x197   : > { %1859 = vadd.xlane.f32.xlu1 %v1858_v39  ;;  %v1649_v63 = vpop.xlane.xlu2 %1648  ;;  %v2760_v4 = vsel %vm2759_vm3, %v2758_v51, %v4666_v17  ;;  %v2427_v39 = vld [vmem:[#allocation4 + $0x8] sm:$0xff] }
 0x198   : > { %v2764_v6 = vsel %vm2763_vm4, %v2762_v62, %v2760_v4  ;;  %v4733_v1 = vmul.f32 0.0625, %v1649_v63  ;;  %1877 = vadd.xlane.f32.xlu0 %v1876_v52  ;;  %v2778_v24 = vsel %vm2763_vm4, %v2777_v27, %v2776_v47  ;;  %v4768_v47 = vmul.f32 %v4657_v50, %v4657_v50  ;;  %v2564_v62 = vld [vmem:[#allocation5 + $0x50] sm:$0xff]  ;;  %v2557_v63 = vld [vmem:[#allocation5 + $0x18] sm:$0xff]  ;;  %v2439_v27 = vld [vmem:[#allocation4 + $0x68] sm:$0xff] }
 0x199   : > { %v4783_v50 = vsel %vm438_vm1, %v2559_v10, inf  ;;  %v2461_v4 = vsel %vm438_vm1, %v2427_v39, -inf  ;;  %v2438_v52 = vld [vmem:[#allocation4 + $0x60] sm:$0xff] }
 0x19a   : > { %v1646_v20 = vpop.xlane.xlu1 %1645  ;;  %v2770_v17 = vperm.slane %v4733_v1, %v4715_v59 }
 0x19b   : > { %v4735_v12 = vmul.f32 0.0625, %v1646_v20  ;;  %v1679_v16 = vpop.xlane.xlu0 %1678  ;;  %v2433_v20 = vld [vmem:[#allocation4 + $0x38] sm:$0xff] }
 0x19c   : > { %1865 = vadd.xlane.f32.xlu2 %v1864_v61  ;;  %v2429_v61 = vld [vmem:[#allocation4 + $0x18] sm:$0xff] }
 0x19d   : > { %v2768_v15 = vperm.slane %v4735_v12, %v4693_v29 }
 0x19f   : > { %1856 = vadd.xlane.f32.xlu1 %v1855_v53  ;;  %v2769_v31 = vsel %vm2759_vm3, %v2768_v15, %v4690_v36  ;;  %v1800_v32 = vpop.xlane.xlu2 %1799  ;;  %v2431_v36 = vld [vmem:[#allocation4 + $0x28] sm:$0xff]  ;;  %v4774_v53 = vsel %vm438_vm1, %v2558_v35, inf  ;;  %v2432_v15 = vld [vmem:[#allocation4 + $0x30] sm:$0xff] }
 0x1a0   : > { %v2771_v25 = vsel %vm2763_vm4, %v2770_v17, %v2769_v31  ;;  %v1886_v8 = vmul.f32 0.0625, %v1800_v32  ;;  %v4780_v51 = vsel %vm438_vm1, %v2431_v36, -inf  ;;  %v2560_v17 = vld [vmem:[#allocation5 + $0x30] sm:$0xff]  ;;  %v4803_v31 = vsel %vm438_vm1, %v2564_v62, inf  ;;  %v2563_v35 = vld [vmem:[#allocation5 + $0x48] sm:$0xff]  ;;  %2462 = vmax.xlane.f32.xlu0 %v2461_v4 }
 0x1a1   : > { %v2815_v38 = vsel %vm2814_vm5, %v2771_v25, %v2764_v6  ;;  %6373 = vst [vmem:[#allocation11_spill] sm:$0xff] %v4803_v31  ;;  %v4806_v32 = vsel %vm438_vm1, %v2557_v63, inf  ;;  %v2435_v25 = vld [vmem:[#allocation4 + $0x48] sm:$0xff]  ;;  %v4818_v36 = vadd.f32 1e-05, %v1983_v44  ;;  %v4821_v39 = vsel %vm438_vm1, %v2432_v15, -inf }
 0x1a2   : > { %v1950_v40 = vsub.f32 %v1886_v8, %v4754_v42  ;;  %v1791_v55 = vpop.xlane.xlu1 %1790  ;;  %v4764_v41 = vsel %vm6367_vm6, %v2778_v24, %v2815_v38  ;;  %6374 = vst [vmem:[#allocation12_spill] sm:$0xff] %v4806_v32  ;;  %v4808_v42 = vmul.f32 0.0625, %v1679_v16  ;;  %v4811_v8 = vsel %vm438_vm1, %v2433_v20, -inf  ;;  %v4816_v38 = vpop.eup %3534  ;;  %v2444_v16 = vld [vmem:[#allocation4 + $0x90] sm:$0xff] }
 0x1a3   : > { %v4771_v48 = vmul.f32 0.0625, %v1791_v55  ;;  %v4814_v24 = vsel %vm438_vm1, %v2561_v13, inf  ;;  %v4824_v55 = vsel %vm438_vm1, %v2560_v17, inf  ;;  %v4840_v58 = vsel %vm438_vm1, %v2435_v25, -inf  ;;  %v2572_v62 = vld [vmem:[#allocation5 + $0x90] sm:$0xff]  ;;  %v1812_v4 = vpop.xlane.xlu0 %1811  ;;  %v2441_v13 = vld [vmem:[#allocation4 + $0x78] sm:$0xff] }
 0x1a4   : > { %1868 = vadd.xlane.f32.xlu2 %v1867_v19  ;;  %6375 = vst [vmem:[#allocation13_spill] sm:$0xff] %v4814_v24  ;;  %v1982_v10 = vmax.f32 %v1950_v40, 0.0  ;;  %v1922_v40 = vmul.f32 %v4687_v28, %v4687_v28  ;;  %v4843_v7 = vsel %vm438_vm1, %v2563_v35, inf  ;;  %v2043_v63 = vmul.f32 %v4816_v38, %v4745_v23  ;;  %v2565_v35 = vld [vmem:[#allocation5 + $0x58] sm:$0xff]  ;;  %v2570_v24 = vld [vmem:[#allocation5 + $0x80] sm:$0xff] }
 0x1a5   : > { %v1947_v6 = vsub.f32 %v4771_v48, %v4768_v47  ;;  %6376 = vst [vmem:[#allocation14_spill] sm:$0xff] %v4824_v55  ;;  %v4829_v47 = vsel %vm438_vm1, %v2439_v27, -inf  ;;  %v4832_v48 = vsel %vm438_vm1, %v2438_v52, -inf  ;;  %v2787_v44 = vperm.slane %v4808_v42, %v4655_v60  ;;  %v2554_v27 = vld [vmem:[#allocation5] sm:$0xff] }
 0x1a6   : > { %6378 = vst [vmem:[#allocation16_spill] sm:$0xff] %v4843_v7  ;;  %3536 = vrsqrt.f32 %v4818_v36  ;;  %v1890_v15 = vmul.f32 0.0625, %v1812_v4  ;;  %v4857_v17 = vadd.f32 1e-05, %v1982_v10  ;;  %v4865_v25 = vsel %vm438_vm1, %v2444_v16, -inf  ;;  %v2562_v4 = vld [vmem:[#allocation5 + $0x40] sm:$0xff] }
 0x1a7   : > { %1874 = vadd.xlane.f32.xlu1 %v1873_v22  ;;  %v1676_v19 = vpop.xlane.xlu2 %1675  ;;  %v4800_v22 = vsel %vm438_vm1, %v2429_v61, -inf  ;;  %v4846_v61 = vsel %vm438_vm1, %v2566_v37, inf  ;;  %6380 = vst [vmem:[#allocation18_spill] sm:$0xff] %v4865_v25  ;;  %v4868_v37 = vsel %vm438_vm1, %v2572_v62, inf  ;;  %v4873_v10 = vsel %vm438_vm1, %v2441_v13, -inf  ;;  %v2449_v13 = vld [vmem:[#allocation4 + $0xb8] sm:$0xff] }
 0x1a8   : > { %v4826_v43 = vmul.f32 0.0625, %v1676_v19  ;;  %6379 = vst [vmem:[#allocation17_spill] sm:$0xff] %v4846_v61  ;;  %v1979_v19 = vmax.f32 %v1947_v6, 0.0  ;;  %v2434_v6 = vld [vmem:[#allocation4 + $0x40] sm:$0xff]  ;;  %v4883_v62 = vmul.f32 %v4735_v12, %v4735_v12  ;;  %2465 = vmax.xlane.f32.xlu0 %v4777_v45  ;;  %3538 = vrsqrt.f32 %v4857_v17 }
 0x1a9   : > { %6381 = vst [vmem:[#allocation19_spill] sm:$0xff] %v4868_v37  ;;  %v2568_v37 = vld [vmem:[#allocation5 + $0x70] sm:$0xff]  ;;  %v2482_v57 = vsel %vm438_vm1, %v2434_v6, -inf  ;;  %v2446_v45 = vld [vmem:[#allocation4 + $0xa0] sm:$0xff]  ;;  %vm2109_vm10 = vcmp.eq.f32.partialorder %v4818_v36, inf  ;;  %vm2111_vm11 = vcmp.eq.f32.partialorder %v4818_v36, 0.0 }
 0x1aa   : > { %v1670_v46 = vpop.xlane.xlu1 %1669  ;;  %v2786_v28 = vperm.slane %v4826_v43, %v4651_v3  ;;  %6382 = vst [vmem:[#allocation20_spill] sm:$0xff] %v4873_v10  ;;  %v4897_v12 = vadd.f32 1e-05, %v1979_v19  ;;  %v2442_v6 = vld [vmem:[#allocation4 + $0x80] sm:$0xff]  ;;  %v4925_v25 = vsel %vm438_vm1, %v2568_v37, inf  ;;  %vm2097_vm12 = vcmp.eq.f32.partialorder %v4857_v17, inf }
 0x1ab   : > { %v4854_v20 = vmul.f32 0.0625, %v1670_v46  ;;  %v1954_v46 = vsub.f32 %v1890_v15, %v1922_v40  ;;  %v2044_v15 = vmul.f32 %v4816_v38, %v2043_v63  ;;  %v4906_v63 = vsel %vm438_vm1, %v2562_v4, inf  ;;  %6389 = vst [vmem:[#allocation27_spill] sm:$0xff] %v4925_v25 }
 0x1ac   : > { %2459 = vmax.xlane.f32.xlu2 %v2458_v2  ;;  %v2437_v2 = vld [vmem:[#allocation4 + $0x58] sm:$0xff]  ;;  %v4860_v52 = vsel %vm2755_vm2, %v2787_v44, %v2786_v28  ;;  %v2443_v28 = vld [vmem:[#allocation4 + $0x88] sm:$0xff]  ;;  %6385 = vst [vmem:[#allocation23_spill] sm:$0xff] %v4906_v63  ;;  %v4908_v31 = vpop.eup %3536  ;;  %3540 = vrsqrt.f32 %v4897_v12  ;;  %v4952_v7 = vsel %vm438_vm1, %v2442_v6, -inf  ;;  %vm2099_vm13 = vcmp.eq.f32.partialorder %v4857_v17, 0.0 }
 0x1ad   : > { %v2782_v34 = vperm.slane %v4854_v20, %v4693_v29  ;;  %v4876_v44 = vsel %vm438_vm1, %v2437_v2, -inf  ;;  %v2577_v2 = vld [vmem:[#allocation5 + $0xb8] sm:$0xff]  ;;  %v4913_v32 = vsel %vm438_vm1, %v2443_v28, -inf  ;;  %v2454_v28 = vld [vmem:[#allocation4 + $0xe0] sm:$0xff]  ;;  %v2045_v10 = vmul.f32 0.5, %v2044_v15  ;;  %v2451_v15 = vld [vmem:[#allocation4 + $0xc8] sm:$0xff] }
 0x1ae   : > { %6386 = vst [vmem:[#allocation24_spill] sm:$0xff] %v4913_v32  ;;  %v2103_v37 = vmul.f32 %v4908_v31, %v4818_v36  ;;  %v4947_v63 = vpop.eup %3538  ;;  %v4959_v55 = vsel %vm438_vm1, %v2454_v28, -inf  ;;  %v2575_v32 = vld [vmem:[#allocation5 + $0xa8] sm:$0xff]  ;;  %v4974_v28 = vsel %vm438_vm1, %v2451_v15, -inf  ;;  %vm2061_vm14 = vcmp.eq.f32.partialorder %v4897_v12, inf }
 0x1af   : > { %1880 = vadd.xlane.f32.xlu1 %v1879_v18  ;;  %v2569_v18 = vld [vmem:[#allocation5 + $0x78] sm:$0xff]  ;;  %v1806_v61 = vpop.xlane.xlu2 %1805  ;;  %6394 = vst [vmem:[#allocation32_spill] sm:$0xff] %v4959_v55  ;;  %vm2063_vm15 = vcmp.eq.f32.partialorder %v4897_v12, 0.0 }
 0x1b0   : > { %v4879_v16 = vsel %vm438_vm1, %v2569_v18, inf  ;;  %v4892_v40 = vmul.f32 0.0625, %v1806_v61  ;;  %v2440_v18 = vld [vmem:[#allocation4 + $0x70] sm:$0xff]  ;;  %v4919_v61 = vsel %vm438_vm1, %v2577_v2, inf  ;;  %v2445_v2 = vld [vmem:[#allocation4 + $0x98] sm:$0xff]  ;;  %2486 = vmax.xlane.f32.xlu0 %v4840_v58  ;;  %6398 = vst [vmem:[#allocation36_spill] sm:$0xff] %v4974_v28 }
 0x1b1   : > { %6383 = vst [vmem:[#allocation21_spill] sm:$0xff] %v4879_v16  ;;  %v4922_v4 = vsel %vm438_vm1, %v2440_v18, -inf  ;;  %v2448_v18 = vld [vmem:[#allocation4 + $0xb0] sm:$0xff]  ;;  %v2453_v55 = vld [vmem:[#allocation4 + $0xd8] sm:$0xff] }
 0x1b2   : > { %v1794_v16 = vpop.xlane.xlu1 %1793  ;;  %6388 = vst [vmem:[#allocation26_spill] sm:$0xff] %v4919_v61  ;;  %v4936_v61 = vsel %vm438_vm1, %v2446_v45, -inf  ;;  %v4986_v58 = vpop.eup %3540  ;;  %v2456_v28 = vld [vmem:[#allocation4 + $0xf0] sm:$0xff] }
 0x1b3   : > { %v4910_v19 = vmul.f32 0.0625, %v1794_v16  ;;  %6391 = vst [vmem:[#allocation29_spill] sm:$0xff] %v4936_v61 }
 0x1b4   : > { %2474 = vmax.xlane.f32.xlu2 %v4780_v51  ;;  %v4887_v51 = vsel %vm2759_vm3, %v2782_v34, %v4684_v26  ;;  %v4900_v26 = vsel %vm438_vm1, %v2565_v35, inf  ;;  %v1986_v34 = vmax.f32 %v1954_v46, 0.0  ;;  %v4916_v35 = vsel %vm438_vm1, %v2449_v13, -inf  ;;  %v2574_v46 = vld [vmem:[#allocation5 + $0xa0] sm:$0xff] }
 0x1b5   : > { %6384 = vst [vmem:[#allocation22_spill] sm:$0xff] %v4900_v26  ;;  %v1682_v26 = vpop.xlane.xlu0 %1681  ;;  %v4932_v13 = vmul.f32 %v4712_v56, %v4712_v56  ;;  %v4945_v56 = vsel %vm438_vm1, %v2574_v46, inf  ;;  %v2447_v46 = vld [vmem:[#allocation4 + $0xa8] sm:$0xff] }
 0x1b6   : > { %6387 = vst [vmem:[#allocation25_spill] sm:$0xff] %v4916_v35  ;;  %v2576_v35 = vld [vmem:[#allocation5 + $0xb0] sm:$0xff]  ;;  %v4940_v25 = vadd.f32 1e-05, %v1986_v34  ;;  %v2579_v34 = vld [vmem:[#allocation5 + $0xc8] sm:$0xff] }
 0x1b7   : > { %2471 = vmax.xlane.f32.xlu1 %v4761_v49  ;;  %v4890_v49 = vsel %vm438_vm1, %v2554_v27, inf  ;;  %v2571_v27 = vld [vmem:[#allocation5 + $0x88] sm:$0xff]  ;;  %6392 = vst [vmem:[#allocation30_spill] sm:$0xff] %v4945_v56  ;;  %v1948_v45 = vsub.f32 %v4910_v19, %v4932_v13  ;;  %v1673_v61 = vpop.xlane.xlu2 %1672  ;;  %v4962_v56 = vsel %vm438_vm1, %v2445_v2, -inf  ;;  %v4965_v19 = vsel %vm438_vm1, %v2448_v18, -inf  ;;  %v2450_v13 = vld [vmem:[#allocation4 + $0xc0] sm:$0xff] }
 0x1b8   : > { %v4928_v16 = vsel %vm438_vm1, %v2571_v27, inf  ;;  %v4942_v27 = vmul.f32 0.0625, %v1682_v26  ;;  %v4956_v26 = vsel %vm438_vm1, %v2570_v24, inf  ;;  %6395 = vst [vmem:[#allocation33_spill] sm:$0xff] %v4962_v56  ;;  %v4968_v6 = vsel %vm438_vm1, %v2576_v35, inf  ;;  %2489 = vmax.xlane.f32.xlu0 %v4792_v14 }
 0x1b9   : > { %6390 = vst [vmem:[#allocation28_spill] sm:$0xff] %v4928_v16  ;;  %v2573_v16 = vld [vmem:[#allocation5 + $0x98] sm:$0xff]  ;;  %v2104_v18 = vmul.f32 %v4908_v31, %v2103_v37  ;;  %3542 = vrsqrt.f32 %v4940_v25  ;;  %v4996_v37 = vsel %vm438_vm1, %v2575_v32, inf  ;;  %v1917_v32 = vmul.f32 %v4710_v54, %v4710_v54 }
 0x1ba   : > { %6393 = vst [vmem:[#allocation31_spill] sm:$0xff] %v4956_v26  ;;  %v2789_v24 = vperm.slane %v4942_v27, %v4693_v29  ;;  %v4977_v2 = vsel %vm438_vm1, %v2573_v16, inf  ;;  %v1815_v35 = vpop.xlane.xlu1 %1814  ;;  %v4993_v16 = vsel %vm438_vm1, %v2447_v46, -inf  ;;  %v1980_v56 = vmax.f32 %v1948_v45, 0.0 }
 0x1bb   : > { %6396 = vst [vmem:[#allocation34_spill] sm:$0xff] %v4965_v19  ;;  %v5001_v19 = vmul.f32 0.0625, %v1673_v61  ;;  %vm2145_vm0 = vcmp.eq.f32.partialorder %v4940_v25, inf }
 0x1bc   : > { %2483 = vmax.xlane.f32.xlu2 %v2482_v57  ;;  %v2581_v57 = vld [vmem:[#allocation5 + $0xd8] sm:$0xff]  ;;  %6397 = vst [vmem:[#allocation35_spill] sm:$0xff] %v4968_v6  ;;  %v4984_v6 = vsel %vm438_vm1, %v2579_v34, inf  ;;  %v4990_v15 = vsel %vm2759_vm3, %v2789_v24, %v4860_v52  ;;  %v1891_v34 = vmul.f32 0.0625, %v1815_v35  ;;  %v5007_v52 = vsel %vm438_vm1, %v2453_v55, -inf  ;;  %v2578_v24 = vld [vmem:[#allocation5 + $0xc0] sm:$0xff] }
 0x1bd   : > { %6399 = vst [vmem:[#allocation37_spill] sm:$0xff] %v4977_v2  ;;  %v4999_v2 = vsel %vm438_vm1, %v2581_v57, inf  ;;  %v1797_v26 = vpop.xlane.xlu0 %1796  ;;  %v6405_v57 = vsub.f32 %v4892_v40, %v4883_v62  ;;  %v2105_v35 = vmul.f32 0.5, %v2104_v18  ;;  %v2055_v55 = vmul.f32 %v4986_v58, %v4897_v12 }
 0x1be   : > { %6400 = vst [vmem:[#allocation38_spill] sm:$0xff] %v4984_v6  ;;  %v5004_v6 = vsel %vm438_vm1, %v2450_v13, -inf  ;;  %v1923_v13 = vmul.f32 %v4697_v33, %v4697_v33  ;;  %v5025_v62 = vsel %vm438_vm1, %v2456_v28, -inf  ;;  %v5028_v33 = vsel %vm438_vm1, %v2578_v24, inf }
 0x1bf   : > { %2477 = vmax.xlane.f32.xlu1 %v4821_v39  ;;  %v2046_v39 = vsub.f32 1.5, %v2045_v10  ;;  %v2091_v10 = vmul.f32 %v4947_v63, %v4857_v17  ;;  %6401 = vst [vmem:[#allocation39_spill] sm:$0xff] %v4996_v37  ;;  %v1885_v37 = vmul.f32 0.0625, %v1797_v26  ;;  %v1984_v61 = vmax.f32 %v6405_v57, 0.0  ;;  %v5020_v54 = vpop.xlane.xlu2 %1690  ;;  %v5030_v40 = vpop.eup %3542 }
 0x1c0   : > { %6402 = vst [vmem:[#allocation40_spill] sm:$0xff] %v4999_v2  ;;  %v2452_v2 = vld [vmem:[#allocation4 + $0xd0] sm:$0xff]  ;;  %v2784_v26 = vperm.slane %v5001_v19, %v4715_v59  ;;  %v1955_v18 = vsub.f32 %v1891_v34, %v1923_v13  ;;  %v2139_v14 = vmul.f32 %v5030_v40, %v4940_v25  ;;  %v5054_v57 = vadd.f32 1e-05, %v1980_v56  ;;  %2587 = vmin.xlane.f32.xlu0 %v4890_v49 }
 0x1c1   : > { %6403 = vst [vmem:[#allocation41_spill] sm:$0xff] %v5004_v6  ;;  %v2047_v46 = vmul.f32 %v4816_v38, %v2046_v39  ;;  %v2092_v6 = vmul.f32 %v4947_v63, %v2091_v10  ;;  %v2580_v38 = vld [vmem:[#allocation5 + $0xd0] sm:$0xff]  ;;  %v1949_v39 = vsub.f32 %v1885_v37, %v1917_v32  ;;  %v5035_v45 = vsel %vm438_vm1, %v2452_v2, -inf }
 0x1c2   : > { %6404 = vst [vmem:[#allocation42_spill] sm:$0xff] %v5007_v52  ;;  %v2455_v52 = vld [vmem:[#allocation4 + $0xe8] sm:$0xff]  ;;  %v5045_v10 = vsel %vm438_vm1, %v2580_v38, inf  ;;  %v2106_v37 = vsub.f32 1.5, %v2105_v35  ;;  %v2056_v32 = vmul.f32 %v4986_v58, %v2055_v55  ;;  %v2785_v2 = vsel %vm2763_vm4, %v2784_v26, %v4887_v51  ;;  %v5050_v34 = vpop.xlane.xlu1 %1687 }
 0x1c3   : > { %v5042_v28 = vsel %vm438_vm1, %v2455_v52, -inf  ;;  %6406 = vst [vmem:[#allocation43_spill] sm:$0xff] %v5045_v10  ;;  %v2093_v24 = vmul.f32 0.5, %v2092_v6  ;;  %v5058_v52 = vsel %vm6366_vm7, %v2785_v2, %v4764_v41  ;;  %v5063_v6 = vmul.f32 %v4670_v9, %v4670_v9 }
 0x1c4   : > { %2480 = vmax.xlane.f32.xlu2 %v4811_v8  ;;  %v2048_v8 = vmul.f32 %v2047_v46, %v4745_v23  ;;  %v1981_v46 = vmax.f32 %v1949_v39, 0.0  ;;  %v1926_v51 = vmul.f32 %v4672_v5, %v4672_v5  ;;  %v1987_v35 = vmax.f32 %v1955_v18, 0.0 }
 0x1c5   : > { %v1924_v56 = vmul.f32 %v4695_v30, %v4695_v30  ;;  %v2107_v41 = vmul.f32 %v4908_v31, %v2106_v37  ;;  %v2094_v55 = vsub.f32 1.5, %v2093_v24  ;;  %v2057_v38 = vmul.f32 0.5, %v2056_v32 }
 0x1c6   : > { %v2050_v13 = vsel %vm2049_vm8, %v4745_v23, %v2048_v8  ;;  %v2052_v39 = vand.u32 2147483648, %v4745_v23  ;;  %v2140_v5 = vmul.f32 %v5030_v40, %v2139_v14  ;;  %v5075_v26 = vadd.f32 1e-05, %v1981_v46 }
 0x1c7   : > { %2468 = vmax.xlane.f32.xlu1 %v4800_v22  ;;  %v5039_v22 = vadd.f32 1e-05, %v1984_v61  ;;  %v1824_v61 = vpop.xlane.xlu0 %1823  ;;  %v1818_v18 = vpop.xlane.xlu2 %1817  ;;  %v1921_v30 = vmul.f32 %v4733_v1, %v4733_v1  ;;  %v5083_v8 = vadd.f32 1e-05, %v1987_v35  ;;  %v2112_v24 = vand.u32 2147483648, %v4818_v36 }
 0x1c8   : > { %v1894_v9 = vmul.f32 0.0625, %v1824_v61  ;;  %v5087_v37 = vsel %vm2051_vm9, %v2052_v39, %v2050_v13  ;;  %v2095_v32 = vmul.f32 %v4947_v63, %v2094_v55  ;;  %v2058_v2 = vsub.f32 1.5, %v2057_v38  ;;  %2602 = vmin.xlane.f32.xlu0 %v4783_v50 }
 0x1c9   : > { %3544 = vrsqrt.f32 %v5039_v22  ;;  %v5099_v35 = vmul.f32 %v4737_v21, %v4737_v21  ;;  %v5103_v49 = vmul.f32 %v4808_v42, %v4808_v42  ;;  %v2100_v21 = vand.u32 2147483648, %v4857_v17 }
 0x1ca   : > { %3546 = vrsqrt.f32 %v5054_v57  ;;  %v1958_v31 = vsub.f32 %v1894_v9, %v1926_v51  ;;  %v1809_v14 = vpop.xlane.xlu1 %1808  ;;  %v2141_v51 = vmul.f32 0.5, %v2140_v5  ;;  %v2059_v38 = vmul.f32 %v4986_v58, %v2058_v2 }
 0x1cb   : > { %3548 = vrsqrt.f32 %v5075_v26  ;;  %v1889_v61 = vmul.f32 0.0625, %v1809_v14  ;;  %vm6362_vm8 = vcmask 1044484   ;;  %vm2147_vm9 = vcmp.eq.f32.partialorder %v4940_v25, 0.0 }
 0x1cc   : > { %2498 = vmax.xlane.f32.xlu2 %v4829_v47  ;;  %v1892_v47 = vmul.f32 0.0625, %v1818_v18  ;;  %v1990_v1 = vmax.f32 %v1958_v31, 0.0  ;;  %3550 = vrsqrt.f32 %v5083_v8  ;;  %v2142_v5 = vsub.f32 1.5, %v2141_v51 }
 0x1cd   : > { %v1953_v55 = vsub.f32 %v1889_v61, %v1921_v30  ;;  %v2096_v18 = vmul.f32 %v2095_v32, %v4857_v17  ;;  %v5138_v32 = vmul.f32 %v4826_v43, %v4826_v43  ;;  %v2060_v51 = vmul.f32 %v2059_v38, %v4897_v12 }
 0x1ce   : > { %v1956_v23 = vsub.f32 %v1892_v47, %v1924_v56  ;;  %v5105_v13 = vadd.f32 1e-05, %v1990_v1  ;;  %v5156_v61 = vmul.f32 %v4942_v27, %v4942_v27  ;;  %v6409_v10 = vand.u32 2147483648, %v4940_v25 }
 0x1cf   : > { %2495 = vmax.xlane.f32.xlu1 %v4832_v48  ;;  %v2108_v48 = vmul.f32 %v2107_v41, %v4818_v36  ;;  %v5094_v46 = vpop.eup %3544  ;;  %v5107_v63 = vpop.xlane.xlu0 %1693  ;;  %v1985_v47 = vmax.f32 %v1953_v55, 0.0  ;;  %v2098_v50 = vsel %vm2097_vm12, %v4857_v17, %v2096_v18  ;;  %vm2085_vm12 = vcmp.eq.f32.partialorder %v5075_v26, inf }
 0x1d0   : > { %v5110_v41 = vpop.eup %3546  ;;  %v1988_v56 = vmax.f32 %v1956_v23, 0.0  ;;  %v2115_v42 = vmul.f32 %v5094_v46, %v5039_v22  ;;  %v1685_v30 = vpop.xlane.xlu2 %1684  ;;  %3552 = vrsqrt.f32 %v5105_v13  ;;  %2507 = vmax.xlane.f32.xlu0 %v4952_v7 }
 0x1d1   : > { %v2110_v39 = vsel %vm2109_vm10, %v4818_v36, %v2108_v48  ;;  %v2067_v58 = vmul.f32 %v5110_v41, %v5054_v57  ;;  %v5132_v2 = vpop.eup %3548  ;;  %v2064_v48 = vand.u32 2147483648, %v4897_v12  ;;  %v5163_v36 = vmul.f32 0.0625, %v1685_v30 }
 0x1d2   : > { %v5130_v31 = vadd.f32 1e-05, %v1988_v56  ;;  %v5149_v1 = vsel %vm2111_vm11, %v2112_v24, %v2110_v39  ;;  %v2116_v23 = vmul.f32 %v5094_v46, %v2115_v42  ;;  %v1827_v43 = vpop.xlane.xlu1 %1826  ;;  %v2143_v24 = vmul.f32 %v5030_v40, %v2142_v5 }
 0x1d3   : > { %v2079_v56 = vmul.f32 %v5132_v2, %v5075_v26  ;;  %v2068_v55 = vmul.f32 %v5110_v41, %v2067_v58  ;;  %v5179_v40 = vsel %vm2099_vm13, %v2100_v21, %v2098_v50  ;;  %v2062_v5 = vsel %vm2061_vm14, %v4897_v12, %v2060_v51 }
 0x1d4   : > { %2599 = vmin.xlane.f32.xlu2 %v4774_v53  ;;  %v5142_v53 = vmul.f32 %v4854_v20, %v4854_v20  ;;  %v5161_v20 = vadd.f32 1e-05, %v1985_v47  ;;  %3554 = vrsqrt.f32 %v5130_v31  ;;  %v2117_v30 = vmul.f32 0.5, %v2116_v23 }
 0x1d5   : > { %v5185_v58 = vmul.f32 0.0625, %v5020_v54  ;;  %v1895_v9 = vmul.f32 0.0625, %v1827_v43  ;;  %v2144_v17 = vmul.f32 %v2143_v24, %v4940_v25  ;;  %v2080_v54 = vmul.f32 %v5132_v2, %v2079_v56 }
 0x1d6   : > { %3556 = vrsqrt.f32 %v5161_v20  ;;  %v2069_v21 = vmul.f32 0.5, %v2068_v55  ;;  %v5211_v50 = vsel %vm2063_vm15, %v2064_v48, %v2062_v5  ;;  %v2118_v24 = vsub.f32 1.5, %v2117_v30 }
 0x1d7   : > { %2590 = vmin.xlane.f32.xlu1 %v4797_v0  ;;  %v5145_v0 = vpop.eup %3550  ;;  %v1821_v38 = vpop.xlane.xlu0 %1820  ;;  %v1959_v56 = vsub.f32 %v1895_v9, %v5063_v6  ;;  %v5227_v12 = vmul.f32 %v5185_v58, %v5185_v58  ;;  %v1742_v48 = vmul.f32 0.0625, %v5050_v34  ;;  %v2146_v30 = vsel %vm2145_vm0, %v4940_v25, %v2144_v17 }
 0x1d8   : > { %v1893_v42 = vmul.f32 0.0625, %v1821_v38  ;;  %v2151_v39 = vmul.f32 %v5145_v0, %v5083_v8  ;;  %v5175_v18 = vpop.eup %3552  ;;  %v2791_v38 = vperm.slane %v5163_v36, %v4715_v59  ;;  %v5190_v27 = vpop.xlane.xlu2 %1702  ;;  %v2070_v5 = vsub.f32 1.5, %v2069_v21 }
 0x1d9   : > { %v2187_v51 = vmul.f32 %v5175_v18, %v5105_v13  ;;  %v1991_v9 = vmax.f32 %v1959_v56, 0.0  ;;  %vm2121_vm10 = vcmp.eq.f32.partialorder %v5039_v22, inf  ;;  %v1744_v17 = vmul.f32 0.0625, %v5107_v63 }
 0x1da   : > { %v1957_v47 = vsub.f32 %v1893_v42, %v5099_v35  ;;  %v5199_v35 = vmul.f32 %v5001_v19, %v5001_v19  ;;  %v2152_v43 = vmul.f32 %v5145_v0, %v2151_v39  ;;  %v5218_v55 = vpop.xlane.xlu1 %1699  ;;  %v2081_v39 = vmul.f32 0.5, %v2080_v54 }
 0x1db   : > { %v2071_v56 = vmul.f32 %v5110_v41, %v2070_v5  ;;  %vm2073_vm11 = vcmp.eq.f32.partialorder %v5054_v57, inf  ;;  %v5252_v7 = vadd.f32 1e-05, %v1991_v9  ;;  %v5254_v14 = vmul.f32 %v1742_v48, %v1742_v48 }
 0x1dc   : > { %2501 = vmax.xlane.f32.xlu2 %v4922_v4  ;;  %v1989_v23 = vmax.f32 %v1957_v47, 0.0  ;;  %v5207_v4 = vpop.eup %3554  ;;  %v2188_v47 = vmul.f32 %v5175_v18, %v2187_v51  ;;  %v6408_v51 = vld [vmem:[#allocation14_spill] sm:$0xff]  ;;  %vm2075_vm13 = vcmp.eq.f32.partialorder %v5054_v57, 0.0  ;;  %vm2157_vm14 = vcmp.eq.f32.partialorder %v5083_v8, inf }
 0x1dd   : > { %v5220_v42 = vpop.eup %3556  ;;  %v2163_v54 = vmul.f32 %v5207_v4, %v5130_v31  ;;  %2605 = vmin.xlane.f32.xlu0 %v6408_v51  ;;  %vm2193_vm15 = vcmp.eq.f32.partialorder %v5105_v13, inf  ;;  %vm2087_vm0 = vcmp.eq.f32.partialorder %v5075_v26, 0.0 }
 0x1de   : > { %v2189_v21 = vmul.f32 0.5, %v2188_v47 }
 0x1df   : > { %2492 = vmax.xlane.f32.xlu1 %v4876_v44  ;;  %v2792_v44 = vsel %vm2763_vm4, %v2791_v38, %v4990_v15  ;;  %v5223_v15 = vadd.f32 1e-05, %v1989_v23  ;;  %v1839_v6 = vpop.xlane.xlu0 %1838  ;;  %v2153_v38 = vmul.f32 0.5, %v2152_v43  ;;  %v2119_v23 = vmul.f32 %v5094_v46, %v2118_v24  ;;  %v6407_v46 = vld [vmem:[#allocation24_spill] sm:$0xff] }
 0x1e0   : > { %v5215_v19 = vsel %vm6362_vm8, %v2792_v44, %v5058_v52  ;;  %v2794_v52 = vperm.slane %v5185_v58, %v4655_v60  ;;  %v1899_v34 = vmul.f32 0.0625, %v1839_v6  ;;  %v2127_v58 = vmul.f32 %v5220_v42, %v5161_v20  ;;  %v1836_v43 = vpop.xlane.xlu2 %1835 }
 0x1e1   : > { %3558 = vrsqrt.f32 %v5223_v15  ;;  %v2793_v44 = vperm.slane %v1742_v48, %v4651_v3  ;;  %v2082_v24 = vsub.f32 1.5, %v2081_v39  ;;  %v2154_v63 = vsub.f32 1.5, %v2153_v38 }
 0x1e2   : > { %v1963_v6 = vsub.f32 %v1899_v34, %v5103_v49  ;;  %v2120_v41 = vmul.f32 %v2119_v23, %v5039_v22  ;;  %v2164_v5 = vmul.f32 %v5207_v4, %v2163_v54  ;;  %v2128_v49 = vmul.f32 %v5220_v42, %v2127_v58  ;;  %v1830_v9 = vpop.xlane.xlu1 %1829  ;;  %v2582_v58 = vld [vmem:[#allocation5 + $0xe0] sm:$0xff] }
 0x1e3   : > { %v2796_v48 = vperm.slane %v1744_v17, %v4693_v29  ;;  %v2795_v25 = vsel %vm2755_vm2, %v2794_v52, %v2793_v44  ;;  %v2083_v38 = vmul.f32 %v5132_v2, %v2082_v24  ;;  %v2072_v23 = vmul.f32 %v2071_v56, %v5054_v57 }
 0x1e4   : > { %2593 = vmin.xlane.f32.xlu2 %v4789_v11  ;;  %v5261_v11 = vsel %vm2147_vm9, %v6409_v10, %v2146_v30  ;;  %v1995_v39 = vmax.f32 %v1963_v6, 0.0  ;;  %v1898_v10 = vmul.f32 0.0625, %v1836_v43  ;;  %v1896_v30 = vmul.f32 0.0625, %v1830_v9 }
 0x1e5   : > { %3560 = vrsqrt.f32 %v5252_v7  ;;  %v2190_v51 = vsub.f32 1.5, %v2189_v21  ;;  %v2165_v43 = vmul.f32 0.5, %v2164_v5  ;;  %v2129_v24 = vmul.f32 0.5, %v2128_v49 }
 0x1e6   : > { %v5274_v34 = vadd.f32 1e-05, %v1995_v39  ;;  %v1962_v52 = vsub.f32 %v1898_v10, %v5138_v32  ;;  %v1960_v44 = vsub.f32 %v1896_v30, %v5142_v53  ;;  %v5290_v21 = vsel %vm2121_vm10, %v5039_v22, %v2120_v41  ;;  %v6410_v32 = vld [vmem:[#allocation16_spill] sm:$0xff] }
 0x1e7   : > { %2510 = vmax.xlane.f32.xlu1 %v6407_v46  ;;  %v5266_v47 = vpop.eup %3558  ;;  %v5276_v54 = vpop.xlane.xlu0 %1711  ;;  %v2155_v46 = vmul.f32 %v5145_v0, %v2154_v63  ;;  %v5292_v0 = vmul.f32 %v1744_v17, %v1744_v17  ;;  %v5298_v53 = vsel %vm438_vm1, %v2582_v58, inf  ;;  %v2084_v63 = vmul.f32 %v2083_v38, %v5075_v26  ;;  %v6412_v17 = vld [vmem:[#allocation23_spill] sm:$0xff]  ;;  %v6413_v30 = vld [vmem:[#allocation20_spill] sm:$0xff] }
 0x1e8   : > { %v2175_v2 = vmul.f32 %v5266_v47, %v5223_v15  ;;  %3562 = vrsqrt.f32 %v5274_v34  ;;  %v5294_v6 = vpop.xlane.xlu2 %1705  ;;  %6411 = vst [vmem:[#allocation24_spill] sm:$0xff] %v5298_v53  ;;  %v5303_v39 = vmul.f32 0.0625, %v5190_v27  ;;  %v1994_v5 = vmax.f32 %v1962_v52, 0.0  ;;  %2504 = vmax.xlane.f32.xlu0 %v6413_v30 }
 0x1e9   : > { %v5306_v41 = vsel %vm2759_vm3, %v2796_v48, %v2795_v25  ;;  %v2191_v49 = vmul.f32 %v5175_v18, %v2190_v51  ;;  %v2074_v9 = vsel %vm2073_vm11, %v5054_v57, %v2072_v23  ;;  %v2156_v25 = vmul.f32 %v2155_v46, %v5083_v8 }
 0x1ea   : > { %v2176_v48 = vmul.f32 %v5266_v47, %v2175_v2  ;;  %v2166_v58 = vsub.f32 1.5, %v2165_v43  ;;  %v2130_v52 = vsub.f32 1.5, %v2129_v24  ;;  %v5321_v18 = vpop.xlane.xlu1 %1696  ;;  %vm2123_vm9 = vcmp.eq.f32.partialorder %v5039_v22, 0.0 }
 0x1eb   : > { %v5317_v38 = vpop.eup %3560  ;;  %v5328_v51 = vmul.f32 %v5163_v36, %v5163_v36  ;;  %v2086_v46 = vsel %vm2085_vm12, %v5075_v26, %v2084_v63  ;;  %vm2159_vm10 = vcmp.eq.f32.partialorder %v5083_v8, 0.0  ;;  %v5340_v24 = vmul.f32 %v5303_v39, %v5303_v39 }
 0x1ec   : > { %2614 = vmin.xlane.f32.xlu2 %v6410_v32  ;;  %v5330_v32 = vadd.f32 1e-05, %v1994_v5  ;;  %v1746_v30 = vmul.f32 0.0625, %v5218_v55  ;;  %v6414_v36 = vand.u32 2147483648, %v5054_v57  ;;  %v2192_v5 = vmul.f32 %v2191_v49, %v5105_v13 }
 0x1ed   : > { %vm2169_vm11 = vcmp.eq.f32.partialorder %v5130_v31, inf  ;;  %v2199_v27 = vmul.f32 %v5317_v38, %v5252_v7  ;;  %v2801_v23 = vperm.slane %v5303_v39, %v4655_v60  ;;  %v2177_v10 = vmul.f32 0.5, %v2176_v48 }
 0x1ee   : > { %v5332_v2 = vpop.eup %3562  ;;  %v2158_v55 = vsel %vm2157_vm14, %v5083_v8, %v2156_v25  ;;  %v2167_v57 = vmul.f32 %v5207_v4, %v2166_v58  ;;  %vm2133_vm12 = vcmp.eq.f32.partialorder %v5161_v20, inf  ;;  %3564 = vrsqrt.f32 %v5330_v32 }
 0x1ef   : > { %2611 = vmin.xlane.f32.xlu1 %v6412_v17  ;;  %v1992_v17 = vmax.f32 %v1960_v44, 0.0  ;;  %v1842_v43 = vpop.xlane.xlu0 %1841  ;;  %v5347_v44 = vsel %vm2075_vm13, %v6414_v36, %v2074_v9  ;;  %v2131_v9 = vmul.f32 %v5220_v42, %v2130_v52  ;;  %vm2195_vm13 = vcmp.eq.f32.partialorder %v5105_v13, 0.0  ;;  %v6415_v36 = vld [vmem:[#allocation29_spill] sm:$0xff]  ;;  %v6416_v52 = vld [vmem:[#allocation18_spill] sm:$0xff] }
 0x1f0   : > { %v1900_v63 = vmul.f32 0.0625, %v1842_v43  ;;  %v2247_v49 = vmul.f32 %v5332_v2, %v5274_v34  ;;  %v1833_v48 = vpop.xlane.xlu2 %1832  ;;  %vm2171_vm14 = vcmp.eq.f32.partialorder %v5130_v31, 0.0  ;;  %v5371_v42 = vmul.f32 %v1746_v30, %v1746_v30  ;;  %2522 = vmax.xlane.f32.xlu0 %v4993_v16 }
 0x1f1   : > { %v5366_v39 = vadd.f32 1e-05, %v1992_v17  ;;  %v2800_v25 = vperm.slane %v1746_v30, %v4651_v3  ;;  %v1897_v58 = vmul.f32 0.0625, %v1833_v48  ;;  %v2178_v4 = vsub.f32 1.5, %v2177_v10 }
 0x1f2   : > { %v1964_v43 = vsub.f32 %v1900_v63, %v5156_v61  ;;  %v2194_v61 = vsel %vm2193_vm15, %v5105_v13, %v2192_v5  ;;  %v2200_v63 = vmul.f32 %v5317_v38, %v2199_v27  ;;  %v2168_v56 = vmul.f32 %v2167_v57, %v5130_v31  ;;  %v5386_v48 = vpop.xlane.xlu1 %1714 }
 0x1f3   : > { %v5383_v53 = vmul.f32 0.0625, %v5276_v54  ;;  %v1961_v30 = vsub.f32 %v1897_v58, %v5199_v35  ;;  %v2132_v5 = vmul.f32 %v2131_v9, %v5161_v20  ;;  %3566 = vrsqrt.f32 %v5366_v39 }
 0x1f4   : > { %2519 = vmax.xlane.f32.xlu2 %v6415_v36  ;;  %v1996_v17 = vmax.f32 %v1964_v43, 0.0  ;;  %v1748_v27 = vmul.f32 0.0625, %v5294_v6  ;;  %v2802_v10 = vsel %vm2755_vm2, %v2801_v23, %v2800_v25  ;;  %v6417_v54 = vand.u32 2147483648, %v5075_v26  ;;  %v5410_v6 = vpop.eup %3564 }
 0x1f5   : > { %v6418_v57 = vand.u32 2147483648, %v5039_v22  ;;  %vm2135_vm15 = vcmp.eq.f32.partialorder %v5161_v20, 0.0  ;;  %v2201_v23 = vmul.f32 0.5, %v2200_v63  ;;  %v1993_v25 = vmax.f32 %v1961_v30, 0.0 }
 0x1f6   : > { %v5392_v43 = vadd.f32 1e-05, %v1996_v17  ;;  %v5401_v35 = vsel %vm2087_vm0, %v6417_v54, %v2086_v46  ;;  %v6419_v58 = vand.u32 2147483648, %v5083_v8  ;;  %v2179_v46 = vmul.f32 %v5266_v47, %v2178_v4  ;;  %v6421_v4 = vld [vmem:[#allocation13_spill] sm:$0xff] }
 0x1f7   : > { %2513 = vmax.xlane.f32.xlu1 %v6416_v52  ;;  %v2248_v52 = vmul.f32 %v5332_v2, %v2247_v49  ;;  %v5394_v16 = vpop.xlane.xlu0 %1708  ;;  %v5408_v9 = vsel %vm2123_vm9, %v6418_v57, %v5290_v21  ;;  %v2170_v22 = vsel %vm2169_vm11, %v5130_v31, %v2168_v56  ;;  %v5426_v21 = vmul.f32 %v5383_v53, %v5383_v53 }
 0x1f8   : > { %v5418_v26 = vsel %vm2159_vm10, %v6419_v58, %v2158_v55  ;;  %v1745_v17 = vmul.f32 0.0625, %v5321_v18  ;;  %v2134_v8 = vsel %vm2133_vm12, %v5161_v20, %v2132_v5  ;;  %v2803_v47 = vperm.slane %v1748_v27, %v4693_v29  ;;  %v1851_v55 = vpop.xlane.xlu2 %1850  ;;  %v6422_v18 = vld [vmem:[#allocation12_spill] sm:$0xff] }
 0x1f9   : > { %6420 = vst [vmem:[#allocation14_spill] sm:$0xff] %v5418_v26  ;;  %v2249_v63 = vmul.f32 0.5, %v2248_v52  ;;  %3568 = vrsqrt.f32 %v5392_v43  ;;  %v2235_v56 = vmul.f32 %v5410_v6, %v5330_v32  ;;  %v1903_v54 = vmul.f32 0.0625, %v1851_v55  ;;  %v5446_v5 = vpop.eup %3566  ;;  %v6434_v26 = vld [vmem:[#allocation41_spill] sm:$0xff] }
 0x1fa   : > { %v6423_v52 = vand.u32 2147483648, %v5105_v13  ;;  %vm2181_vm0 = vcmp.eq.f32.partialorder %v5223_v15, inf  ;;  %v2202_v58 = vsub.f32 1.5, %v2201_v23  ;;  %v5450_v49 = vmul.f32 %v1748_v27, %v1748_v27  ;;  %v1848_v30 = vpop.xlane.xlu1 %1847 }
 0x1fb   : > { %v5452_v36 = vadd.f32 1e-05, %v1993_v25  ;;  %v6426_v55 = vand.u32 2147483648, %v5130_v31  ;;  %v2180_v13 = vmul.f32 %v2179_v46, %v5223_v15  ;;  %v1967_v23 = vsub.f32 %v1903_v54, %v5227_v12  ;;  %v2716_v54 = vld [vmem:[%s6354_s6 + $0x10] sm:$0xff] }
 0x1fc   : > { %2608 = vmin.xlane.f32.xlu2 %v6421_v4  ;;  %v5444_v57 = vsel %vm2195_vm13, %v6423_v52, %v2194_v61  ;;  %v6425_v4 = vld [vmem:[#allocation11_spill] sm:$0xff]  ;;  %v2798_v52 = vperm.slane %v1745_v17, %v4715_v59  ;;  %v5466_v25 = vsel %vm2759_vm3, %v2803_v47, %v2802_v10  ;;  %v2236_v31 = vmul.f32 %v5410_v6, %v2235_v56  ;;  %v2685_v10 = vld [vmem:[%s6353_s5 + $0x18] sm:$0xff] }
 0x1fd   : > { %6424 = vst [vmem:[#allocation16_spill] sm:$0xff] %v5444_v57  ;;  %2617 = vmin.xlane.f32.xlu0 %v6425_v4  ;;  %v2250_v4 = vsub.f32 1.5, %v2249_v63  ;;  %v1902_v57 = vmul.f32 0.0625, %v1848_v30  ;;  %v2211_v46 = vmul.f32 %v5446_v5, %v5366_v39  ;;  %vm6361_vm9 = vcmask 1045509   ;;  %v2684_v63 = vld [vmem:[%s6353_s5 + $0x10] sm:$0xff]  ;;  %v2717_v30 = vld [vmem:[%s6354_s6 + $0x18] sm:$0xff]  ;;  %2706 = vmatpush.msra.mxu0 %v2685_v10 }
 0x1fe   : > { %v2203_v61 = vmul.f32 %v5317_v38, %v2202_v58  ;;  %3570 = vrsqrt.f32 %v5452_v36  ;;  %v5485_v38 = vmul.f32 %v1745_v17, %v1745_v17  ;;  %v2799_v56 = vsel %vm2763_vm4, %v2798_v52, %v5306_v41  ;;  %2842 = vmatpush.msra.mxu1 %v2717_v30  ;;  %v2683_v10 = vld [vmem:[%s6353_s5 + $0x8] sm:$0xff] }
 0x1ff   : > { %2596 = vmin.xlane.f32.xlu1 %v6422_v18  ;;  %v5458_v18 = vsel %vm2171_vm14, %v6426_v55, %v2170_v22  ;;  %v1854_v22 = vpop.xlane.xlu0 %1853  ;;  %v1999_v55 = vmax.f32 %v1967_v23, 0.0  ;;  %v1966_v12 = vsub.f32 %v1902_v57, %v5254_v14  ;;  %v5483_v47 = vpop.eup %3568  ;;  %v6428_v57 = vand.u32 2147483648, %v5161_v20  ;;  %2707 = vmatpush.msra.mxu0 %v2684_v63 }
 0x200   : > { %6427 = vst [vmem:[#allocation23_spill] sm:$0xff] %v5458_v18  ;;  %v1904_v18 = vmul.f32 0.0625, %v1854_v22  ;;  %v2251_v17 = vmul.f32 %v5332_v2, %v2250_v4  ;;  %v5503_v41 = vmul.f32 0.0625, %v5386_v48  ;;  %v1845_v22 = vpop.xlane.xlu2 %1844  ;;  %vm2205_vm10 = vcmp.eq.f32.partialorder %v5252_v7, inf  ;;  %2843 = vmatpush.msra.mxu1 %v2716_v54  ;;  %v6430_v4 = vld [vmem:[#allocation33_spill] sm:$0xff] }
 0x201   : > { %v5489_v14 = vadd.f32 1e-05, %v1999_v55  ;;  %v5498_v58 = vsel %vm2135_vm15, %v6428_v57, %v2134_v8  ;;  %v1998_v52 = vmax.f32 %v1966_v12, 0.0  ;;  %v6429_v55 = vld [vmem:[#allocation15_spill] sm:$0xff]  ;;  %v5511_v20 = vmul.f32 0.0625, %v5394_v16  ;;  %v2682_v16 = vld [vmem:[%s6353_s5] sm:$0xff]  ;;  %2708 = vmatpush.msra.mxu0 %v2683_v10 }
 0x202   : > { %v1968_v23 = vsub.f32 %v1904_v18, %v5292_v0  ;;  %v2237_v8 = vmul.f32 0.5, %v2236_v31  ;;  %v2212_v2 = vmul.f32 %v5446_v5, %v2211_v46  ;;  %v1901_v0 = vmul.f32 0.0625, %v1845_v22  ;;  %v2715_v31 = vld [vmem:[%s6354_s6 + $0x8] sm:$0xff]  ;;  %v6431_v46 = vld [vmem:[#allocation17_spill] sm:$0xff]  ;;  %v1718_v54 = vpop.xlane.xlu1 %1717 }
 0x203   : > { %v2259_v48 = vmul.f32 %v5483_v47, %v5392_v43  ;;  %3572 = vrsqrt.f32 %v5489_v14  ;;  %v5518_v12 = vadd.f32 1e-05, %v1998_v52  ;;  %v2204_v63 = vmul.f32 %v2203_v61, %v5252_v7  ;;  %2844 = vmatpush.msra.mxu1 %v2715_v31  ;;  %2709 = vmatpush.msra.mxu0 %v2682_v16 }
 0x204   : > { %2626 = vmin.xlane.f32.xlu2 %v6429_v55  ;;  %v2000_v18 = vmax.f32 %v1968_v23, 0.0  ;;  %v1965_v30 = vsub.f32 %v1901_v0, %v5328_v51  ;;  %vm6365_vm11 = vcmask 1046534   ;;  %v5539_v57 = vsel %vm2181_vm0, %v5223_v15, %v2180_v13  ;;  %v5541_v23 = vpop.eup %3570 }
 0x205   : > { %2516 = vmax.xlane.f32.xlu0 %v6430_v4  ;;  %vm2253_vm12 = vcmp.eq.f32.partialorder %v5274_v34, inf  ;;  %v2808_v61 = vperm.slane %v5503_v41, %v4655_v60  ;;  %3574 = vrsqrt.f32 %v5518_v12  ;;  %v5549_v52 = vmul.f32 0.0625, %v1718_v54  ;;  %v1593_v54 = vld [vmem:[%s5534_s24] sm:$0xff] }
 0x206   : > { %v5544_v51 = vadd.f32 1e-05, %v2000_v18  ;;  %v2252_v22 = vmul.f32 %v2251_v17, %v5274_v34  ;;  %v2238_v55 = vsub.f32 1.5, %v2237_v8  ;;  %v2823_v13 = vsel %vm6361_vm9, %v2799_v56, %v5215_v19  ;;  %v2714_v17 = vld [vmem:[%s6354_s6] sm:$0xff] }
 0x207   : > { %2623 = vmin.xlane.f32.xlu1 %v6431_v46  ;;  %v1721_v10 = vpop.xlane.xlu0 %1720  ;;  %v1997_v0 = vmax.f32 %v1965_v30, 0.0  ;;  %v2260_v4 = vmul.f32 %v5483_v47, %v2259_v48  ;;  %vm2207_vm13 = vcmp.eq.f32.partialorder %v5252_v7, 0.0  ;;  %v2805_v18 = vperm.slane %v5511_v20, %v4715_v59  ;;  %2845 = vmatpush.msra.mxu1 %v2714_v17 }
 0x208   : > { %v2213_v31 = vmul.f32 0.5, %v2212_v2  ;;  %v5558_v46 = vmul.f32 0.0625, %v1721_v10  ;;  %vm2183_vm14 = vcmp.eq.f32.partialorder %v5223_v15, 0.0  ;;  %3576 = vrsqrt.f32 %v5544_v51  ;;  %v1863_v27 = vpop.xlane.xlu2 %1862 }
 0x209   : > { %v2223_v19 = vmul.f32 %v5541_v23, %v5452_v36  ;;  %v2810_v56 = vperm.slane %v5549_v52, %v4693_v29  ;;  %vm6363_vm15 = vcmask 261120   ;;  %v5570_v8 = vpop.eup %3572  ;;  %v2806_v2 = vsel %vm2763_vm4, %v2805_v18, %v5466_v25 }
 0x20a   : > { %v2812_v48 = vperm.slane %v5558_v46, %v4715_v59  ;;  %v6433_v16 = vperm.slane %v5383_v53, %v4651_v3  ;;  %v5580_v10 = vadd.f32 1e-05, %v1997_v0  ;;  %3422 = vmatmul.msk.f32.vlgmr.msra.gmra.mxu0 %vm6363_vm15, %v1593_v54  ;;  %vm2255_vm0 = vcmp.eq.f32.partialorder %v5274_v34, 0.0  ;;  %v6435_v54 = vld [vmem:[#allocation36_spill] sm:$0xff] }
 0x20b   : > { %v2239_v17 = vmul.f32 %v5410_v6, %v2238_v55  ;;  %vm2241_vm9 = vcmp.eq.f32.partialorder %v5330_v32, inf  ;;  %v1907_v18 = vmul.f32 0.0625, %v1863_v27  ;;  %vm6364_vm8 = vcmask 1047559   ;;  %v5588_v53 = vpop.eup %3574  ;;  %v6436_v55 = vld [vmem:[#allocation34_spill] sm:$0xff] }
 0x20c   : > { %v2809_v30 = vsel %vm2755_vm2, %v2808_v61, %v6433_v16  ;;  %2531 = vmax.xlane.f32.xlu2 %v6434_v26  ;;  %v2261_v61 = vmul.f32 0.5, %v2260_v4  ;;  %v2206_v0 = vsel %vm2205_vm10, %v5252_v7, %v2204_v63  ;;  %v2825_v6 = vsel %vm6365_vm11, %v2806_v2, %v2823_v13  ;;  %v1860_v4 = vpop.xlane.xlu1 %1859 }
 0x20d   : > { %v2811_v25 = vsel %vm2759_vm3, %v2810_v56, %v2809_v30  ;;  %2534 = vmax.xlane.f32.xlu0 %v6435_v54  ;;  %v2224_v27 = vmul.f32 %v5541_v23, %v2223_v19  ;;  %v2295_v26 = vmul.f32 %v5570_v8, %v5489_v14  ;;  %v1971_v56 = vsub.f32 %v1907_v18, %v5340_v24 }
 0x20e   : > { %v2813_v16 = vsel %vm2763_vm4, %v2812_v48, %v2811_v25  ;;  %v5604_v63 = vmul.f32 %v5511_v20, %v5511_v20  ;;  %v5608_v48 = vmul.f32 %v5503_v41, %v5503_v41  ;;  %3578 = vrsqrt.f32 %v5580_v10  ;;  %v5612_v19 = vpop.eup %3576 }
 0x20f   : > { %2525 = vmax.xlane.f32.xlu1 %v6436_v55  ;;  %v2827_v30 = vsel %vm6364_vm8, %v2813_v16, %v2825_v6  ;;  %v1906_v13 = vmul.f32 0.0625, %v1860_v4  ;;  %v2240_v24 = vmul.f32 %v2239_v17, %v5330_v32  ;;  %v2214_v2 = vsub.f32 1.5, %v2213_v31  ;;  %v1872_v25 = vpop.xlane.xlu0 %1871 }
 0x210   : > { %3423 = vmatmul.msk.f32.vlgmr.msra.gmra.mxu1 %vm6363_vm15, %v2827_v30  ;;  %v2283_v18 = vmul.f32 %v5588_v53, %v5518_v12  ;;  %v2254_v20 = vsel %vm2253_vm12, %v5274_v34, %v2252_v22  ;;  %v2262_v41 = vsub.f32 1.5, %v2261_v61  ;;  %v1910_v54 = vmul.f32 0.0625, %v1872_v25 }
 0x211   : > { %v2003_v16 = vmax.f32 %v1971_v56, 0.0  ;;  %v1970_v6 = vsub.f32 %v1906_v13, %v5371_v42  ;;  %v2225_v55 = vmul.f32 0.5, %v2224_v27  ;;  %v2296_v4 = vmul.f32 %v5570_v8, %v2295_v26  ;;  %v1866_v26 = vpop.xlane.xlu2 %1865  ;;  %v6439_v13 = vld [vmem:[#allocation27_spill] sm:$0xff] }
 0x212   : > { %v6437_v17 = vand.u32 2147483648, %v5223_v15  ;;  %v6438_v30 = vand.u32 2147483648, %v5252_v7  ;;  %v2307_v61 = vmul.f32 %v5612_v19, %v5544_v51  ;;  %v1974_v42 = vsub.f32 %v1910_v54, %v5426_v21 }
 0x213   : > { %v2002_v27 = vmax.f32 %v1970_v6, 0.0  ;;  %vm2243_vm10 = vcmp.eq.f32.partialorder %v5330_v32, 0.0  ;;  %v2215_v56 = vmul.f32 %v5446_v5, %v2214_v2  ;;  %vm2217_vm12 = vcmp.eq.f32.partialorder %v5366_v39, inf  ;;  %v6441_v6 = vld [vmem:[#allocation31_spill] sm:$0xff]  ;;  %v6442_v2 = vld [vmem:[#allocation22_spill] sm:$0xff] }
 0x214   : > { %v5627_v31 = vsel %vm2183_vm14, %v6437_v17, %v5539_v57  ;;  %v5633_v22 = vsel %vm2207_vm13, %v6438_v30, %v2206_v0  ;;  %v2284_v15 = vmul.f32 %v5588_v53, %v2283_v18  ;;  %v1908_v57 = vmul.f32 0.0625, %v1866_v26  ;;  %2629 = vmin.xlane.f32.xlu2 %v6439_v13  ;;  %v5649_v21 = vpop.eup %3578 }
 0x215   : > { %v6440_v7 = vand.u32 2147483648, %v5274_v34  ;;  %v2263_v25 = vmul.f32 %v5483_v47, %v2262_v41  ;;  %v2006_v54 = vmax.f32 %v1974_v42, 0.0  ;;  %2635 = vmin.xlane.f32.xlu0 %v6441_v6  ;;  %v5653_v5 = vadd.f32 1e-05, %v2003_v16  ;;  %v1857_v47 = vpop.xlane.xlu1 %1856 }
 0x216   : > { %v2242_v18 = vsel %vm2241_vm9, %v5330_v32, %v2240_v24  ;;  %vm2265_vm13 = vcmp.eq.f32.partialorder %v5392_v43, inf  ;;  %v2226_v34 = vsub.f32 1.5, %v2225_v55  ;;  %v1944_v17 = vmul.f32 %v5549_v52, %v5549_v52 }
 0x217   : > { %v5647_v0 = vsel %vm2255_vm0, %v6440_v7, %v2254_v20  ;;  %2620 = vmin.xlane.f32.xlu1 %v6442_v2  ;;  %v2297_v20 = vmul.f32 0.5, %v2296_v4  ;;  %v5662_v30 = vadd.f32 1e-05, %v2002_v27  ;;  %v2308_v41 = vmul.f32 %v5612_v19, %v2307_v61  ;;  %v1878_v13 = vpop.xlane.xlu0 %1877 }
 0x218   : > { %v5665_v16 = vadd.f32 1e-05, %v2006_v54  ;;  %v1972_v42 = vsub.f32 %v1908_v57, %v5450_v49  ;;  %v1905_v26 = vmul.f32 0.0625, %v1857_v47  ;;  %vm2219_vm14 = vcmp.eq.f32.partialorder %v5366_v39, 0.0 }
 0x219   : > { %v2216_v24 = vmul.f32 %v2215_v56, %v5366_v39  ;;  %v2285_v55 = vmul.f32 0.5, %v2284_v15  ;;  %v2271_v4 = vmul.f32 %v5649_v21, %v5580_v10  ;;  %v2232_v52 = vand.u32 2147483648, %v5452_v36  ;;  %v1869_v2 = vpop.xlane.xlu2 %1868 }
 0x21a   : > { %v1912_v27 = vmul.f32 0.0625, %v1878_v13  ;;  %3580 = vrsqrt.f32 %v5653_v5  ;;  %v1969_v61 = vsub.f32 %v1905_v26, %v5485_v38  ;;  %vm2229_vm9 = vcmp.eq.f32.partialorder %v5452_v36, inf }
 0x21b   : > { %v6443_v49 = vand.u32 2147483648, %v5330_v32  ;;  %v2264_v56 = vmul.f32 %v2263_v25, %v5392_v43  ;;  %v2227_v15 = vmul.f32 %v5541_v23, %v2226_v34  ;;  %v2298_v7 = vsub.f32 1.5, %v2297_v20  ;;  %v6444_v32 = vld [vmem:[#allocation25_spill] sm:$0xff] }
 0x21c   : > { %3582 = vrsqrt.f32 %v5662_v30  ;;  %v2309_v54 = vmul.f32 0.5, %v2308_v41  ;;  %v1976_v6 = vsub.f32 %v1912_v27, %v1944_v17  ;;  %v2004_v38 = vmax.f32 %v1972_v42, 0.0  ;;  %2528 = vmax.xlane.f32.xlu2 %v6444_v32 }
 0x21d   : > { %v5680_v57 = vsel %vm2243_vm10, %v6443_v49, %v2242_v18  ;;  %3584 = vrsqrt.f32 %v5665_v16  ;;  %v2286_v47 = vsub.f32 1.5, %v2285_v55  ;;  %v2272_v26 = vmul.f32 %v5649_v21, %v2271_v4  ;;  %2537 = vmax.xlane.f32.xlu0 %v5035_v45  ;;  %v6445_v18 = vld [vmem:[#allocation28_spill] sm:$0xff]  ;;  %v1875_v55 = vpop.xlane.xlu1 %1874 }
 0x21e   : > { %v1909_v13 = vmul.f32 0.0625, %v1869_v2  ;;  %vm2231_vm0 = vcmp.eq.f32.partialorder %v5452_v36, 0.0  ;;  %vm2267_vm10 = vcmp.eq.f32.partialorder %v5392_v43, 0.0  ;;  %v2008_v23 = vmax.f32 %v1976_v6, 0.0 }
 0x21f   : > { %v2001_v25 = vmax.f32 %v1969_v61, 0.0  ;;  %2638 = vmin.xlane.f32.xlu1 %v6445_v18  ;;  %v2218_v34 = vsel %vm2217_vm12, %v5366_v39, %v2216_v24  ;;  %v2268_v20 = vand.u32 2147483648, %v5392_v43  ;;  %v2228_v17 = vmul.f32 %v2227_v15, %v5452_v36 }
 0x220   : > { %v2299_v41 = vmul.f32 %v5570_v8, %v2298_v7  ;;  %v1973_v42 = vsub.f32 %v1909_v13, %v5604_v63  ;;  %v2266_v45 = vsel %vm2265_vm13, %v5392_v43, %v2264_v56  ;;  %v5702_v4 = vpop.eup %3580  ;;  %v5704_v27 = vadd.f32 1e-05, %v2008_v23  ;;  %v2463_v7 = vpop.xlane.xlu0 %2462 }
 0x221   : > { %v5706_v61 = vadd.f32 1e-05, %v2004_v38  ;;  %v1911_v24 = vmul.f32 0.0625, %v1875_v55  ;;  %v2310_v49 = vsub.f32 1.5, %v2309_v54  ;;  %v5712_v8 = vmul.f32 %v5558_v46, %v5558_v46  ;;  %v2460_v23 = vpop.xlane.xlu2 %2459 }
 0x222   : > { %v5708_v6 = vpop.eup %3582  ;;  %v2287_v63 = vmul.f32 %v5588_v53, %v2286_v47  ;;  %v2273_v15 = vmul.f32 0.5, %v2272_v26  ;;  %v6446_v56 = vand.u32 2147483648, %v5366_v39  ;;  %3586 = vrsqrt.f32 %v5704_v27 }
 0x223   : > { %v5721_v38 = vpop.eup %3584  ;;  %v5724_v54 = vadd.f32 1e-05, %v2001_v25  ;;  %v2005_v13 = vmax.f32 %v1973_v42, 0.0  ;;  %v1975_v46 = vsub.f32 %v1911_v24, %v5608_v48  ;;  %vm2301_vm12 = vcmp.eq.f32.partialorder %v5489_v14, inf }
 0x224   : > { %v5719_v2 = vsel %vm2219_vm14, %v6446_v56, %v2218_v34  ;;  %v2300_v53 = vmul.f32 %v2299_v41, %v5489_v14  ;;  %v2343_v47 = vmul.f32 %v5702_v4, %v5653_v5  ;;  %v2230_v39 = vsel %vm2229_vm9, %v5452_v36, %v2228_v17  ;;  %2546 = vmax.xlane.f32.xlu2 %v5042_v28  ;;  %v6448_v41 = vld [vmem:[#allocation21_spill] sm:$0xff] }
 0x225   : > { %v5736_v26 = vsel %vm2267_vm10, %v2268_v20, %v2266_v45  ;;  %vm2313_vm13 = vcmp.eq.f32.partialorder %v5544_v51, inf  ;;  %v2331_v48 = vmul.f32 %v5708_v6, %v5662_v30  ;;  %3588 = vrsqrt.f32 %v5706_v61  ;;  %2632 = vmin.xlane.f32.xlu0 %v6448_v41  ;;  %v1881_v24 = vpop.xlane.xlu1 %1880 }
 0x226   : > { %6447 = vst [vmem:[#allocation20_spill] sm:$0xff] %v5736_v26  ;;  %v2007_v32 = vmax.f32 %v1975_v46, 0.0  ;;  %v2311_v25 = vmul.f32 %v5612_v19, %v2310_v49  ;;  %v2379_v18 = vmul.f32 %v5721_v38, %v5665_v16  ;;  %v2889_v34 = vperm.slane %v2463_v7, %v4655_v60  ;;  %v6449_v19 = vld [vmem:[#allocation32_spill] sm:$0xff] }
 0x227   : > { %v2888_v43 = vperm.slane %v2460_v23, %v4651_v3  ;;  %v2274_v20 = vsub.f32 1.5, %v2273_v15  ;;  %vm2303_vm14 = vcmp.eq.f32.partialorder %v5489_v14, 0.0  ;;  %v2288_v17 = vmul.f32 %v2287_v63, %v5518_v12  ;;  %2543 = vmax.xlane.f32.xlu1 %v6449_v19 }
 0x228   : > { %3590 = vrsqrt.f32 %v5724_v54  ;;  %v5752_v42 = vadd.f32 1e-05, %v2005_v13  ;;  %v5759_v55 = vsel %vm2231_vm0, %v2232_v52, %v2230_v39  ;;  %vm2289_vm9 = vcmp.eq.f32.partialorder %v5518_v12, inf  ;;  %v5766_v15 = vpop.eup %3586  ;;  %v2466_v13 = vpop.xlane.xlu0 %2465 }
 0x229   : > { %v2344_v28 = vmul.f32 %v5702_v4, %v2343_v47  ;;  %v2890_v45 = vsel %vm2755_vm2, %v2889_v34, %v2888_v43  ;;  %v2292_v63 = vand.u32 2147483648, %v5518_v12  ;;  %v2332_v7 = vmul.f32 %v5708_v6, %v2331_v48  ;;  %v2475_v19 = vpop.xlane.xlu2 %2474 }
 0x22a   : > { %v5769_v56 = vadd.f32 1e-05, %v2007_v32  ;;  %vm2277_vm0 = vcmp.eq.f32.partialorder %v5580_v10, inf  ;;  %v2304_v36 = vand.u32 2147483648, %v5489_v14  ;;  %v2312_v52 = vmul.f32 %v2311_v25, %v5544_v51 }
 0x22b   : > { %v1913_v46 = vmul.f32 0.0625, %v1881_v24  ;;  %v2275_v47 = vmul.f32 %v5649_v21, %v2274_v20  ;;  %vm2291_vm10 = vcmp.eq.f32.partialorder %v5518_v12, 0.0  ;;  %v2380_v39 = vmul.f32 %v5721_v38, %v2379_v18  ;;  %v5779_v48 = vpop.eup %3588 }
 0x22c   : > { %v2403_v23 = vmul.f32 %v5766_v15, %v5704_v27  ;;  %v2891_v32 = vperm.slane %v2466_v13, %v4693_v29  ;;  %3592 = vrsqrt.f32 %v5752_v42  ;;  %vm2315_vm15 = vcmp.eq.f32.partialorder %v5544_v51, 0.0 }
 0x22d   : > { %v2316_v25 = vand.u32 2147483648, %v5544_v51  ;;  %v2345_v34 = vmul.f32 0.5, %v2344_v28  ;;  %vm2279_vm8 = vcmp.eq.f32.partialorder %v5580_v10, 0.0  ;;  %v2302_v21 = vsel %vm2301_vm12, %v5489_v14, %v2300_v53 }
 0x22e   : > { %v2381_v18 = vmul.f32 0.5, %v2380_v39  ;;  %v2404_v43 = vmul.f32 %v5766_v15, %v2403_v23  ;;  %v5790_v20 = vpop.eup %3590  ;;  %v2333_v41 = vmul.f32 0.5, %v2332_v7  ;;  %v5793_v24 = vsel %vm2759_vm3, %v2891_v32, %v2890_v45  ;;  %v6450_v39 = vld [vmem:[#allocation30_spill] sm:$0xff]  ;;  %v6451_v23 = vld [vmem:[#allocation39_spill] sm:$0xff] }
 0x22f   : > { %v2314_v28 = vsel %vm2313_vm13, %v5544_v51, %v2312_v52  ;;  %v2355_v49 = vmul.f32 %v5779_v48, %v5706_v61  ;;  %3594 = vrsqrt.f32 %v5769_v56  ;;  %v1977_v53 = vsub.f32 %v1913_v46, %v5712_v8  ;;  %2647 = vmin.xlane.f32.xlu2 %v6450_v39  ;;  %2650 = vmin.xlane.f32.xlu0 %v6451_v23  ;;  %v6452_v45 = vld [vmem:[#allocation19_spill] sm:$0xff]  ;;  %v2472_v39 = vpop.xlane.xlu1 %2471 }
 0x230   : > { %v2276_v7 = vmul.f32 %v2275_v47, %v5580_v10  ;;  %2641 = vmin.xlane.f32.xlu1 %v6452_v45  ;;  %v5809_v52 = vsel %vm2303_vm14, %v2304_v36, %v2302_v21  ;;  %v2382_v32 = vsub.f32 1.5, %v2381_v18  ;;  %vm2385_vm12 = vcmp.eq.f32.partialorder %v5665_v16, inf  ;;  %v2487_v23 = vpop.xlane.xlu0 %2486 }
 0x231   : > { %v2405_v13 = vmul.f32 0.5, %v2404_v43  ;;  %v6453_v26 = vperm.slane %v5087_v37, %v4651_v3  ;;  %v6454_v8 = vperm.slane %v5211_v50, %v4655_v60  ;;  %v2319_v47 = vmul.f32 %v5790_v20, %v5724_v54 }
 0x232   : > { %v2290_v14 = vsel %vm2289_vm9, %v5518_v12, %v2288_v17  ;;  %v5826_v36 = vsel %vm2315_vm15, %v2316_v25, %v2314_v28  ;;  %v2352_v21 = vand.u32 2147483648, %v5653_v5  ;;  %v5829_v37 = vpop.eup %3592  ;;  %v2896_v50 = vperm.slane %v2475_v19, %v4655_v60 }
 0x233   : > { %v3136_v46 = vsel %vm2755_vm2, %v6454_v8, %v6453_v26  ;;  %v2895_v26 = vperm.slane %v2472_v39, %v4651_v3  ;;  %v2383_v18 = vmul.f32 %v5721_v38, %v2382_v32  ;;  %v2406_v43 = vsub.f32 1.5, %v2405_v13 }
 0x234   : > { %v2009_v45 = vmax.f32 %v1977_v53, 0.0  ;;  %v2278_v17 = vsel %vm2277_vm0, %v5580_v10, %v2276_v7  ;;  %v2346_v51 = vsub.f32 1.5, %v2345_v34  ;;  %v3137_v25 = vperm.slane %v5347_v44, %v4693_v29  ;;  %v2484_v53 = vpop.xlane.xlu2 %2483 }
 0x235   : > { %v2897_v28 = vsel %vm2755_vm2, %v2896_v50, %v2895_v26  ;;  %v5842_v19 = vsel %vm2291_vm10, %v2292_v63, %v2290_v14  ;;  %v2340_v8 = vand.u32 2147483648, %v5662_v30  ;;  %vm2349_vm15 = vcmp.eq.f32.partialorder %v5653_v5, inf  ;;  %v5848_v13 = vpop.eup %3594 }
 0x236   : > { %vm2387_vm13 = vcmp.eq.f32.partialorder %v5665_v16, 0.0  ;;  %v2412_v38 = vand.u32 2147483648, %v5704_v27  ;;  %v5852_v34 = vmul.f32 %v5829_v37, %v5752_v42  ;;  %vm2337_vm14 = vcmp.eq.f32.partialorder %v5662_v30, inf }
 0x237   : > { %v2347_v44 = vmul.f32 %v5702_v4, %v2346_v51  ;;  %v2384_v12 = vmul.f32 %v2383_v18, %v5665_v16  ;;  %vm2409_vm9 = vcmp.eq.f32.partialorder %v5704_v27, inf  ;;  %v3138_v63 = vsel %vm2759_vm3, %v3137_v25, %v3136_v46  ;;  %2549 = vmax.xlane.f32.xlu2 %v5025_v62 }
 0x238   : > { %v6455_v7 = vand.u32 2147483648, %v5580_v10  ;;  %v2334_v39 = vsub.f32 1.5, %v2333_v41  ;;  %v2364_v14 = vand.u32 2147483648, %v5706_v61  ;;  %v2407_v50 = vmul.f32 %v5766_v15, %v2406_v43  ;;  %v6456_v10 = vld [vmem:[#allocation37_spill] sm:$0xff] }
 0x239   : > { %v2903_v4 = vperm.slane %v2487_v23, %v4655_v60  ;;  %v5868_v26 = vadd.f32 1e-05, %v2009_v45  ;;  %v2902_v18 = vperm.slane %v2484_v53, %v4651_v3  ;;  %vm2351_vm0 = vcmp.eq.f32.partialorder %v5653_v5, 0.0  ;;  %2644 = vmin.xlane.f32.xlu0 %v6456_v10  ;;  %v2478_v23 = vpop.xlane.xlu1 %2477 }
 0x23a   : > { %v5863_v32 = vsel %vm2279_vm8, %v6455_v7, %v2278_v17  ;;  %v2356_v46 = vmul.f32 %v5779_v48, %v2355_v49  ;;  %v5877_v41 = vmul.f32 %v5848_v13, %v5769_v56  ;;  %v6457_v17 = vld [vmem:[#allocation42_spill] sm:$0xff]  ;;  %v2328_v15 = vand.u32 2147483648, %v5724_v54 }
 0x23b   : > { %2540 = vmax.xlane.f32.xlu1 %v6457_v17  ;;  %v2335_v43 = vmul.f32 %v5708_v6, %v2334_v39  ;;  %vm2339_vm8 = vcmp.eq.f32.partialorder %v5662_v30, 0.0  ;;  %vm2361_vm10 = vcmp.eq.f32.partialorder %v5706_v61, inf  ;;  %v3141_v62 = vperm.slane %v5179_v40, %v4651_v3  ;;  %v5898_v39 = vpop.xlane.xlu0 %2489 }
 0x23c   : > { %v5887_v49 = vsel %vm2755_vm2, %v2903_v4, %v2902_v18  ;;  %v2348_v45 = vmul.f32 %v2347_v44, %v5653_v5  ;;  %v2357_v51 = vmul.f32 0.5, %v2356_v46  ;;  %v2386_v25 = vsel %vm2385_vm12, %v5665_v16, %v2384_v12  ;;  %v3436_v18 = vld [vmem:[%s6354_s6 + $0x70] sm:$0xff] }
 0x23d   : > { %vm2411_vm11 = vcmp.eq.f32.partialorder %v5704_v27, 0.0  ;;  %v2898_v6 = vperm.slane %v2478_v23, %v4693_v29  ;;  %v2320_v53 = vmul.f32 %v5790_v20, %v2319_v47  ;;  %v2336_v7 = vmul.f32 %v2335_v43, %v5662_v30 }
 0x23e   : > { %v2408_v40 = vmul.f32 %v2407_v50, %v5704_v27  ;;  %3596 = vrsqrt.f32 %v5868_v26  ;;  %vm2325_vm7 = vcmp.eq.f32.partialorder %v5724_v54, inf  ;;  %v2358_v44 = vsub.f32 1.5, %v2357_v51  ;;  %v3437_v50 = vld [vmem:[%s6354_s6 + $0x78] sm:$0xff] }
 0x23f   : > { %vm2363_vm6 = vcmp.eq.f32.partialorder %v5706_v61, 0.0  ;;  %v3139_v12 = vperm.slane %v5401_v35, %v4715_v59  ;;  %v3142_v4 = vperm.slane %v5149_v1, %v4655_v60  ;;  %v2899_v47 = vsel %vm2759_vm3, %v2898_v6, %v2897_v28  ;;  %v2457_v35 = vld [vmem:[#allocation4 + $0xf8] sm:$0xff]  ;;  %3211 = vmatpush.msrb.mxu0 %v3437_v50  ;;  %v2481_v6 = vpop.xlane.xlu2 %2480  ;;  %2659 = vmin.xlane.f32.xlu2 %v5028_v33 }
 0x240   : > { %v2321_v46 = vmul.f32 0.5, %v2320_v53  ;;  %v2376_v10 = vand.u32 2147483648, %v5752_v42  ;;  %v3148_v17 = vperm.slane %v5261_v11, %v4651_v3  ;;  %v2350_v1 = vsel %vm2349_vm15, %v5653_v5, %v2348_v45 }
 0x241   : > { %v2359_v28 = vmul.f32 %v5779_v48, %v2358_v44  ;;  %v6458_v43 = vand.u32 2147483648, %v5665_v16  ;;  %v5928_v51 = vsel %vm2763_vm4, %v3139_v12, %v3138_v63  ;;  %vm2327_vm12 = vcmp.eq.f32.partialorder %v5724_v54, 0.0  ;;  %3212 = vmatpush.msrb.mxu0 %v3436_v18  ;;  %v6459_v12 = vld [vmem:[#allocation38_spill] sm:$0xff]  ;;  %v2585_v18 = vld [vmem:[#allocation5 + $0xf8] sm:$0xff] }
 0x242   : > { %v2322_v53 = vsub.f32 1.5, %v2321_v46  ;;  %v2338_v50 = vsel %vm2337_vm14, %v5662_v30, %v2336_v7  ;;  %v2410_v48 = vsel %vm2409_vm9, %v5704_v27, %v2408_v40  ;;  %v3143_v45 = vsel %vm2755_vm2, %v3142_v4, %v3141_v62  ;;  %2662 = vmin.xlane.f32.xlu0 %v6459_v12  ;;  %v6460_v40 = vld [vmem:[#allocation35_spill] sm:$0xff]  ;;  %v2583_v4 = vld [vmem:[#allocation5 + $0xe8] sm:$0xff] }
 0x243   : > { %v5925_v23 = vsel %vm2387_vm13, %v6458_v43, %v2386_v25  ;;  %v2900_v16 = vperm.slane %v2481_v6, %v4715_v59  ;;  %v2360_v63 = vmul.f32 %v2359_v28, %v5706_v61  ;;  %v2368_v25 = vmul.f32 %v5829_v37, %v5852_v34  ;;  %2653 = vmin.xlane.f32.xlu1 %v6460_v40  ;;  %v2584_v46 = vld [vmem:[#allocation5 + $0xf0] sm:$0xff]  ;;  %v2469_v43 = vpop.xlane.xlu1 %2468  ;;  %v5981_v30 = vpop.xlane.xlu0 %2587 }
 0x244   : > { %v5944_v44 = vsel %vm438_vm1, %v2457_v35, -inf  ;;  %v2905_v7 = vperm.slane %v5898_v39, %v4693_v29  ;;  %v2323_v62 = vmul.f32 %v5790_v20, %v2322_v53  ;;  %v5955_v33 = vsel %vm2351_vm0, %v2352_v21, %v2350_v1  ;;  %v5959_v35 = vpop.eup %3596 }
 0x245   : > { %vm2373_vm15 = vcmp.eq.f32.partialorder %v5752_v42, inf  ;;  %v2400_v34 = vand.u32 2147483648, %v5769_v56  ;;  %v2901_v28 = vsel %vm2763_vm4, %v2900_v16, %v2899_v47  ;;  %v5966_v20 = vsel %vm2339_vm8, %v2340_v8, %v2338_v50 }
 0x246   : > { %v2362_v5 = vsel %vm2361_vm10, %v5706_v61, %v2360_v63  ;;  %v2369_v21 = vmul.f32 0.5, %v2368_v25  ;;  %v2893_v1 = vperm.slane %v2469_v43, %v4715_v59  ;;  %v2324_v6 = vmul.f32 %v2323_v62, %v5724_v54  ;;  %v6461_v43 = vld [vmem:[#allocation14_spill] sm:$0xff] }
 0x247   : > { %v2392_v53 = vmul.f32 %v5848_v13, %v5877_v41  ;;  %v5979_v47 = vsel %vm2411_vm11, %v2412_v38, %v2410_v48  ;;  %vm2375_vm13 = vcmp.eq.f32.partialorder %v5752_v42, 0.0  ;;  %vm2397_vm14 = vcmp.eq.f32.partialorder %v5769_v56, inf  ;;  %v3435_v38 = vld [vmem:[%s6354_s6 + $0x68] sm:$0xff]  ;;  %v3434_v48 = vld [vmem:[%s6354_s6 + $0x60] sm:$0xff] }
 0x248   : > { %v2370_v8 = vsub.f32 1.5, %v2369_v21  ;;  %v5986_v50 = vsel %vm438_vm1, %v2583_v4, inf  ;;  %v5989_v16 = vsel %vm438_vm1, %v2585_v18, inf  ;;  %v5992_v41 = vsel %vm438_vm1, %v2584_v46, inf  ;;  %3213 = vmatpush.msrb.mxu0 %v3435_v38  ;;  %v2499_v18 = vpop.xlane.xlu2 %2498 }
 0x249   : > { %v2894_v27 = vsel %vm2763_vm4, %v2893_v1, %v5793_v24  ;;  %v2326_v63 = vsel %vm2325_vm7, %v5724_v54, %v2324_v6  ;;  %v6009_v25 = vsel %vm2363_vm6, %v2364_v14, %v2362_v5  ;;  %v2393_v12 = vmul.f32 0.5, %v2392_v53  ;;  %v6463_v6 = vld [vmem:[#allocation43_spill] sm:$0xff] }
 0x24a   : > { %vm2399_vm1 = vcmp.eq.f32.partialorder %v5769_v56, 0.0  ;;  %v3011_v24 = vperm.slane %v5981_v30, %v4651_v3  ;;  %v6015_v40 = vsel %vm2814_vm5, %v2901_v28, %v2894_v27  ;;  %v2371_v62 = vmul.f32 %v5829_v37, %v2370_v8  ;;  %3214 = vmatpush.msrb.mxu0 %v3434_v48  ;;  %v6462_v28 = vld [vmem:[#allocation26_spill] sm:$0xff]  ;;  %2665 = vmin.xlane.f32.xlu0 %v6463_v6  ;;  %v6466_v6 = vld [vmem:[#allocation20_spill] sm:$0xff] }
 0x24b   : > { %v2415_v4 = vmul.f32 %v5959_v35, %v5868_v26  ;;  %v2394_v46 = vsub.f32 1.5, %v2393_v12  ;;  %v3144_v61 = vperm.slane %v5408_v9, %v4693_v29  ;;  %v3146_v14 = vperm.slane %v5498_v58, %v4715_v59  ;;  %2656 = vmin.xlane.f32.xlu2 %v6462_v28  ;;  %v2496_v27 = vpop.xlane.xlu1 %2495  ;;  %2552 = vmax.xlane.f32.xlu1 %v5944_v44 }
 0x24c   : > { %v3149_v5 = vperm.slane %v6461_v43, %v4655_v60  ;;  %v6031_v37 = vsel %vm2327_vm12, %v2328_v15, %v2326_v63  ;;  %v2372_v21 = vmul.f32 %v2371_v62, %v5752_v42  ;;  %v2424_v9 = vand.u32 2147483648, %v5868_v26  ;;  %v6464_v15 = vld [vmem:[#allocation23_spill] sm:$0xff]  ;;  %v6058_v62 = vpop.xlane.xlu0 %2602 }
 0x24d   : > { %v2416_v1 = vmul.f32 %v5959_v35, %v2415_v4  ;;  %v2395_v58 = vmul.f32 %v5848_v13, %v2394_v46  ;;  %vm2421_vm6 = vcmp.eq.f32.partialorder %v5868_v26, inf  ;;  %v3145_v53 = vsel %vm2759_vm3, %v3144_v61, %v3143_v45  ;;  %v6465_v61 = vld [vmem:[#allocation16_spill] sm:$0xff] }
 0x24e   : > { %v3150_v54 = vsel %vm2755_vm2, %v3149_v5, %v3148_v17  ;;  %v3151_v8 = vperm.slane %v6464_v15, %v4693_v29  ;;  %v2374_v38 = vsel %vm2373_vm15, %v5752_v42, %v2372_v21  ;;  %vm2423_vm7 = vcmp.eq.f32.partialorder %v5868_v26, 0.0 }
 0x24f   : > { %v2417_v48 = vmul.f32 0.5, %v2416_v1  ;;  %v3147_v13 = vsel %vm2763_vm4, %v3146_v14, %v3145_v53  ;;  %v3153_v45 = vperm.slane %v5627_v31, %v4715_v59  ;;  %v2910_v11 = vperm.slane %v2499_v18, %v4655_v60 }
 0x250   : > { %v2909_v17 = vperm.slane %v2496_v27, %v4651_v3  ;;  %v2396_v63 = vmul.f32 %v2395_v58, %v5769_v56  ;;  %v3152_v12 = vsel %vm2759_vm3, %v3151_v8, %v3150_v54  ;;  %v3155_v14 = vperm.slane %v6465_v61, %v4651_v3 }
 0x251   : > { %v2418_v4 = vsub.f32 1.5, %v2417_v48  ;;  %v3154_v46 = vsel %vm2763_vm4, %v3153_v45, %v3152_v12  ;;  %v3156_v31 = vperm.slane %v5633_v22, %v4655_v60  ;;  %v2377_v18 = vsel %vm2375_vm13, %v2376_v10, %v2374_v38 }
 0x252   : > { %v2911_v44 = vsel %vm2755_vm2, %v2910_v11, %v2909_v17  ;;  %v2398_v43 = vsel %vm2397_vm14, %v5769_v56, %v2396_v63  ;;  %v3158_v5 = vperm.slane %v5719_v2, %v4693_v29  ;;  %v3160_v42 = vperm.slane %v5759_v55, %v4715_v59  ;;  %v2600_v56 = vpop.xlane.xlu2 %2599 }
 0x253   : > { %v2401_v28 = vsel %vm2399_vm1, %v2400_v34, %v2398_v43  ;;  %v2419_v22 = vmul.f32 %v5959_v35, %v2418_v4  ;;  %v3157_v21 = vsel %vm2755_vm2, %v3156_v31, %v3155_v14  ;;  %v3162_v1 = vperm.slane %v5680_v57, %v4651_v3  ;;  %2674 = vmin.xlane.f32.xlu2 %v5986_v50  ;;  %v6467_v57 = vld [vmem:[#allocation40_spill] sm:$0xff]  ;;  %v2591_v38 = vpop.xlane.xlu1 %2590 }
 0x254   : > { %v3159_v10 = vsel %vm2759_vm3, %v3158_v5, %v3157_v21  ;;  %v3163_v2 = vperm.slane %v5647_v0, %v4655_v60  ;;  %v3165_v58 = vperm.slane %v6466_v6, %v4693_v29  ;;  %v3167_v53 = vperm.slane %v5863_v32, %v4715_v59  ;;  %2668 = vmin.xlane.f32.xlu0 %v6467_v57  ;;  %v2508_v11 = vpop.xlane.xlu0 %2507 }
 0x255   : > { %v2420_v34 = vmul.f32 %v2419_v22, %v5868_v26  ;;  %v3161_v35 = vsel %vm2763_vm4, %v3160_v42, %v3159_v10  ;;  %v3169_v55 = vperm.slane %v5842_v19, %v4651_v3  ;;  %v3170_v54 = vperm.slane %v5809_v52, %v4655_v60  ;;  %v6468_v52 = vld [vmem:[#allocation24_spill] sm:$0xff] }
 0x256   : > { %v3164_v0 = vsel %vm2755_vm2, %v3163_v2, %v3162_v1  ;;  %v3172_v15 = vperm.slane %v5826_v36, %v4693_v29  ;;  %v3174_v8 = vperm.slane %v6031_v37, %v4715_v59  ;;  %v3176_v50 = vperm.slane %v5966_v20, %v4651_v3  ;;  %2671 = vmin.xlane.f32.xlu1 %v6468_v52 }
 0x257   : > { %v2422_v32 = vsel %vm2421_vm6, %v5868_v26, %v2420_v34  ;;  %v3166_v19 = vsel %vm2759_vm3, %v3165_v58, %v3164_v0  ;;  %v3177_v27 = vperm.slane %v5955_v33, %v4655_v60  ;;  %v3019_v36 = vperm.slane %v6058_v62, %v4655_v60 }
 0x258   : > { %v2425_v37 = vsel %vm2423_vm7, %v2424_v9, %v2422_v32  ;;  %v3171_v48 = vsel %vm2755_vm2, %v3170_v54, %v3169_v55  ;;  %v3179_v45 = vperm.slane %v6009_v25, %v4693_v29  ;;  %v3168_v20 = vsel %vm2763_vm4, %v3167_v53, %v3166_v19 }
 0x259   : > { %v3173_v17 = vsel %vm2759_vm3, %v3172_v15, %v3171_v48  ;;  %v3178_v33 = vsel %vm2755_vm2, %v3177_v27, %v3176_v50  ;;  %v3181_v63 = vperm.slane %v2377_v18, %v4715_v59  ;;  %v3183_v26 = vperm.slane %v5925_v23, %v4651_v3 }
 0x25a   : > { %v3175_v12 = vsel %vm2763_vm4, %v3174_v8, %v3173_v17  ;;  %v3180_v62 = vsel %vm2759_vm3, %v3179_v45, %v3178_v33  ;;  %v3184_v9 = vperm.slane %v2401_v28, %v4655_v60  ;;  %v3186_v4 = vperm.slane %v5979_v47, %v4693_v29  ;;  %v2502_v5 = vpop.xlane.xlu2 %2501 }
 0x25b   : > { %v3182_v25 = vsel %vm2763_vm4, %v3181_v63, %v3180_v62  ;;  %v3188_v61 = vperm.slane %v2425_v37, %v4715_v59  ;;  %v3190_v14 = vsel %vm2814_vm5, %v3147_v13, %v5928_v51  ;;  %vm6469_vm11 = vcmask 1042434   ;;  %2680 = vmin.xlane.f32.xlu2 %v5989_v16  ;;  %v2493_v39 = vpop.xlane.xlu1 %2492 }
 0x25c   : > { %v3185_v31 = vsel %vm2755_vm2, %v3184_v9, %v3183_v26  ;;  %v3191_v18 = vsel %vm6469_vm11, %v3154_v46, %v3190_v14  ;;  %v3018_v43 = vperm.slane %v2600_v56, %v4651_v3  ;;  %v3012_v23 = vperm.slane %v2591_v38, %v4655_v60  ;;  %v2606_v16 = vpop.xlane.xlu0 %2605  ;;  %vm6476_vm13 = vmmov %vm6469_vm11 }
 0x25d   : > { %v3187_v28 = vsel %vm2759_vm3, %v3186_v4, %v3185_v31  ;;  %vm6470_vm9 = vcmask 1043459   ;;  %v2912_v47 = vperm.slane %v2502_v5, %v4693_v29  ;;  %v2906_v51 = vsel %vm2759_vm3, %v2905_v7, %v5887_v49  ;;  %vm6479_vm1 = vmmov %vm6469_vm11 }
 0x25e   : > { %v3192_v22 = vsel %vm6470_vm9, %v3161_v35, %v3191_v18  ;;  %v3189_v13 = vsel %vm2763_vm4, %v3188_v61, %v3187_v28  ;;  %vm6471_vm0 = vcmask 1044484   ;;  %v3020_v21 = vsel %vm2755_vm2, %v3019_v36, %v3018_v43  ;;  %2677 = vmin.xlane.f32.xlu1 %v5992_v41  ;;  %vm6477_vm14 = vmmov %vm6470_vm9 }
 0x25f   : > { %v3193_v46 = vsel %vm6471_vm0, %v3168_v20, %v3192_v22  ;;  %v3013_v42 = vsel %vm2755_vm2, %v3012_v23, %v3011_v24  ;;  %vm6472_vm8 = vcmask 1045509   ;;  %v2913_v1 = vsel %vm2759_vm3, %v2912_v47, %v2911_v44  ;;  %vm6481_vm7 = vmmov %vm6470_vm9 }
 0x260   : > { %v3194_v10 = vsel %vm6472_vm8, %v3175_v12, %v3193_v46  ;;  %vm6473_vm10 = vcmask 1046534   ;;  %v2907_v7 = vperm.slane %v2493_v39, %v4715_v59  ;;  %vm6474_vm12 = vcmask 1047559   ;;  %vm6480_vm6 = vmmov %vm6472_vm8 }
 0x261   : > { %v3195_v49 = vsel %vm6473_vm10, %v3182_v25, %v3194_v10  ;;  %vm6475_vm15 = vcmask 261120   ;;  %v2916_v56 = vperm.slane %v2508_v11, %v4651_v3  ;;  %v3021_v15 = vperm.slane %v2606_v16, %v4693_v29  ;;  %vm6482_vm11 = vmmov %vm6473_vm10 }
 0x262   : > { %v3196_v2 = vsel %vm6474_vm12, %v3189_v13, %v3195_v49  ;;  %v2908_v30 = vsel %vm2763_vm4, %v2907_v7, %v2906_v51  ;;  %v2594_v6 = vpop.xlane.xlu2 %2593  ;;  %vm6483_vm9 = vmmov %vm6474_vm12 }
 0x263   : > { %3438 = vmatmul.msk.f32.vlgmr.msrb.gmra.mxu0 %vm6475_vm15, %v3196_v2  ;;  %v2945_v24 = vsel %vm6476_vm13, %v2908_v30, %v6015_v40  ;;  %v3014_v44 = vperm.slane %v2594_v6, %v4693_v29  ;;  %v2511_v41 = vpop.xlane.xlu1 %2510  ;;  %v3022_v27 = vsel %vm2759_vm3, %v3021_v15, %v3020_v21  ;;  %v3426_v15 = vld [vmem:[%s6354_s6 + $0x30] sm:$0xff]  ;;  %vm6486_vm10 = vmmov %vm6480_vm6 }
 0x264   : > { %v2917_v34 = vperm.slane %v2511_v41, %v4655_v60  ;;  %v2505_v35 = vpop.xlane.xlu0 %2504  ;;  %vm6487_vm12 = vmmov %vm6482_vm11 }
 0x265   : > { %v3015_v58 = vsel %vm2759_vm3, %v3014_v44, %v3013_v42  ;;  %v2914_v53 = vperm.slane %v2505_v35, %v4715_v59 }
 0x266   : > { %v2918_v55 = vsel %vm2755_vm2, %v2917_v34, %v2916_v56 }
 0x267   : > { %v2915_v57 = vsel %vm2763_vm4, %v2914_v53, %v2913_v1 }
 0x268   : > { %v2946_v40 = vsel %vm6477_vm14, %v2915_v57, %v2945_v24 }
 0x26a   : > { %v2615_v0 = vpop.xlane.xlu2 %2614 }
 0x26b   : > { %v2612_v54 = vpop.xlane.xlu1 %2611  ;;  %v3026_v8 = vperm.slane %v2615_v0, %v4655_v60  ;;  %v3427_v0 = vld [vmem:[%s6354_s6 + $0x38] sm:$0xff] }
 0x26c   : > { %v3025_v32 = vperm.slane %v2612_v54, %v4651_v3  ;;  %v2523_v19 = vpop.xlane.xlu0 %2522  ;;  %2965 = vmatpush.msra.mxu2 %v3427_v0  ;;  %v3432_v54 = vld [vmem:[%s6354_s6 + $0x58] sm:$0xff] }
 0x26d   : > { %v2924_v52 = vperm.slane %v2523_v19, %v4655_v60  ;;  %3088 = vmatpush.msra.mxu3 %v3432_v54  ;;  %v3425_v19 = vld [vmem:[%s6354_s6 + $0x28] sm:$0xff] }
 0x26e   : > { %v3027_v50 = vsel %vm2755_vm2, %v3026_v8, %v3025_v32  ;;  %v3431_v8 = vld [vmem:[%s6354_s6 + $0x50] sm:$0xff]  ;;  %2966 = vmatpush.msra.mxu2 %v3426_v15 }
 0x26f   : > { %3089 = vmatpush.msra.mxu3 %v3431_v8 }
 0x270   : > { %2967 = vmatpush.msra.mxu2 %v3425_v19 }
 0x272   : > { %v2520_v38 = vpop.xlane.xlu2 %2519 }
 0x273   : > { %v2923_v36 = vperm.slane %v2520_v38, %v4651_v3  ;;  %v2514_v48 = vpop.xlane.xlu1 %2513 }
 0x274   : > { %v2919_v45 = vperm.slane %v2514_v48, %v4693_v29  ;;  %v2618_v11 = vpop.xlane.xlu0 %2617 }
 0x275   : > { %v2925_v37 = vsel %vm2755_vm2, %v2924_v52, %v2923_v36  ;;  %v3028_v22 = vperm.slane %v2618_v11, %v4693_v29 }
 0x276   : > { %v2920_v20 = vsel %vm2759_vm3, %v2919_v45, %v2918_v55 }
 0x277   : > { %v3029_v13 = vsel %vm2759_vm3, %v3028_v22, %v3027_v50  ;;  %v3424_v50 = vld [vmem:[%s6354_s6 + $0x20] sm:$0xff] }
 0x278   : > { %2968 = vmatpush.msra.mxu2 %v3424_v50 }
 0x27a   : > { %v2609_v17 = vpop.xlane.xlu2 %2608 }
 0x27b   : > { %v3023_v33 = vperm.slane %v2609_v17, %v4715_v59  ;;  %v2597_v12 = vpop.xlane.xlu1 %2596 }
 0x27c   : > { %v3016_v62 = vperm.slane %v2597_v12, %v4715_v59  ;;  %v2517_v26 = vpop.xlane.xlu0 %2516 }
 0x27d   : > { %v3024_v63 = vsel %vm2763_vm4, %v3023_v33, %v3022_v27  ;;  %v2921_v5 = vperm.slane %v2517_v26, %v4715_v59  ;;  %v3430_v27 = vld [vmem:[%s6354_s6 + $0x48] sm:$0xff] }
 0x27e   : > { %v3017_v9 = vsel %vm2763_vm4, %v3016_v62, %v3015_v58  ;;  %3090 = vmatpush.msra.mxu3 %v3430_v27 }
 0x27f   : > { %v3067_v25 = vsel %vm2814_vm5, %v3024_v63, %v3017_v9  ;;  %v2922_v47 = vsel %vm2763_vm4, %v2921_v5, %v2920_v20  ;;  %vm6478_vm5 = vmmov %vm6471_vm0  ;;  %v3429_v20 = vld [vmem:[%s6354_s6 + $0x40] sm:$0xff] }
 0x280   : > { %v2947_v46 = vsel %vm6478_vm5, %v2922_v47, %v2946_v40  ;;  %3091 = vmatpush.msra.mxu3 %v3429_v20  ;;  %vm6484_vm0 = vmmov %vm6475_vm15 }
 0x281   : > { %vm6485_vm8 = vmmov %vm6478_vm5 }
 0x282   : > { %v2627_v4 = vpop.xlane.xlu2 %2626  ;;  %vm6488_vm15 = vmmov %vm6483_vm9 }
 0x283   : > { %v2624_v61 = vpop.xlane.xlu1 %2623  ;;  %v3033_v14 = vperm.slane %v2627_v4, %v4655_v60  ;;  %vm6489_vm13 = vmmov %vm6484_vm0 }
 0x284   : > { %v3032_v31 = vperm.slane %v2624_v61, %v4651_v3  ;;  %v2535_v18 = vpop.xlane.xlu0 %2534 }
 0x285   : > { %v2931_v17 = vperm.slane %v2535_v18, %v4655_v60 }
 0x286   : > { %v3034_v43 = vsel %vm2755_vm2, %v3033_v14, %v3032_v31 }
 0x28a   : > { %v2532_v23 = vpop.xlane.xlu2 %2531 }
 0x28b   : > { %v2526_v28 = vpop.xlane.xlu1 %2525  ;;  %v2930_v45 = vperm.slane %v2532_v23, %v4651_v3 }
 0x28c   : > { %v6195_v51 = vpop.xlane.xlu0 %2635  ;;  %v2926_v39 = vperm.slane %v2526_v28, %v4693_v29 }
 0x28d   : > { %v2932_v63 = vsel %vm2755_vm2, %v2931_v17, %v2930_v45  ;;  %v2711_v45 = vpop.f32.mrf.mxu0  ;;  %v2847_v20 = vpop.f32.mrf.mxu1 }
 0x28e   : > { %v2927_v24 = vsel %vm2759_vm3, %v2926_v39, %v2925_v37 }
 0x292   : > { %v2630_v21 = vpop.xlane.xlu2 %2629 }
 0x293   : > { %v2621_v42 = vpop.xlane.xlu1 %2620  ;;  %v3035_v2 = vperm.slane %v2630_v21, %v4693_v29 }
 0x294   : > { %v3030_v10 = vperm.slane %v2621_v42, %v4715_v59  ;;  %v2538_v1 = vpop.xlane.xlu0 %2537  ;;  %v3039_v42 = vperm.slane %v6195_v51, %v4651_v3 }
 0x295   : > { %v3036_v56 = vsel %vm2759_vm3, %v3035_v2, %v3034_v43  ;;  %v2933_v62 = vperm.slane %v2538_v1, %v4693_v29 }
 0x296   : > { %v3031_v49 = vsel %vm2763_vm4, %v3030_v10, %v3029_v13 }
 0x297   : > { %v3068_v7 = vsel %vm6479_vm1, %v3031_v49, %v3067_v25  ;;  %v2934_v61 = vsel %vm2759_vm3, %v2933_v62, %v2932_v63 }
 0x29a   : > { %v2529_v16 = vpop.xlane.xlu2 %2528 }
 0x29b   : > { %v2928_v30 = vperm.slane %v2529_v16, %v4715_v59  ;;  %v2639_v44 = vpop.xlane.xlu1 %2638 }
 0x29c   : > { %v2633_v41 = vpop.xlane.xlu0 %2632  ;;  %v3040_v13 = vperm.slane %v2639_v44, %v4655_v60 }
 0x29d   : > { %v2929_v6 = vsel %vm2763_vm4, %v2928_v30, %v2927_v24  ;;  %v3037_v34 = vperm.slane %v2633_v41, %v4715_v59 }
 0x29e   : > { %v2948_v58 = vsel %vm6480_vm6, %v2929_v6, %v2947_v46  ;;  %v3041_v39 = vsel %vm2755_vm2, %v3040_v13, %v3039_v42 }
 0x29f   : > { %v3038_v35 = vsel %vm2763_vm4, %v3037_v34, %v3036_v56 }
 0x2a0   : > { %v6212_v55 = vsel %vm6481_vm7, %v3038_v35, %v3068_v7 }
 0x2a2   : > { %v2547_v53 = vpop.xlane.xlu2 %2546 }
 0x2a3   : > { %v2544_v57 = vpop.xlane.xlu1 %2543  ;;  %v2938_v4 = vperm.slane %v2547_v53, %v4655_v60 }
 0x2a4   : > { %v2651_v32 = vpop.xlane.xlu0 %2650  ;;  %v2937_v26 = vperm.slane %v2544_v57, %v4651_v3 }
 0x2a5   : > { %v3047_v16 = vperm.slane %v2651_v32, %v4655_v60 }
 0x2a6   : > { %v2939_v18 = vsel %vm2755_vm2, %v2938_v4, %v2937_v26  ;;  %v3533_v4 = vld [vmem:[%s6357_s9] ss:$0 sm:$0xff] }
 0x2aa   : > { %v2648_v40 = vpop.xlane.xlu2 %2647 }
 0x2ab   : > { %v2642_v38 = vpop.xlane.xlu1 %2641  ;;  %v3046_v10 = vperm.slane %v2648_v40, %v4651_v3 }
 0x2ac   : > { %v2645_v36 = vpop.xlane.xlu0 %2644  ;;  %v3042_v21 = vperm.slane %v2642_v38, %v4693_v29 }
 0x2ad   : > { %v3044_v24 = vperm.slane %v2645_v36, %v4715_v59  ;;  %v3048_v51 = vsel %vm2755_vm2, %v3047_v16, %v3046_v10  ;;  %v3222_v36 = vld [vmem:[%s6356_s8 + $0x8] sm:$0xff] }
 0x2ae   : > { %v3043_v2 = vsel %vm2759_vm3, %v3042_v21, %v3041_v39 }
 0x2af   : > { %v3045_v44 = vsel %vm2763_vm4, %v3044_v24, %v3043_v2 }
 0x2b0   : > { %v3070_v40 = vsel %vm6485_vm8, %v3045_v44, %v6212_v55 }
 0x2b2   : > { %v2550_v52 = vpop.xlane.xlu2 %2549 }
 0x2b3   : > { %v2541_v37 = vpop.xlane.xlu1 %2540  ;;  %v2940_v25 = vperm.slane %v2550_v52, %v4693_v29 }
 0x2b4   : > { %v2935_v12 = vperm.slane %v2541_v37, %v4715_v59  ;;  %v3221_v37 = vld [vmem:[%s6356_s8] sm:$0xff] }
 0x2b5   : > { %v2663_v33 = vpop.xlane.xlu0 %2662  ;;  %v2941_v23 = vsel %vm2759_vm3, %v2940_v25, %v2939_v18 }
 0x2b6   : > { %v2936_v14 = vsel %vm2763_vm4, %v2935_v12, %v2934_v61  ;;  %v3054_v6 = vperm.slane %v2663_v33, %v4655_v60 }
 0x2b7   : > { %v2949_v5 = vsel %vm6482_vm11, %v2936_v14, %v2948_v58 }
 0x2ba   : > { %v2660_v48 = vpop.xlane.xlu2 %2659 }
 0x2bb   : > { %v2654_v11 = vpop.xlane.xlu1 %2653  ;;  %v3053_v49 = vperm.slane %v2660_v48, %v4651_v3  ;;  %v3532_v48 = vld [vmem:[%s6355_s7] ss:$0 sm:$0xff] }
 0x2bc   : > { %v3049_v7 = vperm.slane %v2654_v11, %v4693_v29  ;;  %v2712_v11 = vadd.f32 %v3532_v48, %v2711_v45 }
 0x2bd   : > { %v2666_v22 = vpop.xlane.xlu0 %2665  ;;  %v3055_v58 = vsel %vm2755_vm2, %v3054_v6, %v3053_v49 }
 0x2be   : > { %v3050_v41 = vsel %vm2759_vm3, %v3049_v7, %v3048_v51  ;;  %v3056_v56 = vperm.slane %v2666_v22, %v4693_v29  ;;  %v2850_v33 = vadd.f32 %v2847_v20, %v2712_v11 }
 0x2c0   : > { %v3057_v0 = vsel %vm2759_vm3, %v3056_v56, %v3055_v58 }
 0x2c2   : > { %v2657_v9 = vpop.xlane.xlu2 %2656 }
 0x2c3   : > { %v2553_v31 = vpop.xlane.xlu1 %2552  ;;  %v3051_v30 = vperm.slane %v2657_v9, %v4715_v59 }
 0x2c4   : > { %v2942_v43 = vperm.slane %v2553_v31, %v4715_v59  ;;  %v3602_v31 = vld [vmem:[%s5534_s24] sm:$0xff] }
 0x2c5   : > { %v3052_v35 = vsel %vm2763_vm4, %v3051_v30, %v3050_v41 }
 0x2c6   : > { %v2943_v28 = vsel %vm2763_vm4, %v2942_v43, %v2941_v23  ;;  %v3071_v32 = vsel %vm6486_vm10, %v3052_v35, %v3070_v40 }
 0x2c7   : > { %v2950_v47 = vsel %vm6483_vm9, %v2943_v28, %v2949_v5  ;;  %v2669_v34 = vpop.xlane.xlu0 %2668 }
 0x2c8   : > { %3428 = vmatmul.msk.f32.vlgmr.msra.gmra.mxu2 %vm6484_vm0, %v2950_v47  ;;  %v3058_v8 = vperm.slane %v2669_v34, %v4715_v59 }
 0x2ca   : > { %v2675_v46 = vpop.xlane.xlu2 %2674 }
 0x2cb   : > { %v2672_v1 = vpop.xlane.xlu1 %2671  ;;  %v3061_v54 = vperm.slane %v2675_v46, %v4655_v60 }
 0x2cc   : > { %v3060_v53 = vperm.slane %v2672_v1, %v4651_v3  ;;  %v3059_v3 = vsel %vm2763_vm4, %v3058_v8, %v3057_v0 }
 0x2cd   : > { %v3072_v55 = vsel %vm6487_vm12, %v3059_v3, %v3071_v32 }
 0x2ce   : > { %v3062_v50 = vsel %vm2755_vm2, %v3061_v54, %v3060_v53  ;;  %vm6490_vm2 = vmmov %vm6484_vm0 }
 0x2d2   : > { %v2681_v57 = vpop.xlane.xlu2 %2680 }
 0x2d3   : > { %v2678_v15 = vpop.xlane.xlu1 %2677  ;;  %v3065_v27 = vperm.slane %v2681_v57, %v4715_v59  ;;  %v3223_v59 = vld [vmem:[%s6356_s8 + $0x10] sm:$0xff] }
 0x2d4   : > { %v3063_v19 = vperm.slane %v2678_v15, %v4693_v29  ;;  %v3224_v29 = vld [vmem:[%s6356_s8 + $0x18] sm:$0xff] }
 0x2d5   : > { %3244 = vmatpush.msrb.mxu1 %v3224_v29 }
 0x2d6   : > { %v3064_v38 = vsel %vm2759_vm3, %v3063_v19, %v3062_v50  ;;  %vm6491_vm3 = vmmov %vm6484_vm0 }
 0x2d7   : > { %v3066_v52 = vsel %vm2763_vm4, %v3065_v27, %v3064_v38  ;;  %3245 = vmatpush.msrb.mxu1 %v3223_v59 }
 0x2d8   : > { %v3073_v60 = vsel %vm6488_vm15, %v3066_v52, %v3072_v55 }
 0x2d9   : > { %3433 = vmatmul.msk.f32.vlgmr.msra.gmra.mxu3 %vm6489_vm13, %v3073_v60  ;;  %3246 = vmatpush.msrb.mxu1 %v3222_v36 }
 0x2db   : > { %3247 = vmatpush.msrb.mxu1 %v3221_v37 }
 0x2e0   : > { %v3216_v26 = vpop.f32.mrf.mxu0 }
 0x34b   : > { %v2970_v17 = vpop.f32.mrf.mxu2 }
 0x34c   : > { %v2973_v63 = vadd.f32 %v2970_v17, %v2850_v33 }
 0x35c   : > { %v3093_v12 = vpop.f32.mrf.mxu3 }
 0x35d   : > { %v3096_v62 = vadd.f32 %v3093_v12, %v2973_v63 }
 0x35f   : > { %v3219_v9 = vadd.f32 %v3216_v26, %v3096_v62 }
 0x361   : > { %v3220_v25 = vmax.f32 %v3219_v9, 0.0 }
 0x363   : > { %3439 = vmatmul.msk.f32.vlgmr.msrb.gmra.mxu1 %vm6490_vm2, %v3220_v25 }
 0x3e0   : > { %v3249_v61 = vpop.f32.mrf.mxu1 }
 0x3e1   : > { %v3250_v14 = vadd.f32 %v3533_v4, %v3249_v61 }
 0x3e3   : > { %v3252_v18 = vadd.f32 %v3602_v31, %v3250_v14 }
 0x3e5   : > { %3253 = vst.msk [vmem:[%s412_s22] sm:$0xff] %vm6491_vm3, %v3252_v18 }
 0x3e6   : > { %3630 = shalt.err (!%p3627_p6)
}
 0x3e7   : > { %3444 = dma.vmem_to_hbm [thread:$0]  (%p3779_p4), %s3268_s16, 128, %s3270_s29, %s3255_s28  }
 0x3e8 PF: > { %p3450_p7 = scmp.ge.s32.totalorder %s3681_s18, 2  ;;  %s3281_s24 = sand.u32 1, %s3661_s13  }
 0x3e9   : > { %s3282_s11 = scalar_lea.sflag [#allocation7], %s3281_s24 }
 0x3ea   : > { %p3447_p9 = pnand %p3450_p7, %p3786_p8 }
 0x3ec   : > { %p3448_p10 = pneg %p3447_p9 }
 0x3ee   : > { %3656 = dma.done.wait (%p3448_p10), %s3282_s11, 128  }
 0x3ef   : > { %3658 = vsyncadd (%p3448_p10), %s3282_s11, 4294967168  ;;  %s23_s18 = sadd.s32 1, %s3681_s18   ;;  %s6492_s16 = sld [smem:[#allocation9_spill]] }
 0x3f0   : > { %p20_p11 = scmp.ge.s32.totalorder %s23_s18, 4   ;;  %s6493_s17 = sld [smem:[#allocation10_spill]] }
 0x3f1   : > { %s6494_s13 = smov %s3665_s14  ;;  %s6495_s14 = smov %s3669_s15 }
 0x3f2   : > { %s6496_s15 = smov %s3792_s26  ;;  %22 = sbr.rel (!%p20_p11) target bundleno = 6 (0x6), region = 115 }
 0x3f7   :  { %3288 = vsyncpa [#allocation7], 1 }
 0x3f8   :  { %3290 = vsyncpa [#allocation7 + $0x1], 1 }

</bundles_post_ra>
